<compile_context>
chip_gen: v6e
topology: v6e:2x2x1
jax: 0.10.0
libtpu: 0.0.40
codegen_flags: <defaults>
</compile_context>

<pallas_src>
import functools
import math

import jax
import jax.numpy as jnp
from jax.experimental import pallas as pl
from jax.experimental.pallas import tpu as pltpu

F32 = jnp.float32
BF16 = jnp.bfloat16
BN_EPS = 1e-5


def _round_up(x, m):
    return ((x + m - 1) // m) * m


# -----------------------------------------------------------------------------
# Fused AttentionGroup kernel: one (batch, row-tile) block per grid step.
# -----------------------------------------------------------------------------
def _attention_group_kernel(x_ref, w_ref, shift_ref, o_ref, *, th, w, c, resident):
    # x_ref:
    #   resident=True : (h_pad+2, w+2, c) -- whole padded image (fetched once per
    #                    batch element; block index constant along the row axis)
    #   resident=False: (th+2,   w+2, c) -- overlapping row window via pl.Element
    if resident:
        row0 = pl.program_id(1) * th
        xt = x_ref[pl.ds(row0, th + 2)]                 # (th+2, w+2, c) f32
    else:
        xt = x_ref[...]                                 # (th+2, w+2, c) f32

    m = th * w
    xtb = xt.astype(BF16)                               # bf16 copy for the MXU path

    # Split-K im2col: one sublane-shifted slab per column offset dj, three cheap
    # row shifts concatenated along channels, K = 3c per matmul, f32 accumulate.
    acc = None
    for dj in range(3):
        slab = xtb[:, dj:dj + w, :]                                        # (th+2, w, c)
        patch = jnp.concatenate([slab[0:th], slab[1:th + 1], slab[2:th + 2]],
                                axis=-1)                                   # (th, w, 3c)
        contrib = jnp.dot(patch.reshape(m, 3 * c), w_ref[dj],
                          preferred_element_type=jnp.float32)              # (m, cm)
        acc = contrib if acc is None else acc + contrib

    y = acc + shift_ref[...]                            # folded conv-bias + BN shift

    # relu(bn(conv_i)) features, one 64-lane slice each.
    f1 = jnp.maximum(y[:, 0 * c:1 * c], 0.0)
    f2 = jnp.maximum(y[:, 1 * c:2 * c], 0.0)
    f3 = jnp.maximum(y[:, 2 * c:3 * c], 0.0)

    # 3-way softmax over the 1x1-conv logits, explicit (VPU/EUP, no XLU reduce).
    l0 = y[:, 3 * c + 0:3 * c + 1]
    l1 = y[:, 3 * c + 1:3 * c + 2]
    l2 = y[:, 3 * c + 2:3 * c + 3]
    mx = jnp.maximum(jnp.maximum(l0, l1), l2)
    e0 = jnp.exp(l0 - mx)
    e1 = jnp.exp(l1 - mx)
    e2 = jnp.exp(l2 - mx)
    r = pl.reciprocal(e0 + e1 + e2, approx=True)

    att = (e0 * r) * f1 + (e1 * r) * f2 + (e2 * r) * f3
    xc = xt[1:th + 1, 1:w + 1, :].reshape(m, c)         # centre tap == x (exact f32)
    o_ref[...] = (xc + att).reshape(th, w, c)


# -----------------------------------------------------------------------------
# VMEM budgeting / tile selection (per chip generation).
# -----------------------------------------------------------------------------
def _vmem_capacity_bytes():
    try:
        info = pltpu.get_tpu_info()
        cap = getattr(info, "vmem_capacity_bytes", None)
        if cap:
            return int(cap)
    except Exception:
        pass
    return 64 * 1024 * 1024          # v7x-sized safe default


def _select_tiling(n, h, w_eff, c, cm, budget):
    """Pick row-tile height th, padded H, and whether the whole image is VMEM-resident."""

    def step_bytes(th, resident, h_pad):
        m = th * w_eff
        x_rows = (h_pad + 2) if resident else (th + 2)
        x_in = 2 * x_rows * (w_eff + 2) * c * 4          # double-buffered input block
        out = 2 * m * c * 4                              # double-buffered output block
        wts = 2 * (3 * 3 * c * cm * 2 + cm * 4)          # bf16 weights + f32 shift
        tmp = (8 * m * cm                                # matmul acc / epilogue (f32)
               + 6 * m * 3 * c                           # bf16 patches / slabs
               + 10 * (th + 2) * (w_eff + 2) * c         # window + bf16 copy
               + 16 * m * c)                             # relu / softmax / att temps
        return x_in + out + wts + tmp

    # keep >=2 grid steps when batch==1 so v7x's two TensorCores both get work
    cap = h if (n >= 2 or h <= 8) else max(8, (h + 1) // 2)
    cands = list(range(8, h + 1, 8))
    if h % 8:
        cands.append(h)

    best_res, best_win = None, None
    for th in cands:
        if th > cap:
            continue
        h_pad = _round_up(h, th)
        if step_bytes(th, True, h_pad) <= budget:
            best_res = th if best_res is None else max(best_res, th)
        if step_bytes(th, False, h_pad) <= budget:
            best_win = th if best_win is None else max(best_win, th)

    if best_res is not None and (best_win is None or best_res >= best_win):
        th, resident = best_res, True
    elif best_win is not None:
        th, resident = best_win, False
    else:
        th, resident = min(h, 8), False
    return th, _round_up(h, th), resident


# -----------------------------------------------------------------------------
# Parameter packing: conv1/conv2/conv3/conv_1x1 -> (3, 3c, cm) bf16 weights
# (taps grouped by column shift dj; BN scale folded in) + f32 shift row.
# -----------------------------------------------------------------------------
def _pack_params(params, c, cm):
    convs = [params['conv1'], params['conv2'], params['conv3']]
    scales = [cp['gamma'] * jax.lax.rsqrt(cp['var'] + BN_EPS) for cp in convs]
    pad_cols = cm - (3 * c + 3)

    dj_blocks = []
    for dj in range(3):
        rows = []
        for di in range(3):
            cols = [convs[k]['w'][di, dj] * scales[k][None, :] for k in range(3)]  # (c,c) each
            cols.append(params['conv_1x1']['w'] if (di == 1 and dj == 1)
                        else jnp.zeros((c, 3), F32))
            cols.append(jnp.zeros((c, pad_cols), F32))
            rows.append(jnp.concatenate(cols, axis=-1))          # (c, cm)
        dj_blocks.append(jnp.concatenate(rows, axis=0))          # (3c, cm)
    w_all = jnp.stack(dj_blocks, axis=0).astype(BF16)            # (3, 3c, cm)

    shifts = [(cp['b'] - cp['mean']) * s + cp['beta'] for cp, s in zip(convs, scales)]
    shifts.append(params['conv_1x1']['b'])
    shifts.append(jnp.zeros((pad_cols,), F32))
    shift = jnp.concatenate(shifts).reshape(1, cm)
    return w_all, shift


# -----------------------------------------------------------------------------
# Public wrapper (NCHW in / NCHW out)
# -----------------------------------------------------------------------------
def attention_group_forward(params, x_nchw):
    x = jnp.transpose(x_nchw.astype(F32), (0, 2, 3, 1))          # NCHW -> NHWC
    n, h, w, c = x.shape

    cm = _round_up(3 * c + 3, 128)                               # lane-pad packed outputs
    w_eff = _round_up(w, 8)                                      # sublane-friendly width

    phys = _vmem_capacity_bytes()
    vmem_limit = min(int(phys * 7 // 10), 100 * 1024 * 1024)     # ~44 MiB v7x, ~89 MiB v5e/v6e
    th, h_pad, resident = _select_tiling(n, h, w_eff, c, cm, vmem_limit * 6 // 10)
    t = h_pad // th

    # Single zero-pad pass: 1-halo top/left, halo + round-up on bottom/right.
    xp = jnp.pad(x, ((0, 0), (1, 1 + h_pad - h), (1, 1 + w_eff - w), (0, 0)))

    w_all, shift = _pack_params(params, c, cm)

    if resident:
        # Whole padded image per batch element; block index is constant along the
        # row-tile axis so it is only DMA'd when the batch index changes.
        x_spec = pl.BlockSpec((None, h_pad + 2, w_eff + 2, c), lambda i, j: (i, 0, 0, 0))
    else:
        # Large images: overlapping row windows expressed in the BlockSpec itself
        # (element-offset index map), no wrapper-side duplication in HBM.
        x_spec = pl.BlockSpec((None, pl.Element(th + 2), w_eff + 2, c),
                              lambda i, j: (i, j * th, 0, 0))

    out = pl.pallas_call(
        functools.partial(_attention_group_kernel, th=th, w=w_eff, c=c, resident=resident),
        out_shape=jax.ShapeDtypeStruct((n, h_pad, w_eff, c), F32),
        grid=(n, t),
        in_specs=[
            x_spec,
            pl.BlockSpec((3, 3 * c, cm), lambda i, j: (0, 0, 0)),   # constant: fetched once
            pl.BlockSpec((1, cm), lambda i, j: (0, 0)),
        ],
        out_specs=pl.BlockSpec((None, th, w_eff, c), lambda i, j: (i, j, 0, 0)),
        compiler_params=pltpu.CompilerParams(
            dimension_semantics=("parallel", "parallel"),           # megacore-friendly
            vmem_limit_bytes=int(vmem_limit),
        ),
    )(xp, w_all, shift)

    out = out[:, :h, :w, :]
    return jnp.transpose(out, (0, 3, 1, 2))                         # NHWC -> NCHW


# -----------------------------------------------------------------------------
# Pure-JAX reference (same eval-mode semantics) for validation.
# -----------------------------------------------------------------------------
def attention_group_reference(params, x_nchw):
    x = jnp.transpose(x_nchw.astype(F32), (0, 2, 3, 1))

    def conv_bn_relu(cp):
        y = jax.lax.conv_general_dilated(
            x, cp['w'], window_strides=(1, 1), padding=((1, 1), (1, 1)),
            dimension_numbers=('NHWC', 'HWIO', 'NHWC'),
            precision=jax.lax.Precision.HIGHEST)
        s = cp['gamma'] * jax.lax.rsqrt(cp['var'] + BN_EPS)
        y = (y + cp['b'] - cp['mean']) * s + cp['beta']
        return jnp.maximum(y, 0.0)

    x1 = conv_bn_relu(params['conv1'])
    x2 = conv_bn_relu(params['conv2'])
    x3 = conv_bn_relu(params['conv3'])
    logits = jnp.einsum('nhwc,cd->nhwd', x, params['conv_1x1']['w'],
                        precision=jax.lax.Precision.HIGHEST) + params['conv_1x1']['b']
    s = jax.nn.softmax(logits, axis=-1)
    att = s[..., 0:1] * x1 + s[..., 1:2] * x2 + s[..., 2:3] * x3
    return jnp.transpose(x + att, (0, 3, 1, 2))


# -----------------------------------------------------------------------------
# Deterministic parameter construction (shapes follow the PyTorch __init__;
# BatchNorm carries PyTorch eval-mode defaults).
# -----------------------------------------------------------------------------
def make_params(key, c):
    ks = jax.random.split(key, 4)

    def conv3(k):
        kw, kb = jax.random.split(k)
        return {
            'w': jax.random.normal(kw, (3, 3, c, c), F32) * math.sqrt(2.0 / (9 * c)),
            'b': jax.random.normal(kb, (c,), F32) * 0.01,
            'gamma': jnp.ones((c,), F32),
            'beta': jnp.zeros((c,), F32),
            'mean': jnp.zeros((c,), F32),
            'var': jnp.ones((c,), F32),
        }

    kw1, kb1 = jax.random.split(ks[3])
    return {
        'conv1': conv3(ks[0]),
        'conv2': conv3(ks[1]),
        'conv3': conv3(ks[2]),
        'conv_1x1': {
            'w': jax.random.normal(kw1, (c, 3), F32) * math.sqrt(1.0 / c),
            'b': jax.random.normal(kb1, (3,), F32) * 0.01,
        },
    }


if __name__ == "__main__":
    key = jax.random.PRNGKey(0)
    kp, kx = jax.random.split(key)

    C = 64                                       # num_channels (lane-friendly, still small)
    params = make_params(kp, C)
    x = jax.random.normal(kx, (2, C, 16, 16), F32)    # NCHW

    y = attention_group_forward(params, x)
    y = jax.block_until_ready(y)

    assert y.shape == x.shape, y.shape
    assert bool(jnp.all(jnp.isfinite(y)))

    y_ref = attention_group_reference(params, x)
    err = float(jnp.max(jnp.abs(y - y_ref)))
    assert err < 5e-2, f"max abs err vs reference: {err}"

    print("KERNEL_OK")
</pallas_src>

<mosaic_0001>
module attributes {stable_mosaic.version = 11 : i64} {
  func.func @_attention_group_kernel(%arg0: i32, %arg1: i32, %arg2: memref<1x18x18x64xf32, #tpu.memory_space<vmem>>, %arg3: memref<3x192x256xbf16, #tpu.memory_space<vmem>>, %arg4: memref<1x256xf32, #tpu.memory_space<vmem>>, %arg5: memref<1x16x16x64xf32, #tpu.memory_space<vmem>>) attributes {dimension_semantics = [#tpu.dimension_semantics<parallel>, #tpu.dimension_semantics<parallel>], iteration_bounds = array<i64: 2, 1>, scalar_prefetch = 0 : i64, scratch_operands = 0 : i64, tpu.core_type = #tpu.core_type<tc>, window_params = [{transform_indices = @transform_0, window_bounds = array<i64: 1, 18, 18, 64>}, {pipeline_mode = #tpu.pipeline_mode<synchronous>, transform_indices = @transform_1, window_bounds = array<i64: 3, 192, 256>}, {pipeline_mode = #tpu.pipeline_mode<synchronous>, transform_indices = @transform_2, window_bounds = array<i64: 1, 256>}, {transform_indices = @transform_3, window_bounds = array<i64: 1, 16, 16, 64>}]} {
    %c16_i32 = arith.constant 16 : i32
    %0 = arith.muli %arg1, %c16_i32 : i32
    %c0 = arith.constant 0 : index
    %1 = arith.index_cast %0 : i32 to index
    %c0_0 = arith.constant 0 : index
    %c0_1 = arith.constant 0 : index
    %2 = vector.load %arg2[%c0, %1, %c0_0, %c0_1] : memref<1x18x18x64xf32, #tpu.memory_space<vmem>>, vector<1x18x18x64xf32>
    %3 = vector.shape_cast %2 : vector<1x18x18x64xf32> to vector<18x18x64xf32>
    %4 = arith.truncf %3 : vector<18x18x64xf32> to vector<18x18x64xbf16>
    %5 = vector.extract_strided_slice %4 {offsets = [0, 0, 0], sizes = [18, 16, 64], strides = [1, 1, 1]} : vector<18x18x64xbf16> to vector<18x16x64xbf16>
    %6 = vector.extract_strided_slice %5 {offsets = [0, 0, 0], sizes = [16, 16, 64], strides = [1, 1, 1]} : vector<18x16x64xbf16> to vector<16x16x64xbf16>
    %7 = vector.extract_strided_slice %5 {offsets = [1, 0, 0], sizes = [16, 16, 64], strides = [1, 1, 1]} : vector<18x16x64xbf16> to vector<16x16x64xbf16>
    %8 = vector.extract_strided_slice %5 {offsets = [2, 0, 0], sizes = [16, 16, 64], strides = [1, 1, 1]} : vector<18x16x64xbf16> to vector<16x16x64xbf16>
    %9 = tpu.concatenate %6, %7, %8 in 2 : vector<16x16x64xbf16>, vector<16x16x64xbf16>, vector<16x16x64xbf16> -> vector<16x16x192xbf16>
    %10 = vector.shape_cast %9 : vector<16x16x192xbf16> to vector<256x192xbf16>
    %c0_2 = arith.constant 0 : index
    %c0_3 = arith.constant 0 : index
    %c0_4 = arith.constant 0 : index
    %11 = vector.load %arg3[%c0_2, %c0_3, %c0_4] : memref<3x192x256xbf16, #tpu.memory_space<vmem>>, vector<1x192x256xbf16>
    %12 = vector.shape_cast %11 : vector<1x192x256xbf16> to vector<192x256xbf16>
    %cst = arith.constant dense<0.000000e+00> : vector<256x256xf32>
    %13 = tpu.matmul %10, %12, %cst {dimension_numbers = #tpu.dot_dimension_numbers<[1], [0], [0], [1], [0, 0, 1, 1], [], []>} : vector<256x192xbf16>, vector<192x256xbf16>, vector<256x256xf32> -> vector<256x256xf32>
    %14 = vector.extract_strided_slice %4 {offsets = [0, 1, 0], sizes = [18, 16, 64], strides = [1, 1, 1]} : vector<18x18x64xbf16> to vector<18x16x64xbf16>
    %15 = vector.extract_strided_slice %14 {offsets = [0, 0, 0], sizes = [16, 16, 64], strides = [1, 1, 1]} : vector<18x16x64xbf16> to vector<16x16x64xbf16>
    %16 = vector.extract_strided_slice %14 {offsets = [1, 0, 0], sizes = [16, 16, 64], strides = [1, 1, 1]} : vector<18x16x64xbf16> to vector<16x16x64xbf16>
    %17 = vector.extract_strided_slice %14 {offsets = [2, 0, 0], sizes = [16, 16, 64], strides = [1, 1, 1]} : vector<18x16x64xbf16> to vector<16x16x64xbf16>
    %18 = tpu.concatenate %15, %16, %17 in 2 : vector<16x16x64xbf16>, vector<16x16x64xbf16>, vector<16x16x64xbf16> -> vector<16x16x192xbf16>
    %19 = vector.shape_cast %18 : vector<16x16x192xbf16> to vector<256x192xbf16>
    %c1 = arith.constant 1 : index
    %c0_5 = arith.constant 0 : index
    %c0_6 = arith.constant 0 : index
    %20 = vector.load %arg3[%c1, %c0_5, %c0_6] : memref<3x192x256xbf16, #tpu.memory_space<vmem>>, vector<1x192x256xbf16>
    %21 = vector.shape_cast %20 : vector<1x192x256xbf16> to vector<192x256xbf16>
    %cst_7 = arith.constant dense<0.000000e+00> : vector<256x256xf32>
    %22 = tpu.matmul %19, %21, %cst_7 {dimension_numbers = #tpu.dot_dimension_numbers<[1], [0], [0], [1], [0, 0, 1, 1], [], []>} : vector<256x192xbf16>, vector<192x256xbf16>, vector<256x256xf32> -> vector<256x256xf32>
    %23 = arith.addf %13, %22 : vector<256x256xf32>
    %24 = vector.extract_strided_slice %4 {offsets = [0, 2, 0], sizes = [18, 16, 64], strides = [1, 1, 1]} : vector<18x18x64xbf16> to vector<18x16x64xbf16>
    %25 = vector.extract_strided_slice %24 {offsets = [0, 0, 0], sizes = [16, 16, 64], strides = [1, 1, 1]} : vector<18x16x64xbf16> to vector<16x16x64xbf16>
    %26 = vector.extract_strided_slice %24 {offsets = [1, 0, 0], sizes = [16, 16, 64], strides = [1, 1, 1]} : vector<18x16x64xbf16> to vector<16x16x64xbf16>
    %27 = vector.extract_strided_slice %24 {offsets = [2, 0, 0], sizes = [16, 16, 64], strides = [1, 1, 1]} : vector<18x16x64xbf16> to vector<16x16x64xbf16>
    %28 = tpu.concatenate %25, %26, %27 in 2 : vector<16x16x64xbf16>, vector<16x16x64xbf16>, vector<16x16x64xbf16> -> vector<16x16x192xbf16>
    %29 = vector.shape_cast %28 : vector<16x16x192xbf16> to vector<256x192xbf16>
    %c2 = arith.constant 2 : index
    %c0_8 = arith.constant 0 : index
    %c0_9 = arith.constant 0 : index
    %30 = vector.load %arg3[%c2, %c0_8, %c0_9] : memref<3x192x256xbf16, #tpu.memory_space<vmem>>, vector<1x192x256xbf16>
    %31 = vector.shape_cast %30 : vector<1x192x256xbf16> to vector<192x256xbf16>
    %cst_10 = arith.constant dense<0.000000e+00> : vector<256x256xf32>
    %32 = tpu.matmul %29, %31, %cst_10 {dimension_numbers = #tpu.dot_dimension_numbers<[1], [0], [0], [1], [0, 0, 1, 1], [], []>} : vector<256x192xbf16>, vector<192x256xbf16>, vector<256x256xf32> -> vector<256x256xf32>
    %33 = arith.addf %23, %32 : vector<256x256xf32>
    %c0_11 = arith.constant 0 : index
    %c0_12 = arith.constant 0 : index
    %34 = vector.load %arg4[%c0_11, %c0_12] : memref<1x256xf32, #tpu.memory_space<vmem>>, vector<1x256xf32>
    %35 = vector.broadcast %34 : vector<1x256xf32> to vector<256x256xf32>
    %36 = arith.addf %33, %35 : vector<256x256xf32>
    %37 = vector.extract_strided_slice %36 {offsets = [0, 0], sizes = [256, 64], strides = [1, 1]} : vector<256x256xf32> to vector<256x64xf32>
    %cst_13 = arith.constant 0.000000e+00 : f32
    %38 = vector.broadcast %cst_13 : f32 to vector<256x64xf32>
    %39 = arith.maximumf %37, %38 : vector<256x64xf32>
    %40 = vector.extract_strided_slice %36 {offsets = [0, 64], sizes = [256, 64], strides = [1, 1]} : vector<256x256xf32> to vector<256x64xf32>
    %cst_14 = arith.constant 0.000000e+00 : f32
    %41 = vector.broadcast %cst_14 : f32 to vector<256x64xf32>
    %42 = arith.maximumf %40, %41 : vector<256x64xf32>
    %43 = vector.extract_strided_slice %36 {offsets = [0, 128], sizes = [256, 64], strides = [1, 1]} : vector<256x256xf32> to vector<256x64xf32>
    %cst_15 = arith.constant 0.000000e+00 : f32
    %44 = vector.broadcast %cst_15 : f32 to vector<256x64xf32>
    %45 = arith.maximumf %43, %44 : vector<256x64xf32>
    %46 = vector.extract_strided_slice %36 {offsets = [0, 192], sizes = [256, 1], strides = [1, 1]} : vector<256x256xf32> to vector<256x1xf32>
    %47 = vector.extract_strided_slice %36 {offsets = [0, 193], sizes = [256, 1], strides = [1, 1]} : vector<256x256xf32> to vector<256x1xf32>
    %48 = vector.extract_strided_slice %36 {offsets = [0, 194], sizes = [256, 1], strides = [1, 1]} : vector<256x256xf32> to vector<256x1xf32>
    %49 = arith.maximumf %46, %47 : vector<256x1xf32>
    %50 = arith.maximumf %49, %48 : vector<256x1xf32>
    %51 = arith.subf %46, %50 : vector<256x1xf32>
    %52 = math.exp %51 : vector<256x1xf32>
    %53 = arith.subf %47, %50 : vector<256x1xf32>
    %54 = math.exp %53 : vector<256x1xf32>
    %55 = arith.subf %48, %50 : vector<256x1xf32>
    %56 = math.exp %55 : vector<256x1xf32>
    %57 = arith.addf %52, %54 : vector<256x1xf32>
    %58 = arith.addf %57, %56 : vector<256x1xf32>
    %59 = tpu.reciprocal %58 {approx = true} : vector<256x1xf32> -> vector<256x1xf32>
    %60 = arith.mulf %52, %59 : vector<256x1xf32>
    %61 = vector.broadcast %60 : vector<256x1xf32> to vector<256x64xf32>
    %62 = arith.mulf %61, %39 : vector<256x64xf32>
    %63 = arith.mulf %54, %59 : vector<256x1xf32>
    %64 = vector.broadcast %63 : vector<256x1xf32> to vector<256x64xf32>
    %65 = arith.mulf %64, %42 : vector<256x64xf32>
    %66 = arith.addf %62, %65 : vector<256x64xf32>
    %67 = arith.mulf %56, %59 : vector<256x1xf32>
    %68 = vector.broadcast %67 : vector<256x1xf32> to vector<256x64xf32>
    %69 = arith.mulf %68, %45 : vector<256x64xf32>
    %70 = arith.addf %66, %69 : vector<256x64xf32>
    %71 = vector.extract_strided_slice %3 {offsets = [1, 1, 0], sizes = [16, 16, 64], strides = [1, 1, 1]} : vector<18x18x64xf32> to vector<16x16x64xf32>
    %72 = vector.shape_cast %71 : vector<16x16x64xf32> to vector<256x64xf32>
    %73 = arith.addf %72, %70 : vector<256x64xf32>
    %74 = vector.shape_cast %73 : vector<256x64xf32> to vector<16x16x64xf32>
    %c0_16 = arith.constant 0 : index
    %c0_17 = arith.constant 0 : index
    %c0_18 = arith.constant 0 : index
    %c0_19 = arith.constant 0 : index
    %75 = vector.load %arg5[%c0_16, %c0_17, %c0_18, %c0_19] : memref<1x16x16x64xf32, #tpu.memory_space<vmem>>, vector<1x16x16x64xf32>
    %76 = vector.shape_cast %75 : vector<1x16x16x64xf32> to vector<16x16x64xf32>
    %77 = vector.shape_cast %74 : vector<16x16x64xf32> to vector<1x16x16x64xf32>
    tpu.vector_store %arg5[%c0_16, %c0_17, %c0_18, %c0_19], %77 {strides = array<i32>} : memref<1x16x16x64xf32, #tpu.memory_space<vmem>>, vector<1x16x16x64xf32>,
    return
  }
  func.func @transform_0(%arg0: i32, %arg1: i32) -> (i32, i32, i32, i32) {
    %c0_i32 = arith.constant 0 : i32
    %c0_i32_0 = arith.constant 0 : i32
    %c0_i32_1 = arith.constant 0 : i32
    %c0_i32_2 = arith.constant 0 : i32
    return %arg0, %c0_i32, %c0_i32_0, %c0_i32_1 : i32, i32, i32, i32
  }
  func.func @transform_1(%arg0: i32, %arg1: i32) -> (i32, i32, i32) {
    %c0_i32 = arith.constant 0 : i32
    %c0_i32_0 = arith.constant 0 : i32
    %c0_i32_1 = arith.constant 0 : i32
    %c0_i32_2 = arith.constant 0 : i32
    return %c0_i32, %c0_i32_0, %c0_i32_1 : i32, i32, i32
  }
  func.func @transform_2(%arg0: i32, %arg1: i32) -> (i32, i32) {
    %c0_i32 = arith.constant 0 : i32
    %c0_i32_0 = arith.constant 0 : i32
    %c0_i32_1 = arith.constant 0 : i32
    return %c0_i32, %c0_i32_0 : i32, i32
  }
  func.func @transform_3(%arg0: i32, %arg1: i32) -> (i32, i32, i32, i32) {
    %c0_i32 = arith.constant 0 : i32
    %c0_i32_0 = arith.constant 0 : i32
    %c0_i32_1 = arith.constant 0 : i32
    return %arg0, %arg1, %c0_i32, %c0_i32_0 : i32, i32, i32, i32
  }
}

</mosaic_0001>

<bundles_post_ra>
// kernel: tpu_custom_call.1
= control target key start
LH: loop header
LB: loop body
LE: loop exit
PB: predicated region body
PF: predicated region fallthrough
CT: control target
= control target key end

     0   :  { %8 = vsyncpa [#allocation3], 0  ;;  %s9096_s0 = inlined_call_operand.vmem [shape: f32[2,18,18,64], index: 0, kind: input, shape index: {}]   ;;  %s9097_s1 = inlined_call_operand.vmem [shape: bf16[3,192,256], index: 1, kind: input, shape index: {}]   ;;  %s9098_s2 = inlined_call_operand.vmem [shape: f32[1,256], index: 2, kind: input, shape index: {}]   ;;  %s9099_s3 = inlined_call_operand.hbm [shape: f32[2,16,16,64], index: 3, kind: output, shape index: {}]  }
   0x1   :  { %10 = vsyncpa [#allocation3 + $0x1], 0  ;;  %s5737_s12 = smov 0   ;;  %s5739_s13 = smov 0  }
   0x2   :  { %s5741_s14 = smov 0   ;;  %s5743_s15 = smov 0  }
   0x3   :  { %s5745_s16 = smov 0   ;;  %s5747_s17 = smov 0  }
   0x4 LB: > { %s4877_s18 = sadd.s32 4294967295, %s5704_s17   ;;  %s4878_s19 = sadd.s32 4294967294, %s5704_s17   ;;  %s5704_s17 = sphi %s5747_s17, %s16_s17   ;;  %s5700_s16 = sphi %s5745_s16, %s9823_s16   ;;  %s5696_s15 = sphi %s5743_s15, %s9822_s15   ;;  %s5692_s14 = sphi %s5741_s14, %s9821_s14   ;;  %s5688_s13 = sphi %s5739_s13, %s9820_s13   ;;  %s5684_s12 = sphi %s5737_s12, %s9819_s12  }
   0x5   : > { %s28_s20 = sadd.s32 1, %s5700_s16  ;;  %s105_s21 = sadd.s32 1, %s5692_s14 }
   0x6   : > { %p30_p0 = scmp.ge.s32.totalorder %s28_s20, 2  ;;  %p115_p1 = scmp.ne.s32.totalorder %s5692_s14, %s5688_s13 }
   0x7   : > { %p116_p2 = scmp.eq.s32.totalorder %s4877_s18, 1  ;;  %p121_p3 = scmp.ne.s32.totalorder %s5688_s13, %s5684_s12 }
   0x8   : > { %s9825_s20 = smov (%p30_p0, %s28_s20), 0  ;;  %p122_p5 = scmp.eq.s32.totalorder %s4878_s19, 1 }
   0x9   : > { %p5777_p4 = por %p116_p2, %p115_p1  ;;  %s100_s23 = ssub.s32 %s5700_s16, %s9825_s20 }
   0xa   : > { %p4881_p6 = scmp.ge.s32.totalorder %s5704_s17, 1  ;;  %p103_p7 = scmp.eq.s32.totalorder %s100_s23, 0 }
   0xb   : > { %p5784_p8 = por %p122_p5, %p121_p3  ;;  %p154_p9 = scmp.lt.s32.totalorder %s5704_s17, 3 }
   0xc   : > { %s5790_s25 = scalar_select %p103_p7, %s5692_s14, %s105_s21  }
   0xd   : > { %p155_p10 = pnand %p4881_p6, %p154_p9 }
   0xf   : > { %158 = sbr.rel (%p155_p10) target bundleno = 1480 (0x5c8), region = 32 }
  0x14   : > { %p178_p11 = scmp.lt.s32.totalorder %s5696_s15, 1  ;;  %v5216_v0 = vld [vmem:[%s9097_s1 + $0x134] ss:$8 sps:$4 sm:$0xff]   ;;  %v5218_v1 = vld [vmem:[%s9097_s1 + $0x130] ss:$8 sps:$4 sm:$0xff]   ;;  %s5706_s28 = smov 64  }
  0x15   : > { %1045 = vmatprep.subr.bf16.mxu0 %v5216_v0  ;;  %v5219_v2 = vld [vmem:[%s9097_s1 + $0x124] ss:$8 sps:$4 sm:$0xff]   ;;  %5058 = vmatprep.subr.bf16.mxu1 %v5216_v0  ;;  %v5221_v3 = vld [vmem:[%s9097_s1 + $0x120] ss:$8 sps:$4 sm:$0xff]   ;;  %v5222_v4 = vld [vmem:[%s9097_s1 + $0x114] ss:$8 sps:$4 sm:$0xff]  }
  0x16   : > { %s179_s30 = scalar_select %p178_p11, %s5696_s15, 1  ;;  %1046 = vmatpush1.bf16.msra.mxu0 %v5218_v1  ;;  %5070 = vmatpush1.bf16.msra.mxu1 %v5218_v1  ;;  %v5224_v5 = vld [vmem:[%s9097_s1 + $0x110] ss:$8 sps:$4 sm:$0xff]   ;;  %v5225_v6 = vld [vmem:[%s9097_s1 + $0x104] ss:$8 sps:$4 sm:$0xff]   ;;  %vm326_vm1 = vcmask 523264  }
  0x17   : > { %1047 = vmatprep.subr.bf16.mxu0 %v5219_v2  ;;  %5059 = vmatprep.subr.bf16.mxu1 %v5219_v2  ;;  %v5227_v21 = vld [vmem:[%s9097_s1 + $0x100] ss:$8 sps:$4 sm:$0xff]   ;;  %v5228_v24 = vld [vmem:[%s9097_s1 + $0xf4] ss:$8 sps:$4 sm:$0xff]   ;;  %v5230_v29 = vld [vmem:[%s9097_s1 + $0xf0] ss:$8 sps:$4 sm:$0xff]  }
  0x18   : > { %s5082_s8 = smul.u32 432, %s179_s30  ;;  %v5231_v48 = vld [vmem:[%s9097_s1 + $0xe4] ss:$8 sps:$4 sm:$0xff]   ;;  %v5233_v49 = vld [vmem:[%s9097_s1 + $0xe0] ss:$8 sps:$4 sm:$0xff]   ;;  %vm1617_vm2 = vcmask 1046528  }
  0x19   : > { %v5234_v52 = vld [vmem:[%s9097_s1 + $0xd4] ss:$8 sps:$4 sm:$0xff]   ;;  %v5236_v55 = vld [vmem:[%s9097_s1 + $0xd0] ss:$8 sps:$4 sm:$0xff]   ;;  %v5237_v59 = vld [vmem:[%s9097_s1 + $0xc4] ss:$8 sps:$4 sm:$0xff]  }
  0x1a   : > { %s5812_s19 = scalar_lea.vmem %s9096_s0, %s5082_s8  ;;  %1048 = vmatpush1.bf16.msra.mxu0 %v5221_v3  ;;  %5071 = vmatpush1.bf16.msra.mxu1 %v5221_v3  ;;  %v5239_v3 = vld [vmem:[%s9097_s1 + $0xc0] ss:$8 sps:$4 sm:$0xff]   ;;  %vm511_vm0 = vsmask.f32 7424  ;;  %s5707_s23 = smov 127  }
  0x1b   : > { %v197_v7 = vld [vmem:[%s5812_s19 + $0x48] sm:$0xff]  ;;  %v198_v8 = vld [vmem:[%s5812_s19 + $0x50] sm:$0xff]  ;;  %v191_v9 = vld [vmem:[%s5812_s19 + $0x18] sm:$0xff]  ;;  %1049 = vmatprep.subr.bf16.mxu0 %v5222_v4  ;;  %5060 = vmatprep.subr.bf16.mxu1 %v5222_v4  ;;  %s5708_s26 = smov 126   ;;  %s5709_s27 = smov 1  }
  0x1c   : > { %v5823_v10 = vpack.c.bf16 %v198_v8, %v197_v7  ;;  %v192_v11 = vld [vmem:[%s5812_s19 + $0x20] sm:$0xff]  ;;  %v201_v13 = vld [vmem:[%s5812_s19 + $0x68] sm:$0xff]  ;;  %v194_v15 = vld [vmem:[%s5812_s19 + $0x30] sm:$0xff]  ;;  %s5710_s29 = smov 2   ;;  %s175_s30 = sand.u32 1, %s5688_s13  }
  0x1d   : > { %v200_v12 = vld [vmem:[%s5812_s19 + $0x60] sm:$0xff]  ;;  %v5828_v14 = vpack.c.bf16 %v192_v11, %v191_v9  ;;  %v195_v16 = vld [vmem:[%s5812_s19 + $0x38] sm:$0xff]  ;;  %v206_v19 = vld [vmem:[%s5812_s19 + $0x90] sm:$0xff]  ;;  %s4882_s4 = sshll.u32 %s175_s30, 8  ;;  %s9051_s9 = scalar_lea.sflag [#allocation3], %s175_s30 }
  0x1e   : > { %9298 = vst [vmem:[#allocation5_spill] sm:$0xff] %v5823_v10  ;;  %298 = vrot.lane.b32.xlu1 %v5823_v10, %s5706_s28  ;;  %v5834_v17 = vpack.c.bf16 %v201_v13, %v200_v12  ;;  %v5838_v18 = vpack.c.bf16 %v195_v16, %v194_v15  ;;  %v207_v20 = vld [vmem:[%s5812_s19 + $0x98] sm:$0xff]  ;;  %1050 = vmatpush1.bf16.msra.mxu0 %v5224_v5  ;;  %v204_v23 = vld [vmem:[%s5812_s19 + $0x80] sm:$0xff]  ;;  %v213_v28 = vld [vmem:[%s5812_s19 + $0xc8] sm:$0xff]  ;;  %s8715_s5 = scalar_lea.vmem [#allocation2], %s4882_s4  ;;  %s5714_s10 = smov [#allocation2]  }
  0x1f   : > { %294 = vrot.lane.b32.xlu0 %v5828_v14, %s5706_s28  ;;  %v203_v22 = vld [vmem:[%s5812_s19 + $0x78] sm:$0xff]  ;;  %1051 = vmatprep.subr.bf16.mxu0 %v5225_v6  ;;  %v5852_v25 = vpack.c.bf16 %v207_v20, %v206_v19  ;;  %v212_v27 = vld [vmem:[%s5812_s19 + $0xc0] sm:$0xff]  ;;  %v209_v30 = vld [vmem:[%s5812_s19 + $0xa8] sm:$0xff]  ;;  %s4802_s6 = sshll.u32 %s8715_s5, 4  ;;  %s5632_s11 = sshll.u32 %s5714_s10, 4  ;;  %s9045_s6 = int_to_ptr.vmem [resolvable:$true] %s4802_s6  ;;  %s5633_s11 = int_to_ptr.vmem [resolvable:$false] %s5632_s11 }
  0x20   : > { %9299 = vst [vmem:[#allocation6_spill] sm:$0xff] %v5838_v18  ;;  %5072 = vmatpush1.bf16.msra.mxu1 %v5224_v5  ;;  %v5856_v26 = vpack.c.bf16 %v204_v23, %v203_v22  ;;  %v210_v31 = vld [vmem:[%s5812_s19 + $0xb0] sm:$0xff]  ;;  %v5867_v32 = vpack.c.bf16 %v213_v28, %v212_v27  ;;  %v219_v35 = vld [vmem:[%s5812_s19 + $0xf8] sm:$0xff]  ;;  %v216_v37 = vld [vmem:[%s5812_s19 + $0xe0] sm:$0xff]  ;;  %v524_v54 = vshll.u32 %v5838_v18, 16  ;;  %v522_v60 = vshrl.u32 %v5838_v18, 16  ;;  %p5635_p1 = scmp.lt.s32.totalorder %s9045_s6, %s5633_s11 }
  0x21   : > { %5061 = vmatprep.subr.bf16.mxu1 %v5225_v6  ;;  %v5871_v33 = vpack.c.bf16 %v210_v31, %v209_v30  ;;  %v218_v34 = vld [vmem:[%s5812_s19 + $0xf0] sm:$0xff]  ;;  %v215_v36 = vld [vmem:[%s5812_s19 + $0xd8] sm:$0xff]  ;;  %v224_v40 = vld [vmem:[%s5812_s19 + $0x120] sm:$0xff]  ;;  %s5634_s18 = scalar_lea.vmem %s5633_s11, 8192 }
  0x22   : > { %300 = vrot.lane.b32.xlu1 %v5834_v17, %s5706_s28  ;;  %1052 = vmatpush1.bf16.msra.mxu0 %v5227_v21  ;;  %v5879_v38 = vpack.c.bf16 %v219_v35, %v218_v34  ;;  %v5883_v39 = vpack.c.bf16 %v216_v37, %v215_v36  ;;  %v225_v41 = vld [vmem:[%s5812_s19 + $0x128] sm:$0xff]  ;;  %v222_v43 = vld [vmem:[%s5812_s19 + $0x110] sm:$0xff]  ;;  %v231_v45 = vld [vmem:[%s5812_s19 + $0x158] sm:$0xff]  ;;  %v526_v0 = vrot.slane %v524_v54, 1 }
  0x23   : > { %296 = vrot.lane.b32.xlu0 %v5838_v18, %s5706_s28  ;;  %1053 = vmatprep.subr.bf16.mxu0 %v5228_v24  ;;  %v221_v42 = vld [vmem:[%s5812_s19 + $0x108] sm:$0xff]  ;;  %v230_v44 = vld [vmem:[%s5812_s19 + $0x150] sm:$0xff]  ;;  %v5893_v46 = vpack.c.bf16 %v225_v41, %v224_v40  ;;  %v227_v47 = vld [vmem:[%s5812_s19 + $0x138] sm:$0xff] }
  0x24   : > { %5073 = vmatpush1.bf16.msra.mxu1 %v5227_v21  ;;  %v5904_v50 = vpack.c.bf16 %v222_v43, %v221_v42  ;;  %v196_v51 = vld [vmem:[%s5812_s19 + $0x40] sm:$0x3]  ;;  %v5917_v56 = vpack.c.bf16 %v231_v45, %v230_v44  ;;  %v237_v62 = vld [vmem:[%s5812_s19 + $0x188] sm:$0xff]  ;;  %v234_v1 = vld [vmem:[%s5812_s19 + $0x170] sm:$0xff]  ;;  %v527_v4 = vor.u32 %v526_v0, %v522_v60  ;;  %v684_v30 = vshll.u32 %v5879_v38, 16 }
  0x25   : > { %5062 = vmatprep.subr.bf16.mxu1 %v5228_v24  ;;  %v228_v53 = vld [vmem:[%s5812_s19 + $0x140] sm:$0xff]  ;;  %v5920_v58 = vpack.c.bf16 %v196_v51, %v196_v51  ;;  %v233_v63 = vld [vmem:[%s5812_s19 + $0x168] sm:$0xff]  ;;  %v5240_v7 = vld [vmem:[%s9097_s1 + $0x174] ss:$8 sps:$4 sm:$0xff]   ;;  %v682_v40 = vshrl.u32 %v5879_v38, 16 }
  0x26   : > { %304 = vrot.lane.b32.xlu1 %v5852_v25, %s5706_s28  ;;  %1054 = vmatpush1.bf16.msra.mxu0 %v5230_v29  ;;  %v236_v57 = vld [vmem:[%s5812_s19 + $0x180] sm:$0xff]  ;;  %v5928_v61 = vpack.c.bf16 %v228_v53, %v227_v47  ;;  %v193_v6 = vld [vmem:[%s5812_s19 + $0x28] sm:$0x3]  ;;  %v5947_v9 = vpack.c.bf16 %v234_v1, %v233_v63  ;;  %v5242_v11 = vld [vmem:[%s9097_s1 + $0x170] ss:$8 sps:$4 sm:$0xff]   ;;  %v686_v43 = vrot.slane %v684_v30, 1 }
  0x27   : > { %302 = vrot.lane.b32.xlu0 %v5856_v26, %s5706_s28  ;;  %1055 = vmatprep.subr.bf16.mxu0 %v5231_v48  ;;  %9300 = vst [vmem:[#allocation7_spill] sm:$0xff] %v5920_v58  ;;  %v528_v2 = vshll.u32 %v5920_v58, 16  ;;  %v5939_v5 = vpack.c.bf16 %v237_v62, %v236_v57  ;;  %v5243_v12 = vld [vmem:[%s9097_s1 + $0x164] ss:$8 sps:$4 sm:$0xff]   ;;  %v202_v13 = vld [vmem:[%s5812_s19 + $0x70] sm:$0x3]  ;;  %v5962_v19 = vpack.c.bf16 %v193_v6, %v193_v6 }
  0x28   : > { %5074 = vmatpush1.bf16.msra.mxu1 %v5230_v29  ;;  %9301 = vst [vmem:[#allocation8_spill] sm:$0xff] %v5928_v61  ;;  %9303 = vst [vmem:[#allocation10_spill] sm:$0xff] %v5947_v9  ;;  %v199_v16 = vld [vmem:[%s5812_s19 + $0x58] sm:$0x3]  ;;  %v5245_v20 = vld [vmem:[%s9097_s1 + $0x160] ss:$8 sps:$4 sm:$0xff]   ;;  %v5975_v24 = vpack.c.bf16 %v202_v13, %v202_v13  ;;  %v687_v45 = vor.u32 %v686_v43, %v682_v40 }
  0x29   : > { %5063 = vmatprep.subr.bf16.mxu1 %v5231_v48  ;;  %9302 = vst [vmem:[#allocation9_spill] sm:$0xff] %v5939_v5  ;;  %v530_v8 = vrot.slane %v528_v2, 1  ;;  %v220_v21 = vld [vmem:[%s5812_s19 + $0x100] sm:$0x3]  ;;  %v5246_v22 = vld [vmem:[%s9097_s1 + $0x154] ss:$8 sps:$4 sm:$0xff]   ;;  %v5980_v28 = vpack.c.bf16 %v199_v16, %v199_v16 }
  0x2a   : > { %308 = vrot.lane.b32.xlu1 %v5867_v32, %s5706_s28  ;;  %1056 = vmatpush1.bf16.msra.mxu0 %v5233_v49  ;;  %v208_v23 = vld [vmem:[%s5812_s19 + $0xa0] sm:$0x3]  ;;  %v205_v27 = vld [vmem:[%s5812_s19 + $0x88] sm:$0x3]  ;;  %v5248_v29 = vld [vmem:[%s9097_s1 + $0x150] ss:$8 sps:$4 sm:$0xff]   ;;  %v5987_v34 = vpack.c.bf16 %v220_v21, %v220_v21 }
  0x2b   : > { %306 = vrot.lane.b32.xlu0 %v5871_v33, %s5706_s28  ;;  %1057 = vmatprep.subr.bf16.mxu0 %v5234_v52  ;;  %v531_v15 = vsel %vm511_vm0, %v527_v4, %v530_v8  ;;  %9304 = vst [vmem:[#allocation11_spill] sm:$0xff] %v5980_v28  ;;  %v214_v31 = vld [vmem:[%s5812_s19 + $0xd0] sm:$0x3]  ;;  %v5991_v35 = vpack.c.bf16 %v208_v23, %v208_v23  ;;  %v211_v36 = vld [vmem:[%s5812_s19 + $0xb8] sm:$0x3]  ;;  %v544_v43 = vshll.u32 %v5823_v10, 16 }
  0x2c   : > { %5075 = vmatpush1.bf16.msra.mxu1 %v5233_v49  ;;  %4932 = vmatprep.mubr.msk.bf16.mxu0 %vm326_vm1, %v531_v15  ;;  %v5249_v37 = vld [vmem:[%s9097_s1 + $0x144] ss:$8 sps:$4 sm:$0xff]   ;;  %v6000_v41 = vpack.c.bf16 %v205_v27, %v205_v27  ;;  %v5251_v42 = vld [vmem:[%s9097_s1 + $0x140] ss:$8 sps:$4 sm:$0xff]   ;;  %v688_v44 = vshll.u32 %v5987_v34, 16  ;;  %v6008_v48 = vpack.c.bf16 %v214_v31, %v214_v31  ;;  %v6015_v51 = vpack.c.bf16 %v211_v36, %v211_v36 }
  0x2d   : > { %5064 = vmatprep.subr.bf16.mxu1 %v5234_v52  ;;  %v5257_v49 = vld [vmem:[%s9097_s1 + $0x1f4] ss:$8 sps:$4 sm:$0xff]   ;;  %v217_v53 = vld [vmem:[%s5812_s19 + $0xe8] sm:$0x3]  ;;  %v226_v57 = vld [vmem:[%s5812_s19 + $0x130] sm:$0x3] }
  0x2e   : > { %312 = vrot.lane.b32.xlu1 %v5879_v38, %s5706_s28  ;;  %1058 = vmatpush1.bf16.msra.mxu0 %v5236_v55  ;;  %v690_v47 = vrot.slane %v688_v44, 1  ;;  %v5254_v54 = vld [vmem:[%s9097_s1 + $0x74] ss:$8 sps:$4 sm:$0xff]   ;;  %v6033_v60 = vpack.c.bf16 %v226_v57, %v226_v57  ;;  %v232_v63 = vld [vmem:[%s5812_s19 + $0x160] sm:$0x3]  ;;  %v548_v57 = vshll.u32 %v5980_v28, 16 }
  0x2f   : > { %310 = vrot.lane.b32.xlu0 %v5883_v39, %s5706_s28  ;;  %1059 = vmatprep.subr.bf16.mxu0 %v5237_v59  ;;  %v229_v0 = vld [vmem:[%s5812_s19 + $0x148] sm:$0x3]  ;;  %v6043_v1 = vpack.c.bf16 %v232_v63, %v232_v63  ;;  %v235_v4 = vld [vmem:[%s5812_s19 + $0x178] sm:$0x3]  ;;  %v188_v27 = vld [vmem:[%s5812_s19] sm:$0xff]  ;;  %v564_v63 = vshll.u32 %v5834_v17, 16 }
  0x30   : > { %5076 = vmatpush1.bf16.msra.mxu1 %v5236_v55  ;;  %v691_v52 = vsel %vm511_vm0, %v687_v45, %v690_v47  ;;  %v6027_v55 = vpack.c.bf16 %v217_v53, %v217_v53  ;;  %9305 = vst [vmem:[#allocation12_spill] sm:$0xff] %v6033_v60  ;;  %v6047_v2 = vpack.c.bf16 %v229_v0, %v229_v0  ;;  %v190_v44 = vld [vmem:[%s5812_s19 + $0x10] sm:$0x3]  ;;  %v542_v53 = vshrl.u32 %v5823_v10, 16 }
  0x31   : > { %5065 = vmatprep.subr.bf16.mxu1 %v5237_v59  ;;  %4940 = vmatprep.mubr.msk.bf16.mxu1 %vm326_vm1, %v691_v52  ;;  %v223_v59 = vld [vmem:[%s5812_s19 + $0x118] sm:$0x3]  ;;  %v243_v52 = vpack.c.bf16 %v190_v44, %v190_v44 }
  0x32   : > { %316 = vrot.lane.b32.xlu1 %v5893_v46, %s5706_s28  ;;  %1060 = vmatpush1.bf16.msra.mxu0 %v5239_v3  ;;  %v6037_v62 = vpack.c.bf16 %v223_v59, %v223_v59  ;;  %9306 = vst [vmem:[#allocation13_spill] sm:$0xff] %v6047_v2 }
  0x33   : > { %314 = vrot.lane.b32.xlu0 %v5904_v50, %s5706_s28  ;;  %1069 = vmatprep.subr.bf16.mxu0 %v5240_v7 }
  0x34   : > { %5077 = vmatpush1.bf16.msra.mxu1 %v5239_v3  ;;  %v238_v3 = vld [vmem:[%s5812_s19 + $0x190] sm:$0x3] }
  0x35   : > { %5066 = vmatprep.subr.bf16.mxu1 %v5240_v7  ;;  %v6053_v6 = vpack.c.bf16 %v238_v3, %v238_v3  ;;  %v6057_v7 = vpack.c.bf16 %v235_v4, %v235_v4 }
  0x36   : > { %320 = vrot.lane.b32.xlu1 %v5917_v56, %s5706_s28  ;;  %1070 = vmatpush2.bf16.msra.mxu0 %v5242_v11 }
  0x37   : > { %318 = vrot.lane.b32.xlu0 %v5928_v61, %s5706_s28  ;;  %1071 = vmatprep.subr.bf16.mxu0 %v5243_v12  ;;  %9307 = vst [vmem:[#allocation14_spill] sm:$0xff] %v6053_v6  ;;  %9308 = vst [vmem:[#allocation15_spill] sm:$0xff] %v6057_v7 }
  0x38   : > { %5078 = vmatpush2.bf16.msra.mxu1 %v5242_v11 }
  0x39   : > { %5067 = vmatprep.subr.bf16.mxu1 %v5243_v12 }
  0x3a   : > { %324 = vrot.lane.b32.xlu1 %v5939_v5, %s5706_s28  ;;  %1072 = vmatpush2.bf16.msra.mxu0 %v5245_v20 }
  0x3b   : > { %322 = vrot.lane.b32.xlu0 %v5947_v9, %s5706_s28  ;;  %1073 = vmatprep.subr.bf16.mxu0 %v5246_v22 }
  0x3c   : > { %5079 = vmatpush2.bf16.msra.mxu1 %v5245_v20 }
  0x3d   : > { %5068 = vmatprep.subr.bf16.mxu1 %v5246_v22 }
  0x3e   : > { %433 = vrot.lane.b32.xlu1 %v5920_v58, %s5706_s28  ;;  %1074 = vmatpush2.bf16.msra.mxu0 %v5248_v29 }
  0x3f   : > { %431 = vrot.lane.b32.xlu0 %v5962_v19, %s5706_s28  ;;  %1075 = vmatprep.subr.bf16.mxu0 %v5249_v37 }
  0x40   : > { %5080 = vmatpush2.bf16.msra.mxu1 %v5248_v29  ;;  %v189_v29 = vld [vmem:[%s5812_s19 + $0x8] sm:$0xff] }
  0x41   : > { %5069 = vmatprep.subr.bf16.mxu1 %v5249_v37  ;;  %v242_v36 = vpack.c.bf16 %v189_v29, %v188_v27  ;;  %v550_v29 = vrot.slane %v548_v57, 1 }
  0x42   : > { %437 = vrot.lane.b32.xlu1 %v5975_v24, %s5706_s28  ;;  %1076 = vmatpush2.bf16.msra.mxu0 %v5251_v42 }
  0x43   : > { %435 = vrot.lane.b32.xlu0 %v5980_v28, %s5706_s28  ;;  %1923 = vmatprep.subr.bf16.mxu0 %v5257_v49 }
  0x44   : > { %5081 = vmatpush2.bf16.msra.mxu1 %v5251_v42 }
  0x45   : > { %1390 = vmatprep.subr.bf16.mxu1 %v5254_v54  ;;  %v546_v54 = vrot.slane %v544_v43, 1 }
  0x46   : > { %441 = vrot.lane.b32.xlu1 %v5991_v35, %s5706_s28 }
  0x47   : > { %439 = vrot.lane.b32.xlu0 %v6000_v41, %s5706_s28  ;;  %v547_v27 = vor.u32 %v546_v54, %v542_v53  ;;  %v568_v53 = vshll.u32 %v5975_v24, 16  ;;  %v5255_v54 = vld [vmem:[%s9097_s1 + $0x1f0] ss:$8 sps:$4 sm:$0xff]  }
  0x49   : > { %v551_v57 = vsel %vm511_vm0, %v547_v27, %v550_v29  ;;  %v570_v29 = vrot.slane %v568_v53, 1 }
  0x4a   : > { %445 = vrot.lane.b32.xlu1 %v6008_v48, %s5706_s28 }
  0x4b   : > { %443 = vrot.lane.b32.xlu0 %v6015_v51, %s5706_s28 }
  0x4e   : > { %449 = vrot.lane.b32.xlu1 %v5987_v34, %s5706_s28 }
  0x4f   : > { %447 = vrot.lane.b32.xlu0 %v6027_v55, %s5706_s28 }
  0x52   : > { %453 = vrot.lane.b32.xlu1 %v6033_v60, %s5706_s28 }
  0x53   : > { %451 = vrot.lane.b32.xlu0 %v6037_v62, %s5706_s28 }
  0x56   : > { %457 = vrot.lane.b32.xlu1 %v6043_v1, %s5706_s28 }
  0x57   : > { %455 = vrot.lane.b32.xlu0 %v6047_v2, %s5706_s28 }
  0x5a   : > { %461 = vrot.lane.b32.xlu1 %v6053_v6, %s5706_s28  ;;  %v5258_v6 = vld [vmem:[%s9097_s1 + $0x1e0] ss:$8 sps:$4 sm:$0xff]  }
  0x5b   : > { %459 = vrot.lane.b32.xlu0 %v6057_v7, %s5706_s28 }
  0x90   : > { %v6063_v8 = vpop.permute.xlu1 %298 }
  0x91   : > { %v295_v11 = vpop.permute.xlu0 %294 }
  0x92   : > { %v6088_v42 = vsel %vm326_vm1, %v242_v36, %v295_v11 }
  0x93   : > { %9311 = vst [vmem:[#allocation18_spill] sm:$0xff] %v6088_v42  ;;  %v514_v47 = vshll.u32 %v6088_v42, 16  ;;  %v512_v36 = vshrl.u32 %v6088_v42, 16 }
  0x94   : > { %v6065_v12 = vpop.permute.xlu1 %300 }
  0x95   : > { %v297_v13 = vpop.permute.xlu0 %296  ;;  %v516_v0 = vrot.slane %v514_v47, 1  ;;  %v562_v47 = vshrl.u32 %v5834_v17, 16 }
  0x96   : > { %v6102_v4 = vsel %vm326_vm1, %v5828_v14, %v297_v13 }
  0x97   : > { %9314 = vst [vmem:[#allocation21_spill] sm:$0xff] %v6102_v4  ;;  %v534_v14 = vshll.u32 %v6102_v4, 16 }
  0x98   : > { %v6067_v15 = vpop.permute.xlu1 %304 }
  0x99   : > { %v6069_v16 = vpop.permute.xlu0 %302  ;;  %v536_v42 = vrot.slane %v534_v14, 1  ;;  %v582_v14 = vshrl.u32 %v5856_v26, 16 }
  0x9c   : > { %v6071_v20 = vpop.permute.xlu1 %308 }
  0x9d   : > { %9309 = vst [vmem:[#allocation16_spill] sm:$0xff] %v6071_v20  ;;  %v6073_v21 = vpop.permute.xlu0 %306 }
  0xa0   : > { %v6075_v22 = vpop.permute.xlu1 %312 }
  0xa1   : > { %v311_v23 = vpop.permute.xlu0 %310 }
  0xa4   : > { %v6079_v30 = vpop.permute.xlu1 %316 }
  0xa5   : > { %v6081_v31 = vpop.permute.xlu0 %314 }
  0xa8   : > { %v6083_v37 = vpop.permute.xlu1 %320 }
  0xa9   : > { %9310 = vst [vmem:[#allocation17_spill] sm:$0xff] %v6083_v37  ;;  %v6085_v40 = vpop.permute.xlu0 %318 }
  0xac   : > { %v6092_v45 = vpop.permute.xlu1 %324 }
  0xad   : > { %9312 = vst [vmem:[#allocation19_spill] sm:$0xff] %v6092_v45  ;;  %v6095_v49 = vpop.permute.xlu0 %322 }
  0xae   : > { %9313 = vst [vmem:[#allocation20_spill] sm:$0xff] %v6095_v49  ;;  %v566_v49 = vrot.slane %v564_v63, 1 }
  0xb0   : > { %v434_v59 = vpop.permute.xlu1 %433  ;;  %v567_v27 = vor.u32 %v566_v49, %v562_v47  ;;  %v5266_v49 = vld [vmem:[%s9097_s1 + $0x1d4] ss:$8 sps:$4 sm:$0xff]   ;;  %v532_v47 = vshrl.u32 %v6102_v4, 16 }
  0xb1   : > { %v432_v3 = vpop.permute.xlu0 %431  ;;  %v6111_v44 = vsel %vm326_vm1, %v5962_v19, %v434_v59  ;;  %v5260_v19 = vld [vmem:[%s9097_s1 + $0x1e4] ss:$8 sps:$4 sm:$0xff]   ;;  %v584_v59 = vshll.u32 %v5856_v26, 16 }
  0xb2   : > { %v6105_v11 = vsel %vm326_vm1, %v243_v52, %v432_v3  ;;  %9316 = vst [vmem:[#allocation23_spill] sm:$0xff] %v6111_v44  ;;  %v517_v3 = vor.u32 %v516_v0, %v512_v36  ;;  %v538_v63 = vshll.u32 %v6111_v44, 16  ;;  %v704_v36 = vshll.u32 %v5904_v50, 16 }
  0xb3   : > { %9315 = vst [vmem:[#allocation22_spill] sm:$0xff] %v6105_v11  ;;  %v518_v43 = vshll.u32 %v6105_v11, 16  ;;  %v604_v44 = vshll.u32 %v5852_v25, 16  ;;  %v537_v5 = vor.u32 %v536_v42, %v532_v47  ;;  %v724_v42 = vshll.u32 %v5893_v46, 16 }
  0xb4   : > { %v6113_v45 = vpop.permute.xlu1 %437  ;;  %v540_v53 = vrot.slane %v538_v63, 1 }
  0xb5   : > { %v520_v13 = vrot.slane %v518_v43, 1  ;;  %v436_v52 = vpop.permute.xlu0 %435  ;;  %v606_v9 = vrot.slane %v604_v44, 1  ;;  %v6189_v44 = vsel %vm326_vm1, %v5883_v39, %v6075_v22  ;;  %v726_v22 = vrot.slane %v724_v42, 1 }
  0xb6   : > { %v541_v20 = vsel %vm511_vm0, %v537_v5, %v540_v53  ;;  %9322 = vst [vmem:[#allocation29_spill] sm:$0xff] %v6189_v44 }
  0xb7   : > { %v521_v43 = vsel %vm511_vm0, %v517_v3, %v520_v13  ;;  %v6140_v13 = vsel %vm326_vm1, %v5838_v18, %v6063_v8  ;;  %v6144_v3 = vsel %vm326_vm1, %v5867_v32, %v311_v23  ;;  %v702_v8 = vshrl.u32 %v5904_v50, 16 }
  0xb8   : > { %1078 = vmatmul.mubr.bf16.vlgmr.msra.gmra.mxu0 %v521_v43  ;;  %v6128_v0 = vpop.permute.xlu1 %441  ;;  %9317 = vst [vmem:[#allocation24_spill] sm:$0xff] %v6140_v13  ;;  %9318 = vst [vmem:[#allocation25_spill] sm:$0xff] %v6144_v3  ;;  %v6155_v43 = vsel %vm326_vm1, %v5920_v58, %v436_v52  ;;  %v554_v18 = vshll.u32 %v6140_v13, 16  ;;  %v674_v4 = vshll.u32 %v6144_v3, 16  ;;  %v5264_v52 = vld [vmem:[%s9097_s1 + $0x1d0] ss:$8 sps:$4 sm:$0xff]   ;;  %v571_v58 = vsel %vm511_vm0, %v567_v27, %v570_v29 }
  0xb9   : > { %v6131_v11 = vpop.permute.xlu0 %439  ;;  %4933 = vmatprep.mubr.msk.bf16.mxu0 %vm326_vm1, %v551_v57  ;;  %1924 = vmatpush1.bf16.msra.mxu0 %v5255_v54  ;;  %v586_v57 = vrot.slane %v584_v59, 1  ;;  %v588_v54 = vshll.u32 %v6000_v41, 16  ;;  %9319 = vst [vmem:[#allocation26_spill] sm:$0xff] %v6155_v43  ;;  %v708_v59 = vshll.u32 %v6037_v62, 16  ;;  %v558_v37 = vshll.u32 %v6155_v43, 16 }
  0xba   : > { %1925 = vmatprep.subr.bf16.mxu0 %v5260_v19  ;;  %v706_v19 = vrot.slane %v704_v36, 1  ;;  %v5272_v36 = vld [vmem:[%s9097_s1 + $0x1c4] ss:$8 sps:$4 sm:$0xff]   ;;  %v552_v27 = vshrl.u32 %v6140_v13, 16  ;;  %v556_v29 = vrot.slane %v554_v18, 1  ;;  %v672_v53 = vshrl.u32 %v6144_v3, 16 }
  0xbb   : > { %v590_v7 = vrot.slane %v588_v54, 1  ;;  %v710_v47 = vrot.slane %v708_v59, 1  ;;  %v560_v54 = vrot.slane %v558_v37, 1  ;;  %v6206_v59 = vsel %vm326_vm1, %v5980_v28, %v6113_v45  ;;  %v5252_v37 = vld [vmem:[%s9097_s1 + $0x70] ss:$8 sps:$4 sm:$0xff]  }
  0xbc   : > { %v6157_v23 = vpop.permute.xlu1 %445  ;;  %v557_v42 = vor.u32 %v556_v29, %v552_v27  ;;  %v5263_v45 = vld [vmem:[%s9097_s1 + $0x64] ss:$8 sps:$4 sm:$0xff]   ;;  %v5276_v29 = vld [vmem:[%s9097_s1 + $0x1b0] ss:$8 sps:$4 sm:$0xff]  }
  0xbd   : > { %9320 = vst [vmem:[#allocation27_spill] sm:$0xff] %v6157_v23  ;;  %v6163_v63 = vpop.permute.xlu0 %443  ;;  %1926 = vmatpush1.bf16.msra.mxu0 %v5258_v6  ;;  %v587_v23 = vor.u32 %v586_v57, %v582_v14  ;;  %v707_v6 = vor.u32 %v706_v19, %v702_v8  ;;  %v6180_v14 = vsel %vm326_vm1, %v5823_v10, %v6065_v12  ;;  %v676_v57 = vrot.slane %v674_v4, 1 }
  0xbe   : > { %9321 = vst [vmem:[#allocation28_spill] sm:$0xff] %v6163_v63  ;;  %1927 = vmatprep.subr.bf16.mxu0 %v5266_v49  ;;  %v602_v63 = vshrl.u32 %v5852_v25, 16  ;;  %v608_v12 = vshll.u32 %v5991_v35, 16  ;;  %v722_v4 = vshrl.u32 %v5893_v46, 16  ;;  %v574_v19 = vshll.u32 %v6180_v14, 16 }
  0xbf   : > { %v591_v13 = vsel %vm511_vm0, %v587_v23, %v590_v7 }
  0xc0   : > { %1088 = vmatmul.mubr.bf16.gmra.mxu0 %v541_v20  ;;  %v450_v49 = vpop.permute.xlu1 %449  ;;  %v5270_v20 = vld [vmem:[%s9097_s1 + $0x1c0] ss:$8 sps:$4 sm:$0xff]   ;;  %v607_v43 = vor.u32 %v606_v9, %v602_v63  ;;  %v610_v28 = vrot.slane %v608_v12, 1  ;;  %v727_v7 = vor.u32 %v726_v22, %v722_v4  ;;  %v5281_v9 = vld [vmem:[%s9097_s1 + $0x1a4] ss:$8 sps:$4 sm:$0xff]   ;;  %v624_v63 = vshll.u32 %v5871_v33, 16 }
  0xc1   : > { %v448_v5 = vpop.permute.xlu0 %447  ;;  %4934 = vmatprep.mubr.msk.bf16.mxu0 %vm326_vm1, %v571_v58  ;;  %1928 = vmatpush1.bf16.msra.mxu0 %v5264_v52  ;;  %v5278_v58 = vld [vmem:[%s9097_s1 + $0x1b4] ss:$8 sps:$4 sm:$0xff]   ;;  %v6210_v52 = vsel %vm326_vm1, %v6027_v55, %v450_v49  ;;  %v711_v49 = vsel %vm511_vm0, %v707_v6, %v710_v47  ;;  %v744_v6 = vshll.u32 %v5928_v61, 16  ;;  %v572_v47 = vshrl.u32 %v6180_v14, 16 }
  0xc2   : > { %v6193_v18 = vsel %vm326_vm1, %v6008_v48, %v448_v5  ;;  %1929 = vmatprep.subr.bf16.mxu0 %v5272_v36  ;;  %v728_v36 = vshll.u32 %v6033_v60, 16  ;;  %v694_v5 = vshll.u32 %v6189_v44, 16  ;;  %v698_v10 = vshll.u32 %v6210_v52, 16 }
  0xc3   : > { %9323 = vst [vmem:[#allocation30_spill] sm:$0xff] %v6193_v18  ;;  %v678_v8 = vshll.u32 %v6193_v18, 16  ;;  %v677_v18 = vor.u32 %v676_v57, %v672_v53  ;;  %v561_v60 = vsel %vm511_vm0, %v557_v42, %v560_v54  ;;  %v576_v57 = vrot.slane %v574_v19, 1 }
  0xc4   : > { %v730_v23 = vrot.slane %v728_v36, 1  ;;  %v6243_v12 = vsel %vm326_vm1, %v5834_v17, %v6069_v16  ;;  %v6248_v4 = vsel %vm326_vm1, %v5879_v38, %v6081_v31  ;;  %v622_v53 = vshrl.u32 %v5871_v33, 16  ;;  %v5279_v16 = vld [vmem:[%s9097_s1 + $0x1a0] ss:$8 sps:$4 sm:$0xff]  }
  0xc5   : > { %v680_v3 = vrot.slane %v678_v8, 1  ;;  %1930 = vmatpush1.bf16.msra.mxu0 %v5270_v20  ;;  %v578_v8 = vshll.u32 %v6206_v59, 16  ;;  %v696_v20 = vrot.slane %v694_v5, 1  ;;  %9324 = vst [vmem:[#allocation31_spill] sm:$0xff] %v6248_v4  ;;  %v700_v22 = vrot.slane %v698_v10, 1 }
  0xc6   : > { %1931 = vmatprep.subr.bf16.mxu0 %v5278_v58  ;;  %v5269_v58 = vld [vmem:[%s9097_s1 + $0x54] ss:$8 sps:$4 sm:$0xff]   ;;  %v742_v31 = vshrl.u32 %v5928_v61, 16  ;;  %v748_v19 = vshll.u32 %v6047_v2, 16  ;;  %v6264_v36 = vsel %vm326_vm1, %v5975_v24, %v6131_v11  ;;  %v626_v10 = vrot.slane %v624_v63, 1 }
  0xc7   : > { %v681_v27 = vsel %vm511_vm0, %v677_v18, %v680_v3  ;;  %v692_v3 = vshrl.u32 %v6189_v44, 16  ;;  %v452_v18 = vpop.permute.xlu0 %451  ;;  %v580_v54 = vrot.slane %v578_v8, 1  ;;  %v594_v42 = vshll.u32 %v6243_v12, 16 }
  0xc8   : > { %1098 = vmatmul.mubr.bf16.gmra.mxu0 %v561_v60  ;;  %1158 = vmatmul.mubr.bf16.vlgmr.msra.gmra.mxu1 %v681_v27  ;;  %v5261_v60 = vld [vmem:[%s9097_s1 + $0x60] ss:$8 sps:$4 sm:$0xff]   ;;  %v6268_v5 = vsel %vm326_vm1, %v5987_v34, %v452_v18  ;;  %v5267_v27 = vld [vmem:[%s9097_s1 + $0x50] ss:$8 sps:$4 sm:$0xff]   ;;  %v611_v11 = vsel %vm511_vm0, %v607_v43, %v610_v28  ;;  %v598_v63 = vshll.u32 %v6264_v36, 16  ;;  %v627_v43 = vor.u32 %v626_v10, %v622_v53 }
  0xc9   : > { %1391 = vmatpush1.bf16.msra.mxu1 %v5252_v37  ;;  %4935 = vmatprep.mubr.msk.bf16.mxu0 %vm326_vm1, %v591_v13  ;;  %v628_v13 = vshll.u32 %v6015_v51, 16  ;;  %9325 = vst [vmem:[#allocation32_spill] sm:$0xff] %v6268_v5  ;;  %v746_v37 = vrot.slane %v744_v6, 1  ;;  %v697_v8 = vor.u32 %v696_v20, %v692_v3  ;;  %v718_v6 = vshll.u32 %v6268_v5, 16  ;;  %v5273_v3 = vld [vmem:[%s9097_s1 + $0x40] ss:$8 sps:$4 sm:$0xff]  }
  0xca   : > { %1392 = vmatprep.subr.bf16.mxu1 %v5263_v45  ;;  %4941 = vmatprep.mubr.msk.bf16.mxu1 %vm326_vm1, %v711_v49  ;;  %v714_v45 = vshll.u32 %v6248_v4, 16  ;;  %v577_v49 = vor.u32 %v576_v57, %v572_v47  ;;  %v5287_v28 = vld [vmem:[%s9097_s1 + $0x194] ss:$8 sps:$4 sm:$0xff]   ;;  %v5285_v20 = vld [vmem:[%s9097_s1 + $0x190] ss:$8 sps:$4 sm:$0xff]   ;;  %v644_v18 = vshll.u32 %v5867_v32, 16 }
  0xcb   : > { %1932 = vmatpush1.bf16.msra.mxu0 %v5276_v29  ;;  %v731_v29 = vsel %vm511_vm0, %v727_v7, %v730_v23  ;;  %v701_v57 = vsel %vm511_vm0, %v697_v8, %v700_v22  ;;  %v630_v7 = vrot.slane %v628_v13, 1  ;;  %v750_v23 = vrot.slane %v748_v19, 1 }
  0xcc   : > { %1933 = vmatprep.subr.bf16.mxu0 %v5281_v9  ;;  %v5275_v9 = vld [vmem:[%s9097_s1 + $0x44] ss:$8 sps:$4 sm:$0xff]   ;;  %v581_v47 = vsel %vm511_vm0, %v577_v49, %v580_v54  ;;  %v454_v54 = vpop.permute.xlu1 %453  ;;  %v747_v22 = vor.u32 %v746_v37, %v742_v31  ;;  %v642_v53 = vshrl.u32 %v5867_v32, 16  ;;  %v6302_v13 = vsel %vm326_vm1, %v5856_v26, %v6067_v15  ;;  %v5284_v31 = vld [vmem:[%s9097_s1 + $0x34] ss:$8 sps:$4 sm:$0xff]  }
  0xcd   : > { %1393 = vmatpush1.bf16.msra.mxu1 %v5261_v60  ;;  %v596_v60 = vrot.slane %v594_v42, 1  ;;  %v6307_v19 = vsel %vm326_vm1, %v5904_v50, %v6079_v30  ;;  %v648_v10 = vshll.u32 %v6008_v48, 16  ;;  %v764_v37 = vshll.u32 %v5917_v56, 16 }
  0xce   : > { %1394 = vmatprep.subr.bf16.mxu1 %v5269_v58  ;;  %v716_v58 = vrot.slane %v714_v45, 1  ;;  %9326 = vst [vmem:[#allocation33_spill] sm:$0xff] %v6307_v19  ;;  %v592_v42 = vshrl.u32 %v6243_v12, 16  ;;  %v712_v15 = vshrl.u32 %v6248_v4, 16  ;;  %v600_v45 = vrot.slane %v598_v63, 1 }
  0xcf   : > { %1934 = vmatpush1.bf16.msra.mxu0 %v5279_v16  ;;  %v5293_v16 = vld [vmem:[%s9097_s1 + $0x184] ss:$8 sps:$4 sm:$0xff]   ;;  %v720_v49 = vrot.slane %v718_v6, 1  ;;  %v6320_v30 = vsel %vm326_vm1, %v6000_v41, %v6128_v0  ;;  %v6324_v8 = vsel %vm326_vm1, %v6037_v62, %v454_v54  ;;  %v5282_v0 = vld [vmem:[%s9097_s1 + $0x30] ss:$8 sps:$4 sm:$0xff]  }
  0xd0   : > { %1108 = vmatmul.mubr.bf16.gmra.mxu0 %v581_v47  ;;  %1168 = vmatmul.mubr.bf16.gmra.mxu1 %v701_v57  ;;  %9327 = vst [vmem:[#allocation34_spill] sm:$0xff] %v6324_v8  ;;  %v597_v63 = vor.u32 %v596_v60, %v592_v42  ;;  %v717_v6 = vor.u32 %v716_v58, %v712_v15  ;;  %v618_v60 = vshll.u32 %v6320_v30, 16  ;;  %v732_v15 = vshrl.u32 %v6307_v19, 16 }
  0xd1   : > { %1395 = vmatpush1.bf16.msra.mxu1 %v5267_v27  ;;  %4936 = vmatprep.mubr.msk.bf16.mxu0 %vm326_vm1, %v611_v11  ;;  %v646_v27 = vrot.slane %v644_v18, 1  ;;  %v768_v11 = vshll.u32 %v6043_v1, 16  ;;  %v631_v47 = vsel %vm511_vm0, %v627_v43, %v630_v7  ;;  %v751_v57 = vsel %vm511_vm0, %v747_v22, %v750_v23  ;;  %v5291_v43 = vld [vmem:[%s9097_s1 + $0x180] ss:$8 sps:$4 sm:$0xff]  }
  0xd2   : > { %4942 = vmatprep.mubr.msk.bf16.mxu1 %vm326_vm1, %v731_v29  ;;  %1396 = vmatprep.subr.bf16.mxu1 %v5275_v9  ;;  %v614_v29 = vshll.u32 %v6302_v13, 16  ;;  %v734_v9 = vshll.u32 %v6307_v19, 16  ;;  %v766_v18 = vrot.slane %v764_v37, 1  ;;  %v601_v58 = vsel %vm511_vm0, %v597_v63, %v600_v45 }
  0xd3   : > { %1935 = vmatprep.subr.bf16.mxu0 %v5287_v28  ;;  %v5290_v28 = vld [vmem:[%s9097_s1 + $0x24] ss:$8 sps:$4 sm:$0xff]   ;;  %v721_v54 = vsel %vm511_vm0, %v717_v6, %v720_v49  ;;  %v647_v7 = vor.u32 %v646_v27, %v642_v53  ;;  %v650_v23 = vrot.slane %v648_v10, 1  ;;  %v770_v22 = vrot.slane %v768_v11, 1  ;;  %v456_v49 = vpop.permute.xlu0 %455  ;;  %v5288_v53 = vld [vmem:[%s9097_s1 + $0x20] ss:$8 sps:$4 sm:$0xff]  }
  0xd4   : > { %1936 = vmatpush1.bf16.msra.mxu0 %v5285_v20  ;;  %v762_v20 = vshrl.u32 %v5917_v56, 16  ;;  %v612_v37 = vshrl.u32 %v6302_v13, 16  ;;  %v616_v42 = vrot.slane %v614_v29, 1  ;;  %v736_v45 = vrot.slane %v734_v9, 1  ;;  %v5296_v29 = vld [vmem:[%s9097_s1 + $0x14] ss:$8 sps:$4 sm:$0xff]  }
  0xd5   : > { %1397 = vmatpush1.bf16.msra.mxu1 %v5273_v3  ;;  %1937 = vmatprep.subr.bf16.mxu0 %v5293_v16  ;;  %v738_v3 = vshll.u32 %v6324_v8, 16  ;;  %v5299_v16 = vld [vmem:[%s9097_s1 + $0x234] ss:$8 sps:$4 sm:$0xff]   ;;  %v6358_v10 = vsel %vm326_vm1, %v5852_v25, %v6073_v21  ;;  %v6363_v27 = vsel %vm326_vm1, %v5893_v46, %v6085_v40  ;;  %v9329_v9 = vld [vmem:[#allocation10_spill] sm:$0xff]  ;;  %v620_v6 = vrot.slane %v618_v60, 1 }
  0xd6   : > { %1398 = vmatprep.subr.bf16.mxu1 %v5284_v31  ;;  %v664_v31 = vshll.u32 %v5883_v39, 16  ;;  %9328 = vst [vmem:[#allocation35_spill] sm:$0xff] %v6363_v27  ;;  %v767_v11 = vor.u32 %v766_v18, %v762_v20  ;;  %v784_v63 = vshll.u32 %v9329_v9, 16  ;;  %v5297_v21 = vld [vmem:[%s9097_s1 + $0x230] ss:$8 sps:$4 sm:$0xff]   ;;  %v662_v40 = vshrl.u32 %v5883_v39, 16 }
  0xd7   : > { %v9331_v20 = vld [vmem:[#allocation12_spill] sm:$0xff]  ;;  %v617_v19 = vor.u32 %v616_v42, %v612_v37  ;;  %v737_v8 = vor.u32 %v736_v45, %v732_v15  ;;  %v651_v4 = vsel %vm511_vm0, %v647_v7, %v650_v23  ;;  %v5305_v15 = vld [vmem:[%s9097_s1 + $0x4] ss:$8 sps:$4 sm:$0xff]  }
  0xd8   : > { %1118 = vmatmul.mubr.bf16.gmra.mxu0 %v601_v58  ;;  %1178 = vmatmul.mubr.bf16.gmra.mxu1 %v721_v54  ;;  %v6382_v18 = vsel %vm326_vm1, %v9331_v20, %v456_v49  ;;  %v666_v60 = vrot.slane %v664_v31, 1  ;;  %v634_v54 = vshll.u32 %v6358_v10, 16  ;;  %v5294_v49 = vld [vmem:[%s9097_s1 + $0x10] ss:$8 sps:$4 sm:$0xff]   ;;  %v782_v31 = vshrl.u32 %v9329_v9, 16 }
  0xd9   : > { %1399 = vmatpush1.bf16.msra.mxu1 %v5282_v0  ;;  %4937 = vmatprep.mubr.msk.bf16.mxu0 %vm326_vm1, %v631_v47  ;;  %v740_v0 = vrot.slane %v738_v3, 1  ;;  %v668_v47 = vshll.u32 %v6027_v55, 16  ;;  %9332 = vst [vmem:[#allocation10_spill] sm:$0xff] %v6382_v18  ;;  %v9333_v3 = vld [vmem:[#allocation15_spill] sm:$0xff]  ;;  %v786_v5 = vrot.slane %v784_v63, 1  ;;  %v758_v42 = vshll.u32 %v6382_v18, 16 }
  0xda   : > { %4943 = vmatprep.mubr.msk.bf16.mxu1 %vm326_vm1, %v751_v57  ;;  %1400 = vmatprep.subr.bf16.mxu1 %v5290_v28  ;;  %v9330_v57 = vld [vmem:[#allocation28_spill] sm:$0xff]  ;;  %v788_v58 = vshll.u32 %v9333_v3, 16  ;;  %v621_v7 = vsel %vm511_vm0, %v617_v19, %v620_v6  ;;  %v667_v45 = vor.u32 %v666_v60, %v662_v40  ;;  %v636_v19 = vrot.slane %v634_v54, 1  ;;  %v5303_v63 = vld [vmem:[%s9097_s1] ss:$8 sps:$4 sm:$0xff]  }
  0xdb   : > { %1938 = vmatpush1.bf16.msra.mxu0 %v5291_v43  ;;  %v6378_v28 = vsel %vm326_vm1, %v5991_v35, %v9330_v57  ;;  %v754_v43 = vshll.u32 %v6363_v27, 16  ;;  %v771_v57 = vsel %vm511_vm0, %v767_v11, %v770_v22  ;;  %v741_v23 = vsel %vm511_vm0, %v737_v8, %v740_v0  ;;  %v5300_v22 = vld [vmem:[%s9097_s1 + $0x220] ss:$8 sps:$4 sm:$0xff]   ;;  %v5308_v11 = vld [vmem:[%s9097_s1 + $0x214] ss:$8 sps:$4 sm:$0xff]   ;;  %v458_v8 = vpop.permute.xlu1 %457 }
  0xdc   : > { %1947 = vmatprep.subr.bf16.mxu0 %v5299_v16  ;;  %v5302_v16 = vld [vmem:[%s9097_s1 + $0x224] ss:$8 sps:$4 sm:$0xff]   ;;  %v638_v37 = vshll.u32 %v6378_v28, 16  ;;  %v790_v6 = vrot.slane %v788_v58, 1  ;;  %v9334_v0 = vld [vmem:[#allocation16_spill] sm:$0xff] }
  0xdd   : > { %1401 = vmatpush1.bf16.msra.mxu1 %v5288_v53  ;;  %v670_v53 = vrot.slane %v668_v47, 1  ;;  %v9335_v40 = vld [vmem:[#allocation17_spill] sm:$0xff]  ;;  %v5306_v60 = vld [vmem:[%s9097_s1 + $0x210] ss:$8 sps:$4 sm:$0xff]   ;;  %v5311_v58 = vld [vmem:[%s9097_s1 + $0xb4] ss:$8 sps:$4 sm:$0xff]  }
  0xde   : > { %1402 = vmatprep.subr.bf16.mxu1 %v5296_v29  ;;  %v756_v29 = vrot.slane %v754_v43, 1  ;;  %v6422_v47 = vsel %vm326_vm1, %v5928_v61, %v9335_v40  ;;  %v9336_v54 = vld [vmem:[#allocation9_spill] sm:$0xff]  ;;  %v6442_v40 = vsel %vm326_vm1, %v6047_v2, %v458_v8  ;;  %v9339_v61 = vld [vmem:[#allocation14_spill] sm:$0xff] }
  0xdf   : > { %1948 = vmatpush2.bf16.msra.mxu0 %v5297_v21  ;;  %v6417_v21 = vsel %vm326_vm1, %v5871_v33, %v9334_v0  ;;  %v805_v43 = vshll.u32 %v9336_v54, 16  ;;  %v760_v0 = vrot.slane %v758_v42, 1  ;;  %9338 = vst [vmem:[#allocation28_spill] sm:$0xff] %v6442_v40  ;;  %v671_v18 = vsel %vm511_vm0, %v667_v45, %v670_v53  ;;  %v5312_v45 = vld [vmem:[%s9097_s1 + $0x200] ss:$8 sps:$4 sm:$0xff]  }
  0xe0   : > { %1128 = vmatmul.mubr.bf16.gmra.mxu0 %v621_v7  ;;  %1188 = vmatmul.mubr.bf16.gmra.mxu1 %v741_v23  ;;  %v752_v7 = vshrl.u32 %v6363_v27, 16  ;;  %v640_v23 = vrot.slane %v638_v37, 1  ;;  %v810_v27 = vshll.u32 %v9339_v61, 16  ;;  %v654_v37 = vshll.u32 %v6417_v21, 16  ;;  %v5314_v53 = vld [vmem:[%s9097_s1 + $0x204] ss:$8 sps:$4 sm:$0xff]  }
  0xe1   : > { %4938 = vmatprep.mubr.msk.bf16.mxu0 %vm326_vm1, %v651_v4  ;;  %4944 = vmatprep.mubr.msk.bf16.mxu1 %vm326_vm1, %v771_v57  ;;  %v787_v4 = vor.u32 %v786_v5, %v782_v31  ;;  %v632_v57 = vshrl.u32 %v6358_v10, 16  ;;  %v240_v5 = vld [vmem:[%s5812_s19 + $0x1a0] sm:$0xff]  ;;  %v774_v42 = vshll.u32 %v6422_v47, 16  ;;  %v241_v61 = vld [vmem:[%s5812_s19 + $0x1a8] sm:$0x3] }
  0xe2   : > { %1403 = vmatpush1.bf16.msra.mxu1 %v5294_v49  ;;  %1949 = vmatprep.subr.bf16.mxu0 %v5302_v16  ;;  %v239_v49 = vld [vmem:[%s5812_s19 + $0x198] sm:$0xff]  ;;  %v9337_v16 = vld [vmem:[#allocation27_spill] sm:$0xff]  ;;  %v656_v44 = vrot.slane %v654_v37, 1  ;;  %v6483_v37 = vpack.c.bf16 %v241_v61, %v241_v61 }
  0xe3   : > { %1404 = vmatprep.subr.bf16.mxu1 %v5305_v15  ;;  %1950 = vmatpush2.bf16.msra.mxu0 %v5300_v22  ;;  %v6438_v31 = vsel %vm326_vm1, %v6015_v51, %v9337_v16  ;;  %v637_v22 = vor.u32 %v636_v19, %v632_v57  ;;  %v757_v15 = vor.u32 %v756_v29, %v752_v7  ;;  %v5309_v16 = vld [vmem:[%s9097_s1 + $0xb0] ss:$8 sps:$4 sm:$0xff]   ;;  %v807_v19 = vrot.slane %v805_v43, 1 }
  0xe4   : > { %1951 = vmatprep.subr.bf16.mxu0 %v5308_v11  ;;  %v791_v8 = vsel %vm511_vm0, %v787_v4, %v790_v6  ;;  %v803_v11 = vshrl.u32 %v9336_v54, 16  ;;  %v6459_v29 = vpack.c.bf16 %v240_v5, %v239_v49  ;;  %v658_v57 = vshll.u32 %v6438_v31, 16  ;;  %v5317_v4 = vld [vmem:[%s9097_s1 + $0xa4] ss:$8 sps:$4 sm:$0xff]   ;;  %v9341_v54 = vld [vmem:[#allocation7_spill] sm:$0xff] }
  0xe5   : > { %v778_v7 = vshll.u32 %v6442_v40, 16  ;;  %v761_v6 = vsel %vm511_vm0, %v757_v15, %v760_v0  ;;  %v812_v43 = vrot.slane %v810_v27, 1  ;;  %v9340_v49 = vld [vmem:[#allocation6_spill] sm:$0xff]  ;;  %v1622_v2 = vrot.slane %v9341_v54, 1 }
  0xe6   : > { %1405 = vmatpush1.bf16.msra.mxu1 %v5303_v63  ;;  %v641_v63 = vsel %vm511_vm0, %v637_v22, %v640_v23  ;;  %v1621_v5 = vrot.slane %v9340_v49, 1  ;;  %v652_v40 = vshrl.u32 %v6417_v21, 16  ;;  %v772_v23 = vshrl.u32 %v6422_v47, 16  ;;  %v5315_v54 = vld [vmem:[%s9097_s1 + $0xa0] ss:$8 sps:$4 sm:$0xff]  }
  0xe7   : > { %1952 = vmatpush2.bf16.msra.mxu0 %v5306_v60  ;;  %1414 = vmatprep.subr.bf16.mxu1 %v5311_v58  ;;  %v776_v0 = vrot.slane %v774_v42, 1  ;;  %v460_v60 = vpop.permute.xlu0 %459  ;;  %v9342_v58 = vld [vmem:[#allocation20_spill] sm:$0xff]  ;;  %v808_v27 = vor.u32 %v807_v19, %v803_v11  ;;  %v827_v42 = vshll.u32 %v6459_v29, 16  ;;  %v660_v15 = vrot.slane %v658_v57, 1 }
  0xe8   : > { %1138 = vmatmul.mubr.bf16.gmra.mxu0 %v641_v63  ;;  %1198 = vmatmul.mubr.bf16.gmra.mxu1 %v761_v6  ;;  %v6478_v22 = vsel %vm326_vm1, %v5917_v56, %v9342_v58  ;;  %v657_v11 = vor.u32 %v656_v44, %v652_v40  ;;  %v1623_v19 = vsel %vm1617_vm2, %v1621_v5, %v1622_v2  ;;  %v832_v6 = vshll.u32 %v6483_v37, 16  ;;  %v5323_v2 = vld [vmem:[%s9097_s1 + $0x84] ss:$8 sps:$4 sm:$0xff]  }
  0xe9   : > { %4939 = vmatprep.mubr.msk.bf16.mxu0 %vm326_vm1, %v671_v18  ;;  %4945 = vmatprep.mubr.msk.bf16.mxu1 %vm326_vm1, %v791_v8  ;;  %v780_v18 = vrot.slane %v778_v7, 1  ;;  %v5320_v8 = vld [vmem:[%s9097_s1 + $0x94] ss:$8 sps:$4 sm:$0xff]   ;;  %v777_v61 = vor.u32 %v776_v0, %v772_v23  ;;  %v813_v57 = vsel %vm511_vm0, %v808_v27, %v812_v43  ;;  %v825_v7 = vshrl.u32 %v6459_v29, 16  ;;  %v462_v43 = vpop.permute.xlu1 %461  ;;  %v9343_v5 = vld [vmem:[#allocation5_spill] sm:$0xff] }
  0xea   : > { %1415 = vmatpush2.bf16.msra.mxu1 %v5309_v16  ;;  %1953 = vmatprep.subr.bf16.mxu0 %v5314_v53  ;;  %v6491_v16 = vsel %vm326_vm1, %v6043_v1, %v460_v60  ;;  %v794_v53 = vshll.u32 %v6478_v22, 16  ;;  %v829_v63 = vrot.slane %v827_v42, 1  ;;  %v661_v60 = vsel %vm511_vm0, %v657_v11, %v660_v15  ;;  %v9344_v0 = vld [vmem:[#allocation19_spill] sm:$0xff] }
  0xeb   : > { %1954 = vmatpush2.bf16.msra.mxu0 %v5312_v45  ;;  %1416 = vmatprep.subr.bf16.mxu1 %v5317_v4  ;;  %v5318_v45 = vld [vmem:[%s9097_s1 + $0x90] ss:$8 sps:$4 sm:$0xff]   ;;  %v798_v4 = vshll.u32 %v6491_v16, 16  ;;  %v781_v44 = vsel %vm511_vm0, %v777_v61, %v780_v18  ;;  %v1627_v23 = vrot.slane %v9343_v5, 1  ;;  %v6513_v58 = vsel %vm326_vm1, %v9329_v9, %v9344_v0  ;;  %v5321_v18 = vld [vmem:[%s9097_s1 + $0x80] ss:$8 sps:$4 sm:$0xff]  }
  0xec   : > { %v796_v40 = vrot.slane %v794_v53, 1  ;;  %v830_v27 = vor.u32 %v829_v63, %v825_v7  ;;  %v9345_v42 = vld [vmem:[#allocation11_spill] sm:$0xff]  ;;  %v9346_v53 = vld [vmem:[#allocation22_spill] sm:$0xff]  ;;  %v816_v7 = vshll.u32 %v6513_v58, 16 }
  0xed   : > { %v1628_v15 = vrot.slane %v9345_v42, 1  ;;  %v1619_v11 = vrot.slane %v9346_v53, 1  ;;  %v800_v61 = vrot.slane %v798_v4, 1 }
  0xee   : > { %1417 = vmatpush2.bf16.msra.mxu1 %v5315_v54  ;;  %v834_v54 = vrot.slane %v832_v6, 1 }
  0xef   : > { %1418 = vmatprep.subr.bf16.mxu1 %v5320_v8  ;;  %v792_v8 = vshrl.u32 %v6478_v22, 16 }
  0xf0   : > { %1148 = vmatmul.mubr.bf16.gmra.mxu0 %v661_v60  ;;  %1208 = vmatmul.mubr.bf16.gmra.mxu1 %v781_v44  ;;  %v835_v6 = vsel %vm511_vm0, %v830_v27, %v834_v54  ;;  %v1629_v60 = vsel %vm1617_vm2, %v1627_v23, %v1628_v15  ;;  %v1634_v23 = vrot.slane %v5975_v24, 1  ;;  %v9348_v27 = vld [vmem:[#allocation23_spill] sm:$0xff]  ;;  %v9349_v15 = vld [vmem:[#allocation21_spill] sm:$0xff]  ;;  %v1639_v24 = vrot.slane %v5856_v26, 1 }
  0xf1   : > { %4946 = vmatprep.mubr.msk.bf16.mxu1 %vm326_vm1, %v813_v57  ;;  %5036 = vmatprep.mubr.msk.bf16.mxu0 %vm326_vm1, %v1623_v19  ;;  %v6523_v19 = vsel %vm326_vm1, %v9333_v3, %v462_v43  ;;  %v9347_v57 = vld [vmem:[#allocation18_spill] sm:$0xff]  ;;  %v797_v63 = vor.u32 %v796_v40, %v792_v8  ;;  %v818_v43 = vrot.slane %v816_v7, 1  ;;  %v1633_v40 = vrot.slane %v5834_v17, 1 }
  0xf2   : > { %1419 = vmatpush2.bf16.msra.mxu1 %v5318_v45  ;;  %v1618_v45 = vrot.slane %v9347_v57, 1  ;;  %v820_v44 = vshll.u32 %v6523_v19, 16  ;;  %v1625_v54 = vrot.slane %v9348_v27, 1  ;;  %v9350_v7 = vld [vmem:[#allocation26_spill] sm:$0xff] }
  0xf3   : > { %1420 = vmatprep.subr.bf16.mxu1 %v5323_v2  ;;  %v801_v0 = vsel %vm511_vm0, %v797_v63, %v800_v61  ;;  %v814_v2 = vshrl.u32 %v6513_v58, 16  ;;  %v1635_v53 = vsel %vm1617_vm2, %v1633_v40, %v1634_v23  ;;  %v1631_v63 = vrot.slane %v9350_v7, 1 }
  0xf4   : > { %v1620_v4 = vsel %vm1617_vm2, %v1618_v45, %v1619_v11  ;;  %v822_v42 = vrot.slane %v820_v44, 1  ;;  %v1640_v45 = vrot.slane %v6000_v41, 1  ;;  %v1646_v41 = vrot.slane %v5991_v35, 1 }
  0xf5   : > { %v819_v8 = vor.u32 %v818_v43, %v814_v2  ;;  %v1636_v2 = vrot.slane %v6180_v14, 1  ;;  %v1652_v35 = vrot.slane %v6015_v51, 1  ;;  %v1658_v51 = vrot.slane %v6008_v48, 1 }
  0xf6   : > { %1421 = vmatpush2.bf16.msra.mxu1 %v5321_v18  ;;  %v1624_v18 = vrot.slane %v9349_v15, 1  ;;  %v1641_v44 = vsel %vm1617_vm2, %v1639_v24, %v1640_v45  ;;  %v1664_v48 = vrot.slane %v6027_v55, 1  ;;  %v1670_v55 = vrot.slane %v5987_v34, 1  ;;  %v9353_v24 = vld [vmem:[#allocation25_spill] sm:$0xff] }
  0xf7   : > { %v823_v11 = vsel %vm511_vm0, %v819_v8, %v822_v42  ;;  %v1676_v34 = vrot.slane %v6037_v62, 1  ;;  %v1666_v45 = vrot.slane %v9353_v24, 1  ;;  %v1682_v62 = vrot.slane %v9331_v20, 1 }
  0xf8   : > { %1218 = vmatmul.mubr.bf16.gmra.mxu1 %v801_v0  ;;  %1956 = vmatmul.mubr.bf16.vlgmr.msra.gmra.mxu0 %v1620_v4  ;;  %v1626_v61 = vsel %vm1617_vm2, %v1624_v18, %v1625_v54  ;;  %v1637_v4 = vrot.slane %v6206_v59, 1  ;;  %v1643_v59 = vrot.slane %v6264_v36, 1  ;;  %v1649_v36 = vrot.slane %v6320_v30, 1 }
  0xf9   : > { %4947 = vmatprep.mubr.msk.bf16.mxu1 %vm326_vm1, %v835_v6  ;;  %5037 = vmatprep.mubr.msk.bf16.mxu0 %vm326_vm1, %v1629_v60  ;;  %v9351_v6 = vld [vmem:[#allocation24_spill] sm:$0xff]  ;;  %v1648_v54 = vrot.slane %v6302_v13, 1  ;;  %v1655_v30 = vrot.slane %v6378_v28, 1  ;;  %v1654_v18 = vrot.slane %v6358_v10, 1  ;;  %v1660_v28 = vrot.slane %v6417_v21, 1 }
  0xfa   : > { %v1630_v60 = vrot.slane %v9351_v6, 1  ;;  %v1638_v40 = vsel %vm1617_vm2, %v1636_v2, %v1637_v4  ;;  %v9358_v4 = vld [vmem:[#allocation31_spill] sm:$0xff] }
  0xfb   : > { %v1678_v2 = vrot.slane %v9358_v4, 1 }
  0xfc   : > { %v1632_v0 = vsel %vm1617_vm2, %v1630_v60, %v1631_v63 }
 0x100   : > { %1228 = vmatmul.mubr.bf16.gmra.mxu1 %v823_v11  ;;  %1966 = vmatmul.mubr.bf16.gmra.mxu0 %v1626_v61 }
 0x101   : > { %4972 = vmatprep.mubr.msk.bf16.mxu1 %vm326_vm1, %v9340_v49  ;;  %5038 = vmatprep.mubr.msk.bf16.mxu0 %vm326_vm1, %v1635_v53  ;;  %v1645_v49 = vrot.slane %v5852_v25, 1  ;;  %v1656_v53 = vsel %vm1617_vm2, %v1654_v18, %v1655_v30 }
 0x103   : > { %v1647_v43 = vsel %vm1617_vm2, %v1645_v49, %v1646_v41  ;;  %v9356_v49 = vld [vmem:[#allocation13_spill] sm:$0xff]  ;;  %v9357_v41 = vld [vmem:[#allocation32_spill] sm:$0xff] }
 0x104   : > { %v1688_v20 = vrot.slane %v9356_v49, 1 }
 0x108   : > { %1423 = vmatmul.mubr.bf16.vlgmr.msra.gmra.mxu1 %v9347_v57  ;;  %1976 = vmatmul.mubr.bf16.gmra.mxu0 %v1632_v0  ;;  %v1642_v57 = vrot.slane %v6243_v12, 1 }
 0x109   : > { %4973 = vmatprep.mubr.msk.bf16.mxu1 %vm326_vm1, %v9343_v5  ;;  %5039 = vmatprep.mubr.msk.bf16.mxu0 %vm326_vm1, %v1641_v44  ;;  %v1651_v5 = vrot.slane %v5871_v33, 1 }
 0x10a   : > { %v1644_v27 = vsel %vm1617_vm2, %v1642_v57, %v1643_v59  ;;  %v6642_v59 = vld [vmem:[%s9098_s2] sm:$0x3] }
 0x10b   : > { %v1653_v23 = vsel %vm1617_vm2, %v1651_v5, %v1652_v35  ;;  %v1694_v35 = vrot.slane %v6043_v1, 1  ;;  %v1699_v1 = vrot.slane %v9329_v9, 1 }
 0x110   : > { %1433 = vmatmul.mubr.bf16.gmra.mxu1 %v9349_v15  ;;  %1986 = vmatmul.mubr.bf16.gmra.mxu0 %v1638_v40  ;;  %v1650_v15 = vsel %vm1617_vm2, %v1648_v54, %v1649_v36 }
 0x111   : > { %4974 = vmatprep.mubr.msk.bf16.mxu1 %vm326_vm1, %v5834_v17  ;;  %5040 = vmatprep.mubr.msk.bf16.mxu0 %vm326_vm1, %v1647_v43  ;;  %v1657_v17 = vrot.slane %v5867_v32, 1  ;;  %v2182_v43 = vlaneseq }
 0x113   : > { %v1659_v42 = vsel %vm1617_vm2, %v1657_v17, %v1658_v51  ;;  %v9361_v51 = vld [vmem:[#allocation33_spill] sm:$0xff] }
 0x118   : > { %1443 = vmatmul.mubr.bf16.gmra.mxu1 %v9351_v6  ;;  %1996 = vmatmul.mubr.bf16.gmra.mxu0 %v1644_v27  ;;  %v9354_v6 = vld [vmem:[#allocation29_spill] sm:$0xff] }
 0x119   : > { %4975 = vmatprep.mubr.msk.bf16.mxu1 %vm326_vm1, %v5856_v26  ;;  %5041 = vmatprep.mubr.msk.bf16.mxu0 %vm326_vm1, %v1653_v23  ;;  %v1663_v26 = vrot.slane %v5883_v39, 1  ;;  %v1672_v60 = vrot.slane %v9354_v6, 1  ;;  %v9359_v23 = vld [vmem:[#allocation34_spill] sm:$0xff] }
 0x11a   : > { %v1685_v27 = vrot.slane %v9359_v23, 1 }
 0x11b   : > { %v1665_v8 = vsel %vm1617_vm2, %v1663_v26, %v1664_v48  ;;  %v9363_v48 = vld [vmem:[#allocation35_spill] sm:$0xff] }
 0x11c   : > { %v1690_v30 = vrot.slane %v9363_v48, 1 }
 0x120   : > { %1453 = vmatmul.mubr.bf16.gmra.mxu1 %v6180_v14  ;;  %2006 = vmatmul.mubr.bf16.gmra.mxu0 %v1650_v15  ;;  %v1661_v14 = vrot.slane %v6438_v31, 1  ;;  %v9362_v15 = vld [vmem:[#allocation10_spill] sm:$0xff] }
 0x121   : > { %4976 = vmatprep.mubr.msk.bf16.mxu1 %vm326_vm1, %v5852_v25  ;;  %5042 = vmatprep.mubr.msk.bf16.mxu0 %vm326_vm1, %v1659_v42  ;;  %v1669_v25 = vrot.slane %v5879_v38, 1  ;;  %v1700_v42 = vrot.slane %v9333_v3, 1  ;;  %v1691_v26 = vrot.slane %v9362_v15, 1 }
 0x122   : > { %v1662_v61 = vsel %vm1617_vm2, %v1660_v28, %v1661_v14  ;;  %v1696_v28 = vrot.slane %v6422_v47, 1 }
 0x123   : > { %v1671_v11 = vsel %vm1617_vm2, %v1669_v25, %v1670_v55  ;;  %v1701_v18 = vsel %vm1617_vm2, %v1699_v1, %v1700_v42  ;;  %v9365_v25 = vld [vmem:[#allocation14_spill] sm:$0xff]  ;;  %v9366_v55 = vld [vmem:[#allocation28_spill] sm:$0xff] }
 0x124   : > { %v1706_v3 = vrot.slane %v9365_v25, 1  ;;  %v1697_v14 = vrot.slane %v9366_v55, 1 }
 0x128   : > { %1463 = vmatmul.mubr.bf16.gmra.mxu1 %v6243_v12  ;;  %2016 = vmatmul.mubr.bf16.gmra.mxu0 %v1656_v53  ;;  %v9352_v12 = vld [vmem:[#allocation30_spill] sm:$0xff] }
 0x129   : > { %4977 = vmatprep.mubr.msk.bf16.mxu1 %vm326_vm1, %v5871_v33  ;;  %5043 = vmatprep.mubr.msk.bf16.mxu0 %vm326_vm1, %v1665_v8  ;;  %v1675_v33 = vrot.slane %v5904_v50, 1  ;;  %v1667_v31 = vrot.slane %v9352_v12, 1  ;;  %v1692_v8 = vsel %vm1617_vm2, %v1690_v30, %v1691_v26  ;;  %v1703_v12 = vrot.slane %v6491_v16, 1 }
 0x12b   : > { %v1677_v7 = vsel %vm1617_vm2, %v1675_v33, %v1676_v34  ;;  %v1668_v63 = vsel %vm1617_vm2, %v1666_v45, %v1667_v31  ;;  %v1711_v33 = vrot.slane %v6459_v29, 1  ;;  %v1712_v34 = vrot.slane %v6483_v37, 1 }
 0x12c   : > { %v1702_v31 = vrot.slane %v6478_v22, 1  ;;  %v1708_v37 = vrot.slane %v6513_v58, 1 }
 0x12e   : > { %v1704_v45 = vsel %vm1617_vm2, %v1702_v31, %v1703_v12 }
 0x130   : > { %1473 = vmatmul.mubr.bf16.gmra.mxu1 %v6302_v13  ;;  %2026 = vmatmul.mubr.bf16.gmra.mxu0 %v1662_v61  ;;  %v1673_v13 = vrot.slane %v6210_v52, 1  ;;  %v1679_v52 = vrot.slane %v9357_v41, 1  ;;  %v1698_v61 = vsel %vm1617_vm2, %v1696_v28, %v1697_v14 }
 0x131   : > { %4978 = vmatprep.mubr.msk.bf16.mxu1 %vm326_vm1, %v5867_v32  ;;  %5044 = vmatprep.mubr.msk.bf16.mxu0 %vm326_vm1, %v1671_v11  ;;  %v1681_v32 = vrot.slane %v5893_v46, 1 }
 0x132   : > { %v1674_v0 = vsel %vm1617_vm2, %v1672_v60, %v1673_v13  ;;  %v1680_v5 = vsel %vm1617_vm2, %v1678_v2, %v1679_v52 }
 0x133   : > { %v1683_v44 = vsel %vm1617_vm2, %v1681_v32, %v1682_v62 }
 0x138   : > { %1483 = vmatmul.mubr.bf16.gmra.mxu1 %v6358_v10  ;;  %2036 = vmatmul.mubr.bf16.gmra.mxu0 %v1668_v63 }
 0x139   : > { %4979 = vmatprep.mubr.msk.bf16.mxu1 %vm326_vm1, %v5883_v39  ;;  %5045 = vmatprep.mubr.msk.bf16.mxu0 %vm326_vm1, %v1677_v7  ;;  %v9355_v39 = vld [vmem:[#allocation8_spill] sm:$0xff] }
 0x13a   : > { %v1687_v10 = vrot.slane %v9355_v39, 1 }
 0x13c   : > { %v1689_v40 = vsel %vm1617_vm2, %v1687_v10, %v1688_v20 }
 0x140   : > { %1493 = vmatmul.mubr.bf16.gmra.mxu1 %v6417_v21  ;;  %2046 = vmatmul.mubr.bf16.gmra.mxu0 %v1674_v0  ;;  %v6631_v21 = vshrl.u32 %v2182_v43, 7 }
 0x141   : > { %4980 = vmatprep.mubr.msk.bf16.mxu1 %vm326_vm1, %v5879_v38  ;;  %5046 = vmatprep.mubr.msk.bf16.mxu0 %vm326_vm1, %v1683_v44  ;;  %v1693_v38 = vrot.slane %v5917_v56, 1 }
 0x142   : > { %v2184_v57 = vsub.s32 0, %v6631_v21 }
 0x143   : > { %v1695_v36 = vsel %vm1617_vm2, %v1693_v38, %v1694_v35 }
 0x144   : > { %v6647_v17 = vrot.slane %v6642_v59, %v2184_v57 }
 0x146   : > { %9360 = vst [vmem:[#allocation12_spill] sm:$0xff] %v6647_v17 }
 0x148   : > { %1503 = vmatmul.mubr.bf16.gmra.mxu1 %v9353_v24  ;;  %2056 = vmatmul.mubr.bf16.gmra.mxu0 %v1680_v5  ;;  %v1713_v24 = vsel %vm1617_vm2, %v1711_v33, %v1712_v34 }
 0x149   : > { %4981 = vmatprep.mubr.msk.bf16.mxu1 %vm326_vm1, %v5904_v50  ;;  %5047 = vmatprep.mubr.msk.bf16.mxu0 %vm326_vm1, %v1689_v40  ;;  %v1684_v50 = vrot.slane %v9361_v51, 1 }
 0x14b   : > { %v1686_v54 = vsel %vm1617_vm2, %v1684_v50, %v1685_v27 }
 0x150   : > { %1513 = vmatmul.mubr.bf16.gmra.mxu1 %v9354_v6  ;;  %2066 = vmatmul.mubr.bf16.gmra.mxu0 %v1686_v54 }
 0x151   : > { %4982 = vmatprep.mubr.msk.bf16.mxu1 %vm326_vm1, %v5893_v46  ;;  %5048 = vmatprep.mubr.msk.bf16.mxu0 %vm326_vm1, %v1695_v36  ;;  %v9364_v46 = vld [vmem:[#allocation9_spill] sm:$0xff] }
 0x152   : > { %v1705_v53 = vrot.slane %v9364_v46, 1 }
 0x154   : > { %v1707_v11 = vsel %vm1617_vm2, %v1705_v53, %v1706_v3 }
 0x158   : > { %1523 = vmatmul.mubr.bf16.gmra.mxu1 %v9358_v4  ;;  %2076 = vmatmul.mubr.bf16.gmra.mxu0 %v1692_v8 }
 0x159   : > { %4983 = vmatprep.mubr.msk.bf16.mxu1 %vm326_vm1, %v9355_v39  ;;  %5049 = vmatprep.mubr.msk.bf16.mxu0 %vm326_vm1, %v1701_v18 }
 0x160   : > { %1533 = vmatmul.mubr.bf16.gmra.mxu1 %v9361_v51  ;;  %2086 = vmatmul.mubr.bf16.gmra.mxu0 %v1698_v61 }
 0x161   : > { %4984 = vmatprep.mubr.msk.bf16.mxu1 %vm326_vm1, %v5917_v56  ;;  %5050 = vmatprep.mubr.msk.bf16.mxu0 %vm326_vm1, %v1707_v11  ;;  %v1709_v56 = vrot.slane %v6523_v19, 1 }
 0x163   : > { %v1710_v16 = vsel %vm1617_vm2, %v1708_v37, %v1709_v56 }
 0x168   : > { %1543 = vmatmul.mubr.bf16.gmra.mxu1 %v9363_v48  ;;  %2096 = vmatmul.mubr.bf16.gmra.mxu0 %v1704_v45 }
 0x169   : > { %4985 = vmatprep.mubr.msk.bf16.mxu1 %vm326_vm1, %v9329_v9  ;;  %5051 = vmatprep.mubr.msk.bf16.mxu0 %vm326_vm1, %v1713_v24 }
 0x170   : > { %1553 = vmatmul.mubr.bf16.gmra.mxu1 %v6422_v47  ;;  %2106 = vmatmul.mubr.bf16.gmra.mxu0 %v1710_v16 }
 0x171   : > { %4986 = vmatprep.mubr.msk.bf16.mxu1 %vm326_vm1, %v9364_v46 }
 0x178   : > { %v6692_v7 = vpop.f32.mrf.mxu0  ;;  %1563 = vmatmul.mubr.bf16.gmra.mxu1 %v6478_v22 }
 0x179   : > { %4987 = vmatprep.mubr.msk.bf16.mxu1 %vm326_vm1, %v6459_v29 }
 0x17a   : > { %v6697_v9 = vpop.f32.mrf.mxu0 }
 0x17c   : > { %v6699_v19 = vpop.f32.mrf.mxu0 }
 0x17e   : > { %v6701_v63 = vpop.f32.mrf.mxu0 }
 0x180   : > { %v6703_v32 = vpop.f32.mrf.mxu0  ;;  %1573 = vmatmul.mubr.bf16.gmra.mxu1 %v6513_v58 }
 0x182   : > { %v6706_v47 = vpop.f32.mrf.mxu0 }
 0x184   : > { %v6708_v62 = vpop.f32.mrf.mxu0 }
 0x186   : > { %v6710_v13 = vpop.f32.mrf.mxu0 }
 0x188   : > { %v6712_v22 = vpop.f32.mrf.mxu0  ;;  %v6714_v6 = vpop.f32.mrf.mxu1 }
 0x18a   : > { %v6716_v29 = vpop.f32.mrf.mxu0  ;;  %v6718_v60 = vpop.f32.mrf.mxu1 }
 0x18c   : > { %v6720_v44 = vpop.f32.mrf.mxu0  ;;  %v6722_v0 = vpop.f32.mrf.mxu1 }
 0x18e   : > { %v6724_v39 = vpop.f32.mrf.mxu0  ;;  %v6726_v58 = vpop.f32.mrf.mxu1 }
 0x190   : > { %v6728_v10 = vpop.f32.mrf.mxu0  ;;  %v6730_v49 = vpop.f32.mrf.mxu1 }
 0x192   : > { %v6732_v20 = vpop.f32.mrf.mxu0  ;;  %v6734_v41 = vpop.f32.mrf.mxu1 }
 0x194   : > { %v6736_v52 = vpop.f32.mrf.mxu0  ;;  %v6738_v4 = vpop.f32.mrf.mxu1 }
 0x196   : > { %v6740_v2 = vpop.f32.mrf.mxu0  ;;  %v6742_v43 = vpop.f32.mrf.mxu1 }
 0x197   : > { %9367 = vst [vmem:[#allocation15_spill] sm:$0xff] %v6742_v43 }
 0x198   : > { %v6744_v40 = vpop.f32.mrf.mxu0  ;;  %v6746_v5 = vpop.f32.mrf.mxu1 }
 0x199   : > { %9368 = vst [vmem:[#allocation16_spill] sm:$0xff] %v6746_v5 }
 0x19a   : > { %v6748_v38 = vpop.f32.mrf.mxu0  ;;  %v6750_v35 = vpop.f32.mrf.mxu1 }
 0x19b   : > { %9369 = vst [vmem:[#allocation17_spill] sm:$0xff] %v6750_v35 }
 0x19c   : > { %v6752_v57 = vpop.f32.mrf.mxu0  ;;  %v6754_v23 = vpop.f32.mrf.mxu1 }
 0x19d   : > { %9370 = vst [vmem:[#allocation27_spill] sm:$0xff] %v6754_v23 }
 0x19e   : > { %v6756_v27 = vpop.f32.mrf.mxu0  ;;  %v6758_v51 = vpop.f32.mrf.mxu1 }
 0x19f   : > { %9371 = vst [vmem:[#allocation6_spill] sm:$0xff] %v6758_v51 }
 0x1a0   : > { %v6760_v50 = vpop.f32.mrf.mxu0  ;;  %v6762_v36 = vpop.f32.mrf.mxu1 }
 0x1a1   : > { %9372 = vst [vmem:[#allocation7_spill] sm:$0xff] %v6762_v36 }
 0x1a2   : > { %v6764_v54 = vpop.f32.mrf.mxu0  ;;  %v6766_v1 = vpop.f32.mrf.mxu1 }
 0x1a3   : > { %9373 = vst [vmem:[#allocation20_spill] sm:$0xff] %v6766_v1 }
 0x1a4   : > { %v6768_v42 = vpop.f32.mrf.mxu0  ;;  %v6770_v15 = vpop.f32.mrf.mxu1 }
 0x1a5   : > { %9374 = vst [vmem:[#allocation5_spill] sm:$0xff] %v6770_v15 }
 0x1a6   : > { %v6772_v26 = vpop.f32.mrf.mxu0  ;;  %v6774_v48 = vpop.f32.mrf.mxu1 }
 0x1a7   : > { %9375 = vst [vmem:[#allocation19_spill] sm:$0xff] %v6774_v48 }
 0x1a8   : > { %v6776_v30 = vpop.f32.mrf.mxu0  ;;  %v6778_v18 = vpop.f32.mrf.mxu1 }
 0x1a9   : > { %9376 = vst [vmem:[#allocation11_spill] sm:$0xff] %v6778_v18 }
 0x1aa   : > { %v6780_v8 = vpop.f32.mrf.mxu0  ;;  %v6782_v46 = vpop.f32.mrf.mxu1 }
 0x1ab   : > { %9377 = vst [vmem:[#allocation22_spill] sm:$0xff] %v6782_v46 }
 0x1ac   : > { %v6784_v53 = vpop.f32.mrf.mxu0  ;;  %v6786_v25 = vpop.f32.mrf.mxu1 }
 0x1ad   : > { %9378 = vst [vmem:[#allocation18_spill] sm:$0xff] %v6786_v25 }
 0x1ae   : > { %v6788_v3 = vpop.f32.mrf.mxu0  ;;  %v6790_v55 = vpop.f32.mrf.mxu1 }
 0x1af   : > { %9379 = vst [vmem:[#allocation23_spill] sm:$0xff] %v6790_v55 }
 0x1b0   : > { %v6792_v14 = vpop.f32.mrf.mxu0  ;;  %v6794_v28 = vpop.f32.mrf.mxu1 }
 0x1b1   : > { %9380 = vst [vmem:[#allocation21_spill] sm:$0xff] %v6794_v28 }
 0x1b2   : > { %v6796_v11 = vpop.f32.mrf.mxu0  ;;  %v6798_v61 = vpop.f32.mrf.mxu1 }
 0x1b3   : > { %9381 = vst [vmem:[#allocation26_spill] sm:$0xff] %v6798_v61 }
 0x1b4   : > { %v6800_v33 = vpop.f32.mrf.mxu0  ;;  %v6802_v34 = vpop.f32.mrf.mxu1 }
 0x1b5   : > { %9382 = vst [vmem:[#allocation24_spill] sm:$0xff] %v6802_v34 }
 0x1b6   : > { %v6804_v12 = vpop.f32.mrf.mxu0  ;;  %v6806_v31 = vpop.f32.mrf.mxu1 }
 0x1b7   : > { %9383 = vst [vmem:[#allocation30_spill] sm:$0xff] %v6806_v31 }
 0x1b8   : > { %v6808_v24 = vpop.f32.mrf.mxu1  ;;  %v1957_v45 = vpop.f32.mrf.mxu0 }
 0x1b9   : > { %9384 = vst [vmem:[#allocation25_spill] sm:$0xff] %v6808_v24 }
 0x1ba   : > { %v6810_v56 = vpop.f32.mrf.mxu1  ;;  %v1959_v37 = vpop.f32.mrf.mxu0 }
 0x1bb   : > { %9385 = vst [vmem:[#allocation29_spill] sm:$0xff] %v6810_v56  ;;  %v2188_v56 = vsub.s32 1, %v6631_v21 }
 0x1bc   : > { %v6812_v16 = vpop.f32.mrf.mxu1  ;;  %v1961_v17 = vpop.f32.mrf.mxu0 }
 0x1bd   : > { %9386 = vst [vmem:[#allocation8_spill] sm:$0xff] %v6812_v16 }
 0x1be   : > { %v6814_v28 = vpop.f32.mrf.mxu1  ;;  %v1963_v61 = vpop.f32.mrf.mxu0 }
 0x1bf   : > { %9387 = vst [vmem:[#allocation13_spill] sm:$0xff] %v6814_v28 }
 0x1c0   : > { %v6816_v55 = vpop.f32.mrf.mxu1  ;;  %v1967_v25 = vpop.f32.mrf.mxu0 }
 0x1c1   : > { %9388 = vst [vmem:[#allocation32_spill] sm:$0xff] %v6816_v55 }
 0x1c2   : > { %v6818_v34 = vpop.f32.mrf.mxu1  ;;  %v1969_v46 = vpop.f32.mrf.mxu0 }
 0x1c3   : > { %9389 = vst [vmem:[#allocation31_spill] sm:$0xff] %v6818_v34  ;;  %v6830_v34 = vrot.slane %v6642_v59, %v2188_v56 }
 0x1c4   : > { %v6820_v18 = vpop.f32.mrf.mxu1  ;;  %v1971_v31 = vpop.f32.mrf.mxu0 }
 0x1c5   : > { %9390 = vst [vmem:[#allocation34_spill] sm:$0xff] %v6820_v18 }
 0x1c6   : > { %v6822_v24 = vpop.f32.mrf.mxu1  ;;  %v1973_v48 = vpop.f32.mrf.mxu0 }
 0x1c7   : > { %9391 = vst [vmem:[#allocation33_spill] sm:$0xff] %v6822_v24 }
 0x1c8   : > { %v1424_v15 = vpop.f32.mrf.mxu1  ;;  %v1977_v16 = vpop.f32.mrf.mxu0 }
 0x1c9   : > { %v1425_v1 = vadd.f32 %v1424_v15, %v6692_v7 }
 0x1ca   : > { %v1426_v28 = vpop.f32.mrf.mxu1  ;;  %v1979_v36 = vpop.f32.mrf.mxu0 }
 0x1cb   : > { %v6826_v51 = vadd.f32 %v1957_v45, %v1425_v1  ;;  %v1427_v55 = vadd.f32 %v1426_v28, %v6697_v9 }
 0x1cc   : > { %v1428_v18 = vpop.f32.mrf.mxu1  ;;  %v1981_v23 = vpop.f32.mrf.mxu0 }
 0x1cd   : > { %9392 = vst [vmem:[#allocation10_spill] sm:$0xff] %v6826_v51  ;;  %v2117_v35 = vadd.f32 %v1959_v37, %v1427_v55  ;;  %v1429_v24 = vadd.f32 %v1428_v18, %v6699_v19 }
 0x1ce   : > { %v1430_v5 = vpop.f32.mrf.mxu1  ;;  %v1983_v21 = vpop.f32.mrf.mxu0 }
 0x1cf   : > { %v6834_v43 = vadd.f32 %v6830_v34, %v2117_v35  ;;  %v6836_v7 = vadd.f32 %v1961_v17, %v1429_v24  ;;  %v1431_v1 = vadd.f32 %v1430_v5, %v6701_v63 }
 0x1d0   : > { %v1434_v15 = vpop.f32.mrf.mxu1  ;;  %v1987_v45 = vpop.f32.mrf.mxu0 }
 0x1d1   : > { %9393 = vst [vmem:[#allocation35_spill] sm:$0xff] %v6834_v43  ;;  %9394 = vst [vmem:[#allocation9_spill] sm:$0xff] %v6836_v7  ;;  %v2119_v9 = vadd.f32 %v1963_v61, %v1431_v1  ;;  %v1435_v59 = vadd.f32 %v1434_v15, %v6703_v32  ;;  %2352 = vrot.lane.b32.xlu0 %v6834_v43, %s5707_s23 }
 0x1d2   : > { %v1436_v55 = vpop.f32.mrf.mxu1  ;;  %v1989_v19 = vpop.f32.mrf.mxu0 }
 0x1d3   : > { %v6843_v18 = vadd.f32 %v6830_v34, %v2119_v9  ;;  %v6845_v35 = vadd.f32 %v1967_v25, %v1435_v59  ;;  %v1437_v17 = vadd.f32 %v1436_v55, %v6706_v47 }
 0x1d4   : > { %v1438_v28 = vpop.f32.mrf.mxu1  ;;  %v1991_v63 = vpop.f32.mrf.mxu0 }
 0x1d5   : > { %9395 = vst [vmem:[#allocation14_spill] sm:$0xff] %v6843_v18  ;;  %9396 = vst [vmem:[#allocation28_spill] sm:$0xff] %v6845_v35  ;;  %v2121_v5 = vadd.f32 %v1969_v46, %v1437_v17  ;;  %v1439_v61 = vadd.f32 %v1438_v28, %v6708_v62  ;;  %2480 = vrot.lane.b32.xlu0 %v6834_v43, %s5708_s26  ;;  %2354 = vrot.lane.b32.xlu1 %v6843_v18, %s5707_s23 }
 0x1d6   : > { %v1440_v32 = vpop.f32.mrf.mxu1  ;;  %v1993_v24 = vpop.f32.mrf.mxu0 }
 0x1d7   : > { %v6854_v56 = vadd.f32 %v6830_v34, %v2121_v5  ;;  %v6856_v25 = vadd.f32 %v1971_v31, %v1439_v61  ;;  %v1441_v47 = vadd.f32 %v1440_v32, %v6710_v13 }
 0x1d8   : > { %v1444_v37 = vpop.f32.mrf.mxu1  ;;  %v1997_v46 = vpop.f32.mrf.mxu0 }
 0x1d9   : > { %9397 = vst [vmem:[#allocation36_spill] sm:$0xff] %v6854_v56  ;;  %9398 = vst [vmem:[#allocation37_spill] sm:$0xff] %v6856_v25  ;;  %v2123_v1 = vadd.f32 %v1973_v48, %v1441_v47  ;;  %v1445_v62 = vadd.f32 %v1444_v37, %v6712_v22  ;;  %2482 = vrot.lane.b32.xlu1 %v6843_v18, %s5708_s26  ;;  %2356 = vrot.lane.b32.xlu0 %v6854_v56, %s5707_s23 }
 0x1da   : > { %v1446_v15 = vpop.f32.mrf.mxu1  ;;  %v1999_v9 = vpop.f32.mrf.mxu0 }
 0x1db   : > { %v6865_v59 = vadd.f32 %v6830_v34, %v2123_v1  ;;  %v6867_v31 = vadd.f32 %v1977_v16, %v1445_v62  ;;  %v1447_v13 = vadd.f32 %v1446_v15, %v6716_v29 }
 0x1dc   : > { %v1448_v55 = vpop.f32.mrf.mxu1  ;;  %v2001_v17 = vpop.f32.mrf.mxu0 }
 0x1dd   : > { %9399 = vst [vmem:[#allocation38_spill] sm:$0xff] %v6865_v59  ;;  %9400 = vst [vmem:[#allocation39_spill] sm:$0xff] %v6867_v31  ;;  %v2125_v48 = vadd.f32 %v1979_v36, %v1447_v13  ;;  %v1449_v22 = vadd.f32 %v1448_v55, %v6720_v44  ;;  %2484 = vrot.lane.b32.xlu0 %v6854_v56, %s5708_s26  ;;  %2358 = vrot.lane.b32.xlu1 %v6865_v59, %s5707_s23 }
 0x1de   : > { %v1450_v28 = vpop.f32.mrf.mxu1  ;;  %v2003_v5 = vpop.f32.mrf.mxu0 }
 0x1df   : > { %v6876_v61 = vadd.f32 %v6830_v34, %v2125_v48  ;;  %v6878_v16 = vadd.f32 %v1981_v23, %v1449_v22  ;;  %v1451_v29 = vadd.f32 %v1450_v28, %v6724_v39 }
 0x1e0   : > { %v1454_v32 = vpop.f32.mrf.mxu1  ;;  %v2007_v47 = vpop.f32.mrf.mxu0 }
 0x1e1   : > { %9401 = vst [vmem:[#allocation40_spill] sm:$0xff] %v6876_v61  ;;  %9402 = vst [vmem:[#allocation41_spill] sm:$0xff] %v6878_v16  ;;  %v2127_v36 = vadd.f32 %v1983_v21, %v1451_v29  ;;  %v1455_v44 = vadd.f32 %v1454_v32, %v6728_v10  ;;  %2486 = vrot.lane.b32.xlu1 %v6865_v59, %s5708_s26  ;;  %2360 = vrot.lane.b32.xlu0 %v6876_v61, %s5707_s23 }
 0x1e2   : > { %v1456_v37 = vpop.f32.mrf.mxu1  ;;  %v2009_v1 = vpop.f32.mrf.mxu0 }
 0x1e3   : > { %v6887_v62 = vadd.f32 %v6830_v34, %v2127_v36  ;;  %v6889_v23 = vadd.f32 %v1987_v45, %v1455_v44  ;;  %v1457_v39 = vadd.f32 %v1456_v37, %v6732_v20 }
 0x1e4   : > { %v1458_v15 = vpop.f32.mrf.mxu1  ;;  %v2011_v13 = vpop.f32.mrf.mxu0 }
 0x1e5   : > { %9403 = vst [vmem:[#allocation42_spill] sm:$0xff] %v6887_v62  ;;  %9404 = vst [vmem:[#allocation43_spill] sm:$0xff] %v6889_v23  ;;  %v2129_v21 = vadd.f32 %v1989_v19, %v1457_v39  ;;  %v1459_v10 = vadd.f32 %v1458_v15, %v6736_v52  ;;  %2488 = vrot.lane.b32.xlu0 %v6876_v61, %s5708_s26  ;;  %2362 = vrot.lane.b32.xlu1 %v6887_v62, %s5707_s23 }
 0x1e6   : > { %v1460_v55 = vpop.f32.mrf.mxu1  ;;  %v2013_v48 = vpop.f32.mrf.mxu0 }
 0x1e7   : > { %v6898_v22 = vadd.f32 %v6830_v34, %v2129_v21  ;;  %v6900_v45 = vadd.f32 %v1991_v63, %v1459_v10  ;;  %v1461_v20 = vadd.f32 %v1460_v55, %v6740_v2 }
 0x1e8   : > { %v1464_v28 = vpop.f32.mrf.mxu1  ;;  %v2017_v29 = vpop.f32.mrf.mxu0 }
 0x1e9   : > { %9405 = vst [vmem:[#allocation44_spill] sm:$0xff] %v6898_v22  ;;  %9406 = vst [vmem:[#allocation45_spill] sm:$0xff] %v6900_v45  ;;  %v2131_v19 = vadd.f32 %v1993_v24, %v1461_v20  ;;  %v1465_v52 = vadd.f32 %v1464_v28, %v6744_v40  ;;  %2490 = vrot.lane.b32.xlu1 %v6887_v62, %s5708_s26  ;;  %2364 = vrot.lane.b32.xlu0 %v6898_v22, %s5707_s23 }
 0x1ea   : > { %v1466_v32 = vpop.f32.mrf.mxu1  ;;  %v2019_v36 = vpop.f32.mrf.mxu0 }
 0x1eb   : > { %v6909_v44 = vadd.f32 %v6830_v34, %v2131_v19  ;;  %v6911_v63 = vadd.f32 %v1997_v46, %v1465_v52  ;;  %v1467_v2 = vadd.f32 %v1466_v32, %v6748_v38 }
 0x1ec   : > { %v1468_v37 = vpop.f32.mrf.mxu1  ;;  %v2021_v39 = vpop.f32.mrf.mxu0 }
 0x1ed   : > { %9407 = vst [vmem:[#allocation46_spill] sm:$0xff] %v6909_v44  ;;  %9408 = vst [vmem:[#allocation47_spill] sm:$0xff] %v6911_v63  ;;  %v2133_v24 = vadd.f32 %v1999_v9, %v1467_v2  ;;  %v1469_v40 = vadd.f32 %v1468_v37, %v6752_v57  ;;  %2492 = vrot.lane.b32.xlu0 %v6898_v22, %s5708_s26  ;;  %2366 = vrot.lane.b32.xlu1 %v6909_v44, %s5707_s23 }
 0x1ee   : > { %v1470_v15 = vpop.f32.mrf.mxu1  ;;  %v2023_v21 = vpop.f32.mrf.mxu0 }
 0x1ef   : > { %v6920_v10 = vadd.f32 %v6830_v34, %v2133_v24  ;;  %v6922_v46 = vadd.f32 %v2001_v17, %v1469_v40  ;;  %v1471_v38 = vadd.f32 %v1470_v15, %v6756_v27 }
 0x1f0   : > { %v1474_v55 = vpop.f32.mrf.mxu1  ;;  %v2027_v20 = vpop.f32.mrf.mxu0 }
 0x1f1   : > { %9409 = vst [vmem:[#allocation48_spill] sm:$0xff] %v6920_v10  ;;  %9410 = vst [vmem:[#allocation49_spill] sm:$0xff] %v6922_v46  ;;  %v2135_v9 = vadd.f32 %v2003_v5, %v1471_v38  ;;  %v1475_v57 = vadd.f32 %v1474_v55, %v6760_v50  ;;  %2494 = vrot.lane.b32.xlu1 %v6909_v44, %s5708_s26  ;;  %2368 = vrot.lane.b32.xlu0 %v6920_v10, %s5707_s23 }
 0x1f2   : > { %v1476_v28 = vpop.f32.mrf.mxu1  ;;  %v2029_v19 = vpop.f32.mrf.mxu0 }
 0x1f3   : > { %v6931_v52 = vadd.f32 %v6830_v34, %v2135_v9  ;;  %v6933_v17 = vadd.f32 %v2007_v47, %v1475_v57  ;;  %v1477_v27 = vadd.f32 %v1476_v28, %v6764_v54 }
 0x1f4   : > { %v1478_v32 = vpop.f32.mrf.mxu1  ;;  %v2031_v2 = vpop.f32.mrf.mxu0 }
 0x1f5   : > { %9411 = vst [vmem:[#allocation50_spill] sm:$0xff] %v6931_v52  ;;  %9412 = vst [vmem:[#allocation51_spill] sm:$0xff] %v6933_v17  ;;  %v2137_v5 = vadd.f32 %v2009_v1, %v1477_v27  ;;  %v1479_v50 = vadd.f32 %v1478_v32, %v6768_v42  ;;  %2496 = vrot.lane.b32.xlu0 %v6920_v10, %s5708_s26  ;;  %2370 = vrot.lane.b32.xlu1 %v6931_v52, %s5707_s23 }
 0x1f6   : > { %v1480_v37 = vpop.f32.mrf.mxu1  ;;  %v2033_v24 = vpop.f32.mrf.mxu0 }
 0x1f7   : > { %v6942_v40 = vadd.f32 %v6830_v34, %v2137_v5  ;;  %v6944_v47 = vadd.f32 %v2011_v13, %v1479_v50  ;;  %v1481_v54 = vadd.f32 %v1480_v37, %v6772_v26 }
 0x1f8   : > { %v1484_v15 = vpop.f32.mrf.mxu1  ;;  %v2037_v38 = vpop.f32.mrf.mxu0 }
 0x1f9   : > { %9413 = vst [vmem:[#allocation52_spill] sm:$0xff] %v6944_v47  ;;  %v2139_v1 = vadd.f32 %v2013_v48, %v1481_v54  ;;  %v1485_v42 = vadd.f32 %v1484_v15, %v6776_v30  ;;  %2498 = vrot.lane.b32.xlu1 %v6931_v52, %s5708_s26  ;;  %2372 = vrot.lane.b32.xlu0 %v6942_v40, %s5707_s23 }
 0x1fa   : > { %v1486_v55 = vpop.f32.mrf.mxu1  ;;  %v2039_v9 = vpop.f32.mrf.mxu0 }
 0x1fb   : > { %v6953_v57 = vadd.f32 %v6830_v34, %v2139_v1  ;;  %v6955_v13 = vadd.f32 %v2017_v29, %v1485_v42  ;;  %v1487_v26 = vadd.f32 %v1486_v55, %v6780_v8 }
 0x1fc   : > { %v1488_v28 = vpop.f32.mrf.mxu1  ;;  %v2041_v27 = vpop.f32.mrf.mxu0 }
 0x1fd   : > { %9414 = vst [vmem:[#allocation53_spill] sm:$0xff] %v6955_v13  ;;  %v2141_v48 = vadd.f32 %v2019_v36, %v1487_v26  ;;  %v1489_v30 = vadd.f32 %v1488_v28, %v6784_v53  ;;  %2500 = vrot.lane.b32.xlu0 %v6942_v40, %s5708_s26  ;;  %2374 = vrot.lane.b32.xlu1 %v6953_v57, %s5707_s23 }
 0x1fe   : > { %v1490_v32 = vpop.f32.mrf.mxu1  ;;  %v2043_v5 = vpop.f32.mrf.mxu0 }
 0x1ff   : > { %v6964_v50 = vadd.f32 %v6830_v34, %v2141_v48  ;;  %v6966_v29 = vadd.f32 %v2021_v39, %v1489_v30  ;;  %v1491_v8 = vadd.f32 %v1490_v32, %v6788_v3 }
 0x200   : > { %v1494_v37 = vpop.f32.mrf.mxu1  ;;  %v2047_v54 = vpop.f32.mrf.mxu0 }
 0x201   : > { %9415 = vst [vmem:[#allocation54_spill] sm:$0xff] %v6966_v29  ;;  %v2143_v36 = vadd.f32 %v2023_v21, %v1491_v8  ;;  %v1495_v53 = vadd.f32 %v1494_v37, %v6792_v14  ;;  %2502 = vrot.lane.b32.xlu1 %v6953_v57, %s5708_s26  ;;  %2376 = vrot.lane.b32.xlu0 %v6964_v50, %s5707_s23 }
 0x202   : > { %v1496_v15 = vpop.f32.mrf.mxu1  ;;  %v2049_v1 = vpop.f32.mrf.mxu0 }
 0x203   : > { %v6975_v42 = vadd.f32 %v6830_v34, %v2143_v36  ;;  %v6977_v39 = vadd.f32 %v2027_v20, %v1495_v53  ;;  %v1497_v3 = vadd.f32 %v1496_v15, %v6796_v11 }
 0x204   : > { %v1498_v55 = vpop.f32.mrf.mxu1  ;;  %v2051_v26 = vpop.f32.mrf.mxu0 }
 0x205   : > { %9416 = vst [vmem:[#allocation55_spill] sm:$0xff] %v6975_v42  ;;  %9417 = vst [vmem:[#allocation56_spill] sm:$0xff] %v6977_v39  ;;  %v2145_v21 = vadd.f32 %v2029_v19, %v1497_v3  ;;  %v1499_v14 = vadd.f32 %v1498_v55, %v6800_v33  ;;  %2504 = vrot.lane.b32.xlu0 %v6964_v50, %s5708_s26  ;;  %2378 = vrot.lane.b32.xlu1 %v6975_v42, %s5707_s23 }
 0x206   : > { %v1500_v28 = vpop.f32.mrf.mxu1  ;;  %v2053_v48 = vpop.f32.mrf.mxu0 }
 0x207   : > { %v6986_v30 = vadd.f32 %v6830_v34, %v2145_v21  ;;  %v6988_v20 = vadd.f32 %v2031_v2, %v1499_v14  ;;  %v1501_v11 = vadd.f32 %v1500_v28, %v6804_v12 }
 0x208   : > { %v1504_v32 = vpop.f32.mrf.mxu1  ;;  %v2057_v8 = vpop.f32.mrf.mxu0 }
 0x209   : > { %9418 = vst [vmem:[#allocation57_spill] sm:$0xff] %v6986_v30  ;;  %9419 = vst [vmem:[#allocation58_spill] sm:$0xff] %v6988_v20  ;;  %v2147_v19 = vadd.f32 %v2033_v24, %v1501_v11  ;;  %v1505_v33 = vadd.f32 %v1504_v32, %v6714_v6  ;;  %2506 = vrot.lane.b32.xlu1 %v6975_v42, %s5708_s26  ;;  %2380 = vrot.lane.b32.xlu0 %v6986_v30, %s5707_s23 }
 0x20a   : > { %v1506_v37 = vpop.f32.mrf.mxu1  ;;  %v2059_v36 = vpop.f32.mrf.mxu0 }
 0x20b   : > { %v6997_v53 = vadd.f32 %v6830_v34, %v2147_v19  ;;  %v6999_v2 = vadd.f32 %v2037_v38, %v1505_v33  ;;  %v1507_v12 = vadd.f32 %v1506_v37, %v6718_v60 }
 0x20c   : > { %v1508_v15 = vpop.f32.mrf.mxu1  ;;  %v2061_v3 = vpop.f32.mrf.mxu0 }
 0x20d   : > { %9420 = vst [vmem:[#allocation59_spill] sm:$0xff] %v6997_v53  ;;  %9421 = vst [vmem:[#allocation60_spill] sm:$0xff] %v6999_v2  ;;  %v2149_v24 = vadd.f32 %v2039_v9, %v1507_v12  ;;  %v1509_v6 = vadd.f32 %v1508_v15, %v6722_v0  ;;  %2508 = vrot.lane.b32.xlu0 %v6986_v30, %s5708_s26  ;;  %2382 = vrot.lane.b32.xlu1 %v6997_v53, %s5707_s23 }
 0x20e   : > { %v1510_v55 = vpop.f32.mrf.mxu1  ;;  %v2063_v21 = vpop.f32.mrf.mxu0 }
 0x20f   : > { %v7008_v14 = vadd.f32 %v6830_v34, %v2149_v24  ;;  %v7010_v38 = vadd.f32 %v2041_v27, %v1509_v6  ;;  %v1511_v60 = vadd.f32 %v1510_v55, %v6726_v58  ;;  %v9428_v55 = vld [vmem:[#allocation15_spill] sm:$0xff] }
 0x210   : > { %v1514_v28 = vpop.f32.mrf.mxu1  ;;  %v2067_v11 = vpop.f32.mrf.mxu0 }
 0x211   : > { %9422 = vst [vmem:[#allocation61_spill] sm:$0xff] %v7008_v14  ;;  %9423 = vst [vmem:[#allocation62_spill] sm:$0xff] %v7010_v38  ;;  %v2151_v9 = vadd.f32 %v2043_v5, %v1511_v60  ;;  %v1515_v0 = vadd.f32 %v1514_v28, %v6730_v49  ;;  %2384 = vrot.lane.b32.xlu0 %v7008_v14, %s5707_s23  ;;  %2510 = vrot.lane.b32.xlu1 %v6997_v53, %s5708_s26 }
 0x212   : > { %v1516_v32 = vpop.f32.mrf.mxu1  ;;  %v2069_v19 = vpop.f32.mrf.mxu0 }
 0x213   : > { %v7019_v33 = vadd.f32 %v6830_v34, %v2151_v9  ;;  %v7021_v27 = vadd.f32 %v2047_v54, %v1515_v0  ;;  %v1517_v58 = vadd.f32 %v1516_v32, %v6734_v41  ;;  %v9429_v9 = vld [vmem:[#allocation16_spill] sm:$0xff] }
 0x214   : > { %v1518_v37 = vpop.f32.mrf.mxu1  ;;  %v2071_v12 = vpop.f32.mrf.mxu0 }
 0x215   : > { %9424 = vst [vmem:[#allocation63_spill] sm:$0xff] %v7019_v33  ;;  %9425 = vst [vmem:[#allocation64_spill] sm:$0xff] %v7021_v27  ;;  %v2153_v5 = vadd.f32 %v2049_v1, %v1517_v58  ;;  %v1519_v49 = vadd.f32 %v1518_v37, %v6738_v4  ;;  %2512 = vrot.lane.b32.xlu0 %v7008_v14, %s5708_s26  ;;  %2386 = vrot.lane.b32.xlu1 %v7019_v33, %s5707_s23  ;;  %v9432_v37 = vld [vmem:[#allocation17_spill] sm:$0xff] }
 0x216   : > { %v1520_v15 = vpop.f32.mrf.mxu1  ;;  %v2073_v24 = vpop.f32.mrf.mxu0 }
 0x217   : > { %v7030_v6 = vadd.f32 %v6830_v34, %v2153_v5  ;;  %v7032_v54 = vadd.f32 %v2051_v26, %v1519_v49  ;;  %v1521_v41 = vadd.f32 %v1520_v15, %v9428_v55  ;;  %v9433_v55 = vld [vmem:[#allocation27_spill] sm:$0xff] }
 0x218   : > { %v1524_v60 = vpop.f32.mrf.mxu1  ;;  %v2077_v28 = vpop.f32.mrf.mxu0 }
 0x219   : > { %9426 = vst [vmem:[#allocation65_spill] sm:$0xff] %v7030_v6  ;;  %9427 = vst [vmem:[#allocation66_spill] sm:$0xff] %v7032_v54  ;;  %v2155_v1 = vadd.f32 %v2053_v48, %v1521_v41  ;;  %v1525_v4 = vadd.f32 %v1524_v60, %v9429_v9  ;;  %2388 = vrot.lane.b32.xlu0 %v7030_v6, %s5707_s23  ;;  %2514 = vrot.lane.b32.xlu1 %v7019_v33, %s5708_s26 }
 0x21a   : > { %v1526_v0 = vpop.f32.mrf.mxu1  ;;  %v2079_v32 = vpop.f32.mrf.mxu0 }
 0x21b   : > { %v7041_v58 = vadd.f32 %v6830_v34, %v2155_v1  ;;  %v7043_v26 = vadd.f32 %v2057_v8, %v1525_v4  ;;  %v1527_v5 = vadd.f32 %v1526_v0, %v9432_v37  ;;  %v9436_v4 = vld [vmem:[#allocation6_spill] sm:$0xff] }
 0x21c   : > { %v1528_v49 = vpop.f32.mrf.mxu1  ;;  %v2081_v15 = vpop.f32.mrf.mxu0 }
 0x21d   : > { %9430 = vst [vmem:[#allocation15_spill] sm:$0xff] %v7041_v58  ;;  %9431 = vst [vmem:[#allocation16_spill] sm:$0xff] %v7043_v26  ;;  %v2157_v48 = vadd.f32 %v2059_v36, %v1527_v5  ;;  %v1529_v41 = vadd.f32 %v1528_v49, %v9433_v55  ;;  %2516 = vrot.lane.b32.xlu0 %v7030_v6, %s5708_s26  ;;  %2390 = vrot.lane.b32.xlu1 %v7041_v58, %s5707_s23  ;;  %v9437_v5 = vld [vmem:[#allocation7_spill] sm:$0xff] }
 0x21e   : > { %v1530_v60 = vpop.f32.mrf.mxu1  ;;  %v2083_v9 = vpop.f32.mrf.mxu0 }
 0x21f   : > { %v7052_v1 = vadd.f32 %v6830_v34, %v2157_v48  ;;  %v7054_v8 = vadd.f32 %v2061_v3, %v1529_v41  ;;  %v1531_v0 = vadd.f32 %v1530_v60, %v9436_v4  ;;  %v9440_v41 = vld [vmem:[#allocation20_spill] sm:$0xff] }
 0x220   : > { %v1534_v37 = vpop.f32.mrf.mxu1  ;;  %v2087_v54 = vpop.f32.mrf.mxu0 }
 0x221   : > { %9434 = vst [vmem:[#allocation17_spill] sm:$0xff] %v7052_v1  ;;  %9435 = vst [vmem:[#allocation27_spill] sm:$0xff] %v7054_v8  ;;  %v2159_v36 = vadd.f32 %v2063_v21, %v1531_v0  ;;  %v1535_v49 = vadd.f32 %v1534_v37, %v9437_v5  ;;  %2392 = vrot.lane.b32.xlu0 %v7052_v1, %s5707_s23  ;;  %2518 = vrot.lane.b32.xlu1 %v7041_v58, %s5708_s26  ;;  %v9441_v21 = vld [vmem:[#allocation5_spill] sm:$0xff] }
 0x222   : > { %v1536_v55 = vpop.f32.mrf.mxu1  ;;  %v2089_v26 = vpop.f32.mrf.mxu0 }
 0x223   : > { %v7063_v48 = vadd.f32 %v6830_v34, %v2159_v36  ;;  %v7065_v3 = vadd.f32 %v2067_v11, %v1535_v49  ;;  %v1537_v60 = vadd.f32 %v1536_v55, %v9440_v41  ;;  %v9444_v11 = vld [vmem:[#allocation19_spill] sm:$0xff] }
 0x224   : > { %v1538_v4 = vpop.f32.mrf.mxu1  ;;  %v2091_v37 = vpop.f32.mrf.mxu0 }
 0x225   : > { %9438 = vst [vmem:[#allocation6_spill] sm:$0xff] %v7063_v48  ;;  %9439 = vst [vmem:[#allocation7_spill] sm:$0xff] %v7065_v3  ;;  %v2161_v8 = vadd.f32 %v2069_v19, %v1537_v60  ;;  %v1539_v0 = vadd.f32 %v1538_v4, %v9441_v21  ;;  %2520 = vrot.lane.b32.xlu0 %v7052_v1, %s5708_s26  ;;  %2394 = vrot.lane.b32.xlu1 %v7063_v48, %s5707_s23  ;;  %v9445_v19 = vld [vmem:[#allocation11_spill] sm:$0xff] }
 0x226   : > { %v1540_v5 = vpop.f32.mrf.mxu1  ;;  %v2093_v4 = vpop.f32.mrf.mxu0 }
 0x227   : > { %v7074_v38 = vadd.f32 %v6830_v34, %v2161_v8  ;;  %v7076_v36 = vadd.f32 %v2071_v12, %v1539_v0  ;;  %v1541_v49 = vadd.f32 %v1540_v5, %v9444_v11  ;;  %v9448_v12 = vld [vmem:[#allocation22_spill] sm:$0xff] }
 0x228   : > { %v1544_v55 = vpop.f32.mrf.mxu1 }
 0x229   : > { %9442 = vst [vmem:[#allocation20_spill] sm:$0xff] %v7074_v38  ;;  %9443 = vst [vmem:[#allocation5_spill] sm:$0xff] %v7076_v36  ;;  %v2163_v41 = vadd.f32 %v2073_v24, %v1541_v49  ;;  %v1545_v60 = vadd.f32 %v1544_v55, %v9445_v19  ;;  %2396 = vrot.lane.b32.xlu0 %v7074_v38, %s5707_s23  ;;  %2522 = vrot.lane.b32.xlu1 %v7063_v48, %s5708_s26  ;;  %v9449_v24 = vld [vmem:[#allocation18_spill] sm:$0xff]  ;;  %v2097_v55 = vpop.f32.mrf.mxu0 }
 0x22a   : > { %v1546_v21 = vpop.f32.mrf.mxu1 }
 0x22b   : > { %v7085_v3 = vadd.f32 %v6830_v34, %v2163_v41  ;;  %v7087_v8 = vadd.f32 %v2077_v28, %v1545_v60  ;;  %v1547_v0 = vadd.f32 %v1546_v21, %v9448_v12  ;;  %v9452_v28 = vld [vmem:[#allocation23_spill] sm:$0xff] }
 0x22c   : > { %v1548_v5 = vpop.f32.mrf.mxu1 }
 0x22d   : > { %9446 = vst [vmem:[#allocation19_spill] sm:$0xff] %v7085_v3  ;;  %9447 = vst [vmem:[#allocation11_spill] sm:$0xff] %v7087_v8  ;;  %v2165_v11 = vadd.f32 %v2079_v32, %v1547_v0  ;;  %v1549_v49 = vadd.f32 %v1548_v5, %v9449_v24  ;;  %2524 = vrot.lane.b32.xlu0 %v7074_v38, %s5708_s26  ;;  %2398 = vrot.lane.b32.xlu1 %v7085_v3, %s5707_s23  ;;  %v9453_v32 = vld [vmem:[#allocation21_spill] sm:$0xff]  ;;  %v2099_v5 = vpop.f32.mrf.mxu0 }
 0x22e   : > { %v1550_v19 = vpop.f32.mrf.mxu1 }
 0x22f   : > { %v7096_v36 = vadd.f32 %v6830_v34, %v2165_v11  ;;  %v7098_v41 = vadd.f32 %v2081_v15, %v1549_v49  ;;  %v1551_v60 = vadd.f32 %v1550_v19, %v9452_v28  ;;  %v9456_v15 = vld [vmem:[#allocation26_spill] sm:$0xff] }
 0x230   : > { %v1554_v21 = vpop.f32.mrf.mxu1 }
 0x231   : > { %9450 = vst [vmem:[#allocation22_spill] sm:$0xff] %v7096_v36  ;;  %9451 = vst [vmem:[#allocation18_spill] sm:$0xff] %v7098_v41  ;;  %v2167_v12 = vadd.f32 %v2083_v9, %v1551_v60  ;;  %v1555_v0 = vadd.f32 %v1554_v21, %v9453_v32  ;;  %2400 = vrot.lane.b32.xlu0 %v7096_v36, %s5707_s23  ;;  %2526 = vrot.lane.b32.xlu1 %v7085_v3, %s5708_s26  ;;  %v9457_v9 = vld [vmem:[#allocation24_spill] sm:$0xff]  ;;  %v2101_v21 = vpop.f32.mrf.mxu0 }
 0x232   : > { %v1556_v24 = vpop.f32.mrf.mxu1 }
 0x233   : > { %v7107_v8 = vadd.f32 %v6830_v34, %v2167_v12  ;;  %v7109_v11 = vadd.f32 %v2087_v54, %v1555_v0  ;;  %v1557_v49 = vadd.f32 %v1556_v24, %v9456_v15  ;;  %v9460_v54 = vld [vmem:[#allocation30_spill] sm:$0xff] }
 0x234   : > { %v1558_v19 = vpop.f32.mrf.mxu1 }
 0x235   : > { %9454 = vst [vmem:[#allocation23_spill] sm:$0xff] %v7107_v8  ;;  %9455 = vst [vmem:[#allocation21_spill] sm:$0xff] %v7109_v11  ;;  %v2169_v28 = vadd.f32 %v2089_v26, %v1557_v49  ;;  %v1559_v60 = vadd.f32 %v1558_v19, %v9457_v9  ;;  %2528 = vrot.lane.b32.xlu0 %v7096_v36, %s5708_s26  ;;  %2402 = vrot.lane.b32.xlu1 %v7107_v8, %s5707_s23  ;;  %v9461_v26 = vld [vmem:[#allocation25_spill] sm:$0xff]  ;;  %v2103_v19 = vpop.f32.mrf.mxu0 }
 0x236   : > { %v1560_v32 = vpop.f32.mrf.mxu1 }
 0x237   : > { %v7118_v41 = vadd.f32 %v6830_v34, %v2169_v28  ;;  %v7120_v12 = vadd.f32 %v2091_v37, %v1559_v60  ;;  %v1561_v0 = vadd.f32 %v1560_v32, %v9460_v54  ;;  %v9464_v37 = vld [vmem:[#allocation29_spill] sm:$0xff] }
 0x238   : > { %v1564_v24 = vpop.f32.mrf.mxu1 }
 0x239   : > { %9458 = vst [vmem:[#allocation26_spill] sm:$0xff] %v7118_v41  ;;  %9459 = vst [vmem:[#allocation24_spill] sm:$0xff] %v7120_v12  ;;  %v2171_v15 = vadd.f32 %v2093_v4, %v1561_v0  ;;  %v1565_v49 = vadd.f32 %v1564_v24, %v9461_v26  ;;  %2404 = vrot.lane.b32.xlu0 %v7118_v41, %s5707_s23  ;;  %2530 = vrot.lane.b32.xlu1 %v7107_v8, %s5708_s26  ;;  %v9465_v4 = vld [vmem:[#allocation8_spill] sm:$0xff]  ;;  %v2107_v24 = vpop.f32.mrf.mxu0 }
 0x23a   : > { %v1566_v9 = vpop.f32.mrf.mxu1 }
 0x23b   : > { %v7129_v11 = vadd.f32 %v6830_v34, %v2171_v15  ;;  %v7131_v28 = vadd.f32 %v2097_v55, %v1565_v49  ;;  %v1567_v60 = vadd.f32 %v1566_v9, %v9464_v37  ;;  %v9468_v55 = vld [vmem:[#allocation13_spill] sm:$0xff] }
 0x23c   : > { %v1568_v32 = vpop.f32.mrf.mxu1 }
 0x23d   : > { %9462 = vst [vmem:[#allocation30_spill] sm:$0xff] %v7129_v11  ;;  %9463 = vst [vmem:[#allocation25_spill] sm:$0xff] %v7131_v28  ;;  %v2173_v54 = vadd.f32 %v2099_v5, %v1567_v60  ;;  %v1569_v0 = vadd.f32 %v1568_v32, %v9465_v4  ;;  %2532 = vrot.lane.b32.xlu0 %v7118_v41, %s5708_s26  ;;  %2406 = vrot.lane.b32.xlu1 %v7129_v11, %s5707_s23  ;;  %v9469_v5 = vld [vmem:[#allocation32_spill] sm:$0xff]  ;;  %v2109_v32 = vpop.f32.mrf.mxu0 }
 0x23e   : > { %v1570_v26 = vpop.f32.mrf.mxu1 }
 0x23f   : > { %v7140_v12 = vadd.f32 %v6830_v34, %v2173_v54  ;;  %v7142_v15 = vadd.f32 %v2101_v21, %v1569_v0  ;;  %v1571_v49 = vadd.f32 %v1570_v26, %v9468_v55  ;;  %v9472_v26 = vld [vmem:[#allocation34_spill] sm:$0xff] }
 0x240   : > { %v1574_v9 = vpop.f32.mrf.mxu1 }
 0x241   : > { %9466 = vst [vmem:[#allocation29_spill] sm:$0xff] %v7140_v12  ;;  %9467 = vst [vmem:[#allocation8_spill] sm:$0xff] %v7142_v15  ;;  %v2175_v37 = vadd.f32 %v2103_v19, %v1571_v49  ;;  %v1575_v60 = vadd.f32 %v1574_v9, %v9469_v5  ;;  %2408 = vrot.lane.b32.xlu0 %v7140_v12, %s5707_s23  ;;  %2534 = vrot.lane.b32.xlu1 %v7129_v11, %s5708_s26  ;;  %v2111_v19 = vpop.f32.mrf.mxu0  ;;  %v9474_v15 = vld [vmem:[#allocation31_spill] sm:$0xff] }
 0x242   : > { %v1576_v4 = vpop.f32.mrf.mxu1 }
 0x243   : > { %v7151_v28 = vadd.f32 %v6830_v34, %v2175_v37  ;;  %v7153_v54 = vadd.f32 %v2107_v24, %v1575_v60  ;;  %v2353_v21 = vpop.permute.xlu0 %2352  ;;  %v1577_v24 = vadd.f32 %v1576_v4, %v9474_v15  ;;  %v2113_v15 = vpop.f32.mrf.mxu0 }
 0x244   : > { %v1578_v0 = vpop.f32.mrf.mxu1  ;;  %v2448_v49 = vmax.f32 %v6834_v43, %v2353_v21 }
 0x245   : > { %9470 = vst [vmem:[#allocation13_spill] sm:$0xff] %v7151_v28  ;;  %9471 = vst [vmem:[#allocation32_spill] sm:$0xff] %v7153_v54  ;;  %v1579_v55 = vadd.f32 %v1578_v0, %v9472_v26  ;;  %2536 = vrot.lane.b32.xlu0 %v7140_v12, %s5708_s26  ;;  %2410 = vrot.lane.b32.xlu1 %v7151_v28, %s5707_s23 }
 0x246   : > { %v1580_v54 = vpop.f32.mrf.mxu1 }
 0x247   : > { %v7161_v9 = vadd.f32 %v2111_v19, %v1579_v55  ;;  %v2481_v5 = vpop.permute.xlu0 %2480  ;;  %v2355_v37 = vpop.permute.xlu1 %2354  ;;  %v2177_v55 = vadd.f32 %v2109_v32, %v1577_v24  ;;  %v9475_v19 = vld [vmem:[#allocation33_spill] sm:$0xff] }
 0x248   : > { %v7164_v60 = vmax.f32 %v2448_v49, %v2481_v5  ;;  %v2449_v0 = vmax.f32 %v6843_v18, %v2355_v37 }
 0x249   : > { %9473 = vst [vmem:[#allocation34_spill] sm:$0xff] %v7161_v9  ;;  %2538 = vrot.lane.b32.xlu1 %v7151_v28, %s5708_s26  ;;  %v1581_v9 = vadd.f32 %v1580_v54, %v9475_v19  ;;  %v7179_v5 = vadd.f32 %v6830_v34, %v2177_v55 }
 0x24a   : > { %2736 = vrot.lane.b32.xlu0 %v7164_v60, %s5709_s27 }
 0x24b   : > { %v2483_v26 = vpop.permute.xlu1 %2482  ;;  %v2357_v21 = vpop.permute.xlu0 %2356  ;;  %9476 = vst [vmem:[#allocation31_spill] sm:$0xff] %v7179_v5  ;;  %v2179_v37 = vadd.f32 %v2113_v15, %v1581_v9 }
 0x24c   : > { %v7172_v27 = vmax.f32 %v2449_v0, %v2483_v26  ;;  %v2450_v0 = vmax.f32 %v6854_v56, %v2357_v21 }
 0x24d   : > { %v7186_v24 = vadd.f32 %v6830_v34, %v2179_v37 }
 0x24e   : > { %2928 = vrot.lane.b32.xlu0 %v7164_v60, %s5710_s29  ;;  %2738 = vrot.lane.b32.xlu1 %v7172_v27, %s5709_s27 }
 0x24f   : > { %v2485_v4 = vpop.permute.xlu0 %2484  ;;  %v2359_v49 = vpop.permute.xlu1 %2358  ;;  %9477 = vst [vmem:[#allocation33_spill] sm:$0xff] %v7186_v24 }
 0x250   : > { %v7193_v55 = vmax.f32 %v2450_v0, %v2485_v4  ;;  %v2451_v19 = vmax.f32 %v6865_v59, %v2359_v49 }
 0x252   : > { %2412 = vrot.lane.b32.xlu0 %v7179_v5, %s5707_s23  ;;  %2930 = vrot.lane.b32.xlu1 %v7172_v27, %s5710_s29 }
 0x253   : > { %v2487_v32 = vpop.permute.xlu1 %2486  ;;  %v2361_v54 = vpop.permute.xlu0 %2360 }
 0x254   : > { %v7200_v15 = vmax.f32 %v2451_v19, %v2487_v32  ;;  %v2452_v37 = vmax.f32 %v6876_v61, %v2361_v54 }
 0x256   : > { %2540 = vrot.lane.b32.xlu0 %v7179_v5, %s5708_s26  ;;  %2414 = vrot.lane.b32.xlu1 %v7186_v24, %s5707_s23 }
 0x257   : > { %v2489_v9 = vpop.permute.xlu0 %2488  ;;  %v2363_v26 = vpop.permute.xlu1 %2362 }
 0x258   : > { %v7207_v0 = vmax.f32 %v2452_v37, %v2489_v9  ;;  %v2453_v20 = vmax.f32 %v6887_v62, %v2363_v26 }
 0x25a   : > { %2740 = vrot.lane.b32.xlu0 %v7193_v55, %s5709_s27  ;;  %2542 = vrot.lane.b32.xlu1 %v7186_v24, %s5708_s26 }
 0x25b   : > { %v2491_v34 = vpop.permute.xlu1 %2490  ;;  %v2365_v21 = vpop.permute.xlu0 %2364 }
 0x25c   : > { %v7214_v19 = vmax.f32 %v2453_v20, %v2491_v34  ;;  %v2454_v2 = vmax.f32 %v6898_v22, %v2365_v21 }
 0x25e   : > { %2932 = vrot.lane.b32.xlu0 %v7193_v55, %s5710_s29  ;;  %2742 = vrot.lane.b32.xlu1 %v7200_v15, %s5709_s27 }
 0x25f   : > { %v2493_v4 = vpop.permute.xlu0 %2492  ;;  %v2367_v49 = vpop.permute.xlu1 %2366 }
 0x260   : > { %v7221_v37 = vmax.f32 %v2454_v2, %v2493_v4  ;;  %v2455_v29 = vmax.f32 %v6909_v44, %v2367_v49 }
 0x262   : > { %2744 = vrot.lane.b32.xlu0 %v7207_v0, %s5709_s27  ;;  %2934 = vrot.lane.b32.xlu1 %v7200_v15, %s5710_s29 }
 0x263   : > { %v2495_v32 = vpop.permute.xlu1 %2494  ;;  %v2369_v54 = vpop.permute.xlu0 %2368 }
 0x264   : > { %v7228_v21 = vmax.f32 %v2455_v29, %v2495_v32  ;;  %v2456_v39 = vmax.f32 %v6920_v10, %v2369_v54 }
 0x266   : > { %2936 = vrot.lane.b32.xlu0 %v7207_v0, %s5710_s29  ;;  %2746 = vrot.lane.b32.xlu1 %v7214_v19, %s5709_s27 }
 0x267   : > { %v2497_v9 = vpop.permute.xlu0 %2496  ;;  %v2371_v26 = vpop.permute.xlu1 %2370 }
 0x268   : > { %v7235_v49 = vmax.f32 %v2456_v39, %v2497_v9  ;;  %v2457_v47 = vmax.f32 %v6931_v52, %v2371_v26 }
 0x26a   : > { %2748 = vrot.lane.b32.xlu0 %v7221_v37, %s5709_s27  ;;  %2938 = vrot.lane.b32.xlu1 %v7214_v19, %s5710_s29 }
 0x26b   : > { %v2499_v20 = vpop.permute.xlu1 %2498  ;;  %v2373_v34 = vpop.permute.xlu0 %2372 }
 0x26c   : > { %v7242_v54 = vmax.f32 %v2457_v47, %v2499_v20  ;;  %v2458_v13 = vmax.f32 %v6942_v40, %v2373_v34 }
 0x26e   : > { %2940 = vrot.lane.b32.xlu0 %v7221_v37, %s5710_s29  ;;  %2750 = vrot.lane.b32.xlu1 %v7228_v21, %s5709_s27 }
 0x26f   : > { %v2501_v2 = vpop.permute.xlu0 %2500  ;;  %v2375_v4 = vpop.permute.xlu1 %2374 }
 0x270   : > { %v7249_v26 = vmax.f32 %v2458_v13, %v2501_v2  ;;  %v2459_v46 = vmax.f32 %v6953_v57, %v2375_v4 }
 0x272   : > { %2752 = vrot.lane.b32.xlu0 %v7235_v49, %s5709_s27  ;;  %2942 = vrot.lane.b32.xlu1 %v7228_v21, %s5710_s29 }
 0x273   : > { %v2503_v29 = vpop.permute.xlu1 %2502  ;;  %v2377_v32 = vpop.permute.xlu0 %2376 }
 0x274   : > { %v7256_v34 = vmax.f32 %v2459_v46, %v2503_v29  ;;  %v2460_v17 = vmax.f32 %v6964_v50, %v2377_v32 }
 0x276   : > { %2944 = vrot.lane.b32.xlu0 %v7235_v49, %s5710_s29  ;;  %2754 = vrot.lane.b32.xlu1 %v7242_v54, %s5709_s27 }
 0x277   : > { %v2505_v39 = vpop.permute.xlu0 %2504  ;;  %v2379_v9 = vpop.permute.xlu1 %2378 }
 0x278   : > { %v7263_v4 = vmax.f32 %v2460_v17, %v2505_v39  ;;  %v2461_v45 = vmax.f32 %v6975_v42, %v2379_v9 }
 0x27a   : > { %2756 = vrot.lane.b32.xlu0 %v7249_v26, %s5709_s27  ;;  %2946 = vrot.lane.b32.xlu1 %v7242_v54, %s5710_s29 }
 0x27b   : > { %v2507_v47 = vpop.permute.xlu1 %2506  ;;  %v2381_v20 = vpop.permute.xlu0 %2380 }
 0x27c   : > { %v7270_v32 = vmax.f32 %v2461_v45, %v2507_v47  ;;  %v2462_v16 = vmax.f32 %v6986_v30, %v2381_v20 }
 0x27e   : > { %2948 = vrot.lane.b32.xlu0 %v7249_v26, %s5710_s29  ;;  %2758 = vrot.lane.b32.xlu1 %v7256_v34, %s5709_s27 }
 0x27f   : > { %v2509_v13 = vpop.permute.xlu0 %2508  ;;  %v2383_v2 = vpop.permute.xlu1 %2382 }
 0x280   : > { %v7277_v9 = vmax.f32 %v2462_v16, %v2509_v13  ;;  %v2463_v63 = vmax.f32 %v6997_v53, %v2383_v2 }
 0x282   : > { %2760 = vrot.lane.b32.xlu0 %v7263_v4, %s5709_s27  ;;  %2950 = vrot.lane.b32.xlu1 %v7256_v34, %s5710_s29 }
 0x283   : > { %v2385_v46 = vpop.permute.xlu0 %2384  ;;  %v2511_v29 = vpop.permute.xlu1 %2510 }
 0x284   : > { %v7284_v20 = vmax.f32 %v2463_v63, %v2511_v29  ;;  %v2464_v25 = vmax.f32 %v7008_v14, %v2385_v46 }
 0x286   : > { %2952 = vrot.lane.b32.xlu0 %v7263_v4, %s5710_s29  ;;  %2762 = vrot.lane.b32.xlu1 %v7270_v32, %s5709_s27 }
 0x287   : > { %v2513_v17 = vpop.permute.xlu0 %2512  ;;  %v2387_v39 = vpop.permute.xlu1 %2386 }
 0x288   : > { %v7291_v2 = vmax.f32 %v2464_v25, %v2513_v17  ;;  %v2465_v23 = vmax.f32 %v7019_v33, %v2387_v39 }
 0x28a   : > { %2764 = vrot.lane.b32.xlu0 %v7277_v9, %s5709_s27  ;;  %2954 = vrot.lane.b32.xlu1 %v7270_v32, %s5710_s29  ;;  %9478 = vst [vmem:[#allocation67_spill] sm:$0xff] %v7291_v2 }
 0x28b   : > { %v2389_v45 = vpop.permute.xlu0 %2388  ;;  %v2515_v47 = vpop.permute.xlu1 %2514 }
 0x28c   : > { %v7298_v29 = vmax.f32 %v2465_v23, %v2515_v47  ;;  %v2466_v7 = vmax.f32 %v7030_v6, %v2389_v45 }
 0x28e   : > { %2956 = vrot.lane.b32.xlu0 %v7277_v9, %s5710_s29  ;;  %2766 = vrot.lane.b32.xlu1 %v7284_v20, %s5709_s27  ;;  %9479 = vst [vmem:[#allocation68_spill] sm:$0xff] %v7298_v29 }
 0x28f   : > { %v2517_v16 = vpop.permute.xlu0 %2516  ;;  %v2391_v13 = vpop.permute.xlu1 %2390 }
 0x290   : > { %v7305_v39 = vmax.f32 %v2466_v7, %v2517_v16  ;;  %v2467_v31 = vmax.f32 %v7041_v58, %v2391_v13 }
 0x292   : > { %2768 = vrot.lane.b32.xlu0 %v7291_v2, %s5709_s27  ;;  %2958 = vrot.lane.b32.xlu1 %v7284_v20, %s5710_s29  ;;  %9480 = vst [vmem:[#allocation69_spill] sm:$0xff] %v7305_v39 }
 0x293   : > { %v2393_v63 = vpop.permute.xlu0 %2392  ;;  %v2519_v46 = vpop.permute.xlu1 %2518 }
 0x294   : > { %v7312_v47 = vmax.f32 %v2467_v31, %v2519_v46  ;;  %v2468_v35 = vmax.f32 %v7052_v1, %v2393_v63 }
 0x296   : > { %2960 = vrot.lane.b32.xlu0 %v7291_v2, %s5710_s29  ;;  %2770 = vrot.lane.b32.xlu1 %v7298_v29, %s5709_s27  ;;  %9481 = vst [vmem:[#allocation70_spill] sm:$0xff] %v7312_v47 }
 0x297   : > { %v2521_v25 = vpop.permute.xlu0 %2520  ;;  %v2395_v17 = vpop.permute.xlu1 %2394 }
 0x298   : > { %v7319_v13 = vmax.f32 %v2468_v35, %v2521_v25  ;;  %v2469_v51 = vmax.f32 %v7063_v48, %v2395_v17 }
 0x29a   : > { %2772 = vrot.lane.b32.xlu0 %v7305_v39, %s5709_s27  ;;  %2962 = vrot.lane.b32.xlu1 %v7298_v29, %s5710_s29  ;;  %9482 = vst [vmem:[#allocation71_spill] sm:$0xff] %v7319_v13 }
 0x29b   : > { %v2397_v23 = vpop.permute.xlu0 %2396  ;;  %v2523_v45 = vpop.permute.xlu1 %2522 }
 0x29c   : > { %v7326_v46 = vmax.f32 %v2469_v51, %v2523_v45 }
 0x29e   : > { %2964 = vrot.lane.b32.xlu0 %v7305_v39, %s5710_s29  ;;  %2774 = vrot.lane.b32.xlu1 %v7312_v47, %s5709_s27  ;;  %9483 = vst [vmem:[#allocation72_spill] sm:$0xff] %v7326_v46  ;;  %v2470_v39 = vmax.f32 %v7074_v38, %v2397_v23 }
 0x29f   : > { %v2525_v7 = vpop.permute.xlu0 %2524  ;;  %v2399_v16 = vpop.permute.xlu1 %2398 }
 0x2a0   : > { %v7333_v17 = vmax.f32 %v2470_v39, %v2525_v7  ;;  %v2471_v29 = vmax.f32 %v7085_v3, %v2399_v16 }
 0x2a2   : > { %2776 = vrot.lane.b32.xlu0 %v7319_v13, %s5709_s27  ;;  %2966 = vrot.lane.b32.xlu1 %v7312_v47, %s5710_s29  ;;  %9484 = vst [vmem:[#allocation73_spill] sm:$0xff] %v7333_v17 }
 0x2a3   : > { %v2401_v31 = vpop.permute.xlu0 %2400  ;;  %v2527_v63 = vpop.permute.xlu1 %2526 }
 0x2a4   : > { %v7340_v45 = vmax.f32 %v2471_v29, %v2527_v63 }
 0x2a6   : > { %2968 = vrot.lane.b32.xlu0 %v7319_v13, %s5710_s29  ;;  %2778 = vrot.lane.b32.xlu1 %v7326_v46, %s5709_s27  ;;  %9485 = vst [vmem:[#allocation74_spill] sm:$0xff] %v7340_v45  ;;  %v2472_v13 = vmax.f32 %v7096_v36, %v2401_v31 }
 0x2a7   : > { %v2529_v35 = vpop.permute.xlu0 %2528  ;;  %v2403_v25 = vpop.permute.xlu1 %2402 }
 0x2a8   : > { %v7347_v16 = vmax.f32 %v2472_v13, %v2529_v35  ;;  %v2473_v47 = vmax.f32 %v7107_v8, %v2403_v25 }
 0x2aa   : > { %2780 = vrot.lane.b32.xlu0 %v7333_v17, %s5709_s27  ;;  %2970 = vrot.lane.b32.xlu1 %v7326_v46, %s5710_s29  ;;  %9486 = vst [vmem:[#allocation75_spill] sm:$0xff] %v7347_v16 }
 0x2ab   : > { %v2405_v51 = vpop.permute.xlu0 %2404  ;;  %v2531_v23 = vpop.permute.xlu1 %2530 }
 0x2ac   : > { %v7354_v63 = vmax.f32 %v2473_v47, %v2531_v23 }
 0x2ae   : > { %2972 = vrot.lane.b32.xlu0 %v7333_v17, %s5710_s29  ;;  %2782 = vrot.lane.b32.xlu1 %v7340_v45, %s5709_s27  ;;  %9487 = vst [vmem:[#allocation76_spill] sm:$0xff] %v7354_v63  ;;  %v2474_v17 = vmax.f32 %v7118_v41, %v2405_v51 }
 0x2af   : > { %v2533_v39 = vpop.permute.xlu0 %2532  ;;  %v2407_v7 = vpop.permute.xlu1 %2406 }
 0x2b0   : > { %v7361_v25 = vmax.f32 %v2474_v17, %v2533_v39  ;;  %v2475_v46 = vmax.f32 %v7129_v11, %v2407_v7 }
 0x2b2   : > { %2784 = vrot.lane.b32.xlu0 %v7347_v16, %s5709_s27  ;;  %2974 = vrot.lane.b32.xlu1 %v7340_v45, %s5710_s29  ;;  %9488 = vst [vmem:[#allocation77_spill] sm:$0xff] %v7361_v25 }
 0x2b3   : > { %v2409_v29 = vpop.permute.xlu0 %2408  ;;  %v2535_v31 = vpop.permute.xlu1 %2534 }
 0x2b4   : > { %v7368_v51 = vmax.f32 %v2475_v46, %v2535_v31  ;;  %v2476_v45 = vmax.f32 %v7140_v12, %v2409_v29 }
 0x2b6   : > { %2976 = vrot.lane.b32.xlu0 %v7347_v16, %s5710_s29  ;;  %2786 = vrot.lane.b32.xlu1 %v7354_v63, %s5709_s27 }
 0x2b7   : > { %v2537_v13 = vpop.permute.xlu0 %2536  ;;  %v2411_v35 = vpop.permute.xlu1 %2410 }
 0x2b8   : > { %v7376_v17 = vmax.f32 %v2476_v45, %v2537_v13  ;;  %v2477_v31 = vmax.f32 %v7151_v28, %v2411_v35 }
 0x2ba   : > { %2788 = vrot.lane.b32.xlu0 %v7361_v25, %s5709_s27  ;;  %2978 = vrot.lane.b32.xlu1 %v7354_v63, %s5710_s29 }
 0x2bb   : > { %v2539_v47 = vpop.permute.xlu1 %2538 }
 0x2bc   : > { %v2737_v23 = vpop.permute.xlu0 %2736  ;;  %v7385_v29 = vmax.f32 %v2477_v31, %v2539_v47 }
 0x2bd   : > { %v2832_v16 = vsub.f32 %v6834_v43, %v2737_v23 }
 0x2be   : > { %2980 = vrot.lane.b32.xlu0 %v7361_v25, %s5710_s29  ;;  %2790 = vrot.lane.b32.xlu1 %v7368_v51, %s5709_s27  ;;  %9489 = vst [vmem:[#allocation78_spill] sm:$0xff] %v7385_v29 }
 0x2bf   : > { %v2864_v2 = vmul.f32 1.442695, %v2832_v16 }
 0x2c0   : > { %v2929_v39 = vpop.permute.xlu0 %2928  ;;  %v2739_v7 = vpop.permute.xlu1 %2738 }
 0x2c1   : > { %v3024_v63 = vsub.f32 %v6834_v43, %v2929_v39  ;;  %v2833_v46 = vsub.f32 %v6843_v18, %v2739_v7  ;;  %5324 = vpow2.f32 %v2864_v2 }
 0x2c2   : > { %2792 = vrot.lane.b32.xlu0 %v7376_v17, %s5709_s27  ;;  %2982 = vrot.lane.b32.xlu1 %v7368_v51, %s5710_s29 }
 0x2c3   : > { %v3056_v23 = vmul.f32 1.442695, %v3024_v63  ;;  %v2866_v25 = vmul.f32 1.442695, %v2833_v46 }
 0x2c4   : > { %v2413_v45 = vpop.permute.xlu0 %2412  ;;  %v2931_v13 = vpop.permute.xlu1 %2930 }
 0x2c5   : > { %v3025_v16 = vsub.f32 %v6843_v18, %v2931_v13  ;;  %v2478_v35 = vmax.f32 %v7179_v5, %v2413_v45  ;;  %5326 = vpow2.f32 %v3056_v23 }
 0x2c6   : > { %2984 = vrot.lane.b32.xlu0 %v7376_v17, %s5710_s29  ;;  %2794 = vrot.lane.b32.xlu1 %v7385_v29, %s5709_s27  ;;  %5328 = vpow2.f32 %v2866_v25 }
 0x2c7   : > { %v3058_v47 = vmul.f32 1.442695, %v3025_v16 }
 0x2c8   : > { %v2541_v39 = vpop.permute.xlu0 %2540  ;;  %v2415_v7 = vpop.permute.xlu1 %2414 }
 0x2c9   : > { %v7393_v63 = vmax.f32 %v2478_v35, %v2541_v39  ;;  %v2479_v2 = vmax.f32 %v7186_v24, %v2415_v7  ;;  %5330 = vpow2.f32 %v3058_v47 }
 0x2ca   : > { %2986 = vrot.lane.b32.xlu1 %v7385_v29, %s5710_s29 }
 0x2cb   : > { %9490 = vst [vmem:[#allocation79_spill] sm:$0xff] %v7393_v63  ;;  %2796 = vrot.lane.b32.xlu0 %v7393_v63, %s5709_s27 }
 0x2cc   : > { %v2741_v46 = vpop.permute.xlu0 %2740  ;;  %v2543_v31 = vpop.permute.xlu1 %2542 }
 0x2cd   : > { %v2834_v45 = vsub.f32 %v6854_v56, %v2741_v46  ;;  %v7401_v23 = vmax.f32 %v2479_v2, %v2543_v31 }
 0x2ce   : > { %v7409_v7 = vpop.eup %5324 }
 0x2cf   : > { %9491 = vst [vmem:[#allocation80_spill] sm:$0xff] %v7401_v23  ;;  %v2868_v13 = vmul.f32 1.442695, %v2834_v45  ;;  %2988 = vrot.lane.b32.xlu0 %v7393_v63, %s5710_s29  ;;  %2798 = vrot.lane.b32.xlu1 %v7401_v23, %s5709_s27  ;;  %9492 = vst [vmem:[#allocation81_spill] sm:$0xff] %v7409_v7 }
 0x2d0   : > { %v2933_v25 = vpop.permute.xlu0 %2932  ;;  %v2743_v16 = vpop.permute.xlu1 %2742 }
 0x2d1   : > { %5332 = vpow2.f32 %v2868_v13  ;;  %v3026_v35 = vsub.f32 %v6854_v56, %v2933_v25  ;;  %v2835_v39 = vsub.f32 %v6865_v59, %v2743_v16 }
 0x2d2   : > { %v7415_v45 = vpop.eup %5326 }
 0x2d3   : > { %v3060_v47 = vmul.f32 1.442695, %v3026_v35  ;;  %v2870_v46 = vmul.f32 1.442695, %v2835_v39  ;;  %3152 = vrot.lane.b32.xlu0 %v7409_v7, %s5707_s23  ;;  %2990 = vrot.lane.b32.xlu1 %v7401_v23, %s5710_s29  ;;  %9493 = vst [vmem:[#allocation82_spill] sm:$0xff] %v7415_v45  ;;  %v7419_v16 = vpop.eup %5328 }
 0x2d4   : > { %v2745_v2 = vpop.permute.xlu0 %2744  ;;  %v2935_v31 = vpop.permute.xlu1 %2934  ;;  %9494 = vst [vmem:[#allocation83_spill] sm:$0xff] %v7419_v16 }
 0x2d5   : > { %5334 = vpow2.f32 %v3060_v47  ;;  %v2836_v13 = vsub.f32 %v6876_v61, %v2745_v2  ;;  %v3027_v25 = vsub.f32 %v6865_v59, %v2935_v31 }
 0x2d6   : > { %5336 = vpow2.f32 %v2870_v46  ;;  %v7427_v63 = vpop.eup %5330 }
 0x2d7   : > { %v2872_v35 = vmul.f32 1.442695, %v2836_v13  ;;  %v3062_v39 = vmul.f32 1.442695, %v3027_v25  ;;  %3312 = vrot.lane.b32.xlu0 %v7415_v45, %s5708_s26  ;;  %3154 = vrot.lane.b32.xlu1 %v7419_v16, %s5707_s23  ;;  %9495 = vst [vmem:[#allocation84_spill] sm:$0xff] %v7427_v63 }
 0x2d8   : > { %v2937_v7 = vpop.permute.xlu0 %2936  ;;  %v2747_v23 = vpop.permute.xlu1 %2746 }
 0x2d9   : > { %5338 = vpow2.f32 %v2872_v35  ;;  %v3028_v47 = vsub.f32 %v6876_v61, %v2937_v7  ;;  %v2837_v2 = vsub.f32 %v6887_v62, %v2747_v23  ;;  %v9163_v7 = vmov 64  }
 0x2da   : > { %5340 = vpow2.f32 %v3062_v39  ;;  %5148 = vset.pattern.permute.xlu0 %v9163_v7  ;;  %5149 = vset.pattern.permute.xlu1 %v9163_v7 }
 0x2db   : > { %v3064_v31 = vmul.f32 1.442695, %v3028_v47  ;;  %v2874_v46 = vmul.f32 1.442695, %v2837_v2  ;;  %3314 = vrot.lane.b32.xlu1 %v7427_v63, %s5708_s26 }
 0x2dc   : > { %v2749_v13 = vpop.permute.xlu0 %2748  ;;  %v2939_v25 = vpop.permute.xlu1 %2938 }
 0x2dd   : > { %5342 = vpow2.f32 %v3064_v31  ;;  %v2838_v16 = vsub.f32 %v6898_v22, %v2749_v13  ;;  %v3029_v45 = vsub.f32 %v6887_v62, %v2939_v25 }
 0x2de   : > { %v7433_v35 = vpop.eup %5332  ;;  %5344 = vpow2.f32 %v2874_v46 }
 0x2df   : > { %v2876_v23 = vmul.f32 1.442695, %v2838_v16  ;;  %v3066_v39 = vmul.f32 1.442695, %v3029_v45  ;;  %3156 = vrot.lane.b32.xlu0 %v7433_v35, %s5707_s23 }
 0x2e0   : > { %v2941_v47 = vpop.permute.xlu0 %2940  ;;  %v2751_v2 = vpop.permute.xlu1 %2750 }
 0x2e1   : > { %5346 = vpow2.f32 %v2876_v23  ;;  %v3030_v31 = vsub.f32 %v6898_v22, %v2941_v47  ;;  %v2839_v13 = vsub.f32 %v6909_v44, %v2751_v2 }
 0x2e2   : > { %v7441_v25 = vpop.eup %5334  ;;  %5348 = vpow2.f32 %v3066_v39 }
 0x2e3   : > { %9496 = vst [vmem:[#allocation85_spill] sm:$0xff] %v7441_v25  ;;  %v7443_v46 = vpop.eup %5336  ;;  %v3068_v63 = vmul.f32 1.442695, %v3030_v31  ;;  %v2878_v29 = vmul.f32 1.442695, %v2839_v13  ;;  %3316 = vrot.lane.b32.xlu0 %v7441_v25, %s5708_s26 }
 0x2e4   : > { %9497 = vst [vmem:[#allocation86_spill] sm:$0xff] %v7443_v46  ;;  %3158 = vrot.lane.b32.xlu1 %v7443_v46, %s5707_s23  ;;  %v2753_v45 = vpop.permute.xlu0 %2752  ;;  %v2943_v16 = vpop.permute.xlu1 %2942 }
 0x2e5   : > { %5350 = vpow2.f32 %v3068_v63  ;;  %v2840_v23 = vsub.f32 %v6920_v10, %v2753_v45  ;;  %v3031_v47 = vsub.f32 %v6909_v44, %v2943_v16 }
 0x2e6   : > { %v7451_v2 = vpop.eup %5338  ;;  %5352 = vpow2.f32 %v2878_v29 }
 0x2e7   : > { %9498 = vst [vmem:[#allocation87_spill] sm:$0xff] %v7451_v2  ;;  %v7453_v39 = vpop.eup %5340  ;;  %v2880_v31 = vmul.f32 1.442695, %v2840_v23  ;;  %v3070_v13 = vmul.f32 1.442695, %v3031_v47  ;;  %3160 = vrot.lane.b32.xlu0 %v7451_v2, %s5707_s23 }
 0x2e8   : > { %3318 = vrot.lane.b32.xlu1 %v7453_v39, %s5708_s26  ;;  %v2945_v7 = vpop.permute.xlu0 %2944  ;;  %v2755_v46 = vpop.permute.xlu1 %2754 }
 0x2e9   : > { %5354 = vpow2.f32 %v2880_v31  ;;  %v3032_v63 = vsub.f32 %v6920_v10, %v2945_v7  ;;  %v2841_v45 = vsub.f32 %v6931_v52, %v2755_v46 }
 0x2ea   : > { %v7461_v16 = vpop.eup %5342  ;;  %5356 = vpow2.f32 %v3070_v13 }
 0x2eb   : > { %9499 = vst [vmem:[#allocation88_spill] sm:$0xff] %v7461_v16  ;;  %v7463_v29 = vpop.eup %5344  ;;  %v3072_v23 = vmul.f32 1.442695, %v3032_v63  ;;  %v2882_v47 = vmul.f32 1.442695, %v2841_v45  ;;  %3320 = vrot.lane.b32.xlu0 %v7461_v16, %s5708_s26 }
 0x2ec   : > { %9500 = vst [vmem:[#allocation89_spill] sm:$0xff] %v7463_v29  ;;  %3162 = vrot.lane.b32.xlu1 %v7463_v29, %s5707_s23  ;;  %v2757_v25 = vpop.permute.xlu0 %2756  ;;  %v2947_v2 = vpop.permute.xlu1 %2946 }
 0x2ed   : > { %5358 = vpow2.f32 %v3072_v23  ;;  %v2842_v7 = vsub.f32 %v6942_v40, %v2757_v25  ;;  %v3033_v46 = vsub.f32 %v6931_v52, %v2947_v2 }
 0x2ee   : > { %v7471_v31 = vpop.eup %5346  ;;  %5360 = vpow2.f32 %v2882_v47 }
 0x2ef   : > { %9501 = vst [vmem:[#allocation90_spill] sm:$0xff] %v7471_v31  ;;  %v7473_v13 = vpop.eup %5348  ;;  %v2884_v63 = vmul.f32 1.442695, %v2842_v7  ;;  %v3074_v45 = vmul.f32 1.442695, %v3033_v46  ;;  %3164 = vrot.lane.b32.xlu0 %v7471_v31, %s5707_s23 }
 0x2f0   : > { %9502 = vst [vmem:[#allocation91_spill] sm:$0xff] %v7473_v13  ;;  %3322 = vrot.lane.b32.xlu1 %v7473_v13, %s5708_s26  ;;  %v2949_v29 = vpop.permute.xlu0 %2948  ;;  %v2759_v16 = vpop.permute.xlu1 %2758 }
 0x2f1   : > { %5362 = vpow2.f32 %v2884_v63  ;;  %v3034_v25 = vsub.f32 %v6942_v40, %v2949_v29  ;;  %v2843_v2 = vsub.f32 %v6953_v57, %v2759_v16 }
 0x2f2   : > { %v7481_v23 = vpop.eup %5350  ;;  %5364 = vpow2.f32 %v3074_v45 }
 0x2f3   : > { %9503 = vst [vmem:[#allocation92_spill] sm:$0xff] %v7481_v23  ;;  %v7483_v47 = vpop.eup %5352  ;;  %v3076_v7 = vmul.f32 1.442695, %v3034_v25  ;;  %v2886_v46 = vmul.f32 1.442695, %v2843_v2  ;;  %3324 = vrot.lane.b32.xlu0 %v7481_v23, %s5708_s26 }
 0x2f4   : > { %9504 = vst [vmem:[#allocation93_spill] sm:$0xff] %v7483_v47  ;;  %3166 = vrot.lane.b32.xlu1 %v7483_v47, %s5707_s23  ;;  %v2761_v31 = vpop.permute.xlu0 %2760  ;;  %v2951_v13 = vpop.permute.xlu1 %2950 }
 0x2f5   : > { %5366 = vpow2.f32 %v3076_v7  ;;  %v2844_v29 = vsub.f32 %v6964_v50, %v2761_v31  ;;  %v3035_v16 = vsub.f32 %v6953_v57, %v2951_v13 }
 0x2f6   : > { %v7491_v63 = vpop.eup %5354  ;;  %5368 = vpow2.f32 %v2886_v46 }
 0x2f7   : > { %9505 = vst [vmem:[#allocation94_spill] sm:$0xff] %v7491_v63  ;;  %v7493_v45 = vpop.eup %5356  ;;  %v2888_v25 = vmul.f32 1.442695, %v2844_v29  ;;  %v3078_v2 = vmul.f32 1.442695, %v3035_v16  ;;  %3168 = vrot.lane.b32.xlu0 %v7491_v63, %s5707_s23 }
 0x2f8   : > { %9506 = vst [vmem:[#allocation95_spill] sm:$0xff] %v7493_v45  ;;  %3326 = vrot.lane.b32.xlu1 %v7493_v45, %s5708_s26  ;;  %v2953_v47 = vpop.permute.xlu0 %2952  ;;  %v2763_v23 = vpop.permute.xlu1 %2762 }
 0x2f9   : > { %5370 = vpow2.f32 %v2888_v25  ;;  %v3036_v31 = vsub.f32 %v6964_v50, %v2953_v47  ;;  %v2845_v13 = vsub.f32 %v6975_v42, %v2763_v23 }
 0x2fa   : > { %v7501_v7 = vpop.eup %5358  ;;  %5372 = vpow2.f32 %v3078_v2 }
 0x2fb   : > { %9507 = vst [vmem:[#allocation96_spill] sm:$0xff] %v7501_v7  ;;  %v7503_v46 = vpop.eup %5360  ;;  %v3080_v29 = vmul.f32 1.442695, %v3036_v31  ;;  %v2890_v16 = vmul.f32 1.442695, %v2845_v13  ;;  %3328 = vrot.lane.b32.xlu0 %v7501_v7, %s5708_s26 }
 0x2fc   : > { %9508 = vst [vmem:[#allocation97_spill] sm:$0xff] %v7503_v46  ;;  %3170 = vrot.lane.b32.xlu1 %v7503_v46, %s5707_s23  ;;  %v2765_v63 = vpop.permute.xlu0 %2764  ;;  %v2955_v45 = vpop.permute.xlu1 %2954 }
 0x2fd   : > { %5374 = vpow2.f32 %v3080_v29  ;;  %v2846_v47 = vsub.f32 %v6986_v30, %v2765_v63  ;;  %v3037_v23 = vsub.f32 %v6975_v42, %v2955_v45 }
 0x2fe   : > { %v7511_v25 = vpop.eup %5362  ;;  %5376 = vpow2.f32 %v2890_v16 }
 0x2ff   : > { %9509 = vst [vmem:[#allocation98_spill] sm:$0xff] %v7511_v25  ;;  %v7513_v2 = vpop.eup %5364  ;;  %v2892_v31 = vmul.f32 1.442695, %v2846_v47  ;;  %v3082_v13 = vmul.f32 1.442695, %v3037_v23  ;;  %3172 = vrot.lane.b32.xlu0 %v7511_v25, %s5707_s23 }
 0x300   : > { %9510 = vst [vmem:[#allocation99_spill] sm:$0xff] %v7513_v2  ;;  %3330 = vrot.lane.b32.xlu1 %v7513_v2, %s5708_s26  ;;  %v2957_v46 = vpop.permute.xlu0 %2956  ;;  %v2767_v7 = vpop.permute.xlu1 %2766 }
 0x301   : > { %5378 = vpow2.f32 %v2892_v31  ;;  %v3038_v63 = vsub.f32 %v6986_v30, %v2957_v46  ;;  %v2847_v45 = vsub.f32 %v6997_v53, %v2767_v7 }
 0x302   : > { %v7521_v29 = vpop.eup %5366  ;;  %5380 = vpow2.f32 %v3082_v13 }
 0x303   : > { %9511 = vst [vmem:[#allocation100_spill] sm:$0xff] %v7521_v29  ;;  %v7523_v16 = vpop.eup %5368  ;;  %v3084_v47 = vmul.f32 1.442695, %v3038_v63  ;;  %v2894_v23 = vmul.f32 1.442695, %v2847_v45  ;;  %3332 = vrot.lane.b32.xlu0 %v7521_v29, %s5708_s26 }
 0x304   : > { %9512 = vst [vmem:[#allocation101_spill] sm:$0xff] %v7523_v16  ;;  %3174 = vrot.lane.b32.xlu1 %v7523_v16, %s5707_s23  ;;  %v2769_v25 = vpop.permute.xlu0 %2768  ;;  %v2959_v2 = vpop.permute.xlu1 %2958 }
 0x305   : > { %5382 = vpow2.f32 %v3084_v47  ;;  %v2848_v46 = vsub.f32 %v7008_v14, %v2769_v25  ;;  %v3039_v7 = vsub.f32 %v6997_v53, %v2959_v2 }
 0x306   : > { %v7531_v31 = vpop.eup %5370  ;;  %5384 = vpow2.f32 %v2894_v23 }
 0x307   : > { %9513 = vst [vmem:[#allocation102_spill] sm:$0xff] %v7531_v31  ;;  %v7533_v13 = vpop.eup %5372  ;;  %v2896_v63 = vmul.f32 1.442695, %v2848_v46  ;;  %v3086_v45 = vmul.f32 1.442695, %v3039_v7  ;;  %3176 = vrot.lane.b32.xlu0 %v7531_v31, %s5707_s23 }
 0x308   : > { %9514 = vst [vmem:[#allocation103_spill] sm:$0xff] %v7533_v13  ;;  %3334 = vrot.lane.b32.xlu1 %v7533_v13, %s5708_s26  ;;  %v2961_v16 = vpop.permute.xlu0 %2960  ;;  %v2771_v29 = vpop.permute.xlu1 %2770 }
 0x309   : > { %5386 = vpow2.f32 %v2896_v63  ;;  %v3040_v25 = vsub.f32 %v7008_v14, %v2961_v16  ;;  %v2849_v2 = vsub.f32 %v7019_v33, %v2771_v29 }
 0x30a   : > { %v7541_v47 = vpop.eup %5374  ;;  %5388 = vpow2.f32 %v3086_v45 }
 0x30b   : > { %9515 = vst [vmem:[#allocation104_spill] sm:$0xff] %v7541_v47  ;;  %v7543_v23 = vpop.eup %5376  ;;  %v3088_v46 = vmul.f32 1.442695, %v3040_v25  ;;  %v2898_v7 = vmul.f32 1.442695, %v2849_v2  ;;  %3336 = vrot.lane.b32.xlu0 %v7541_v47, %s5708_s26 }
 0x30c   : > { %9516 = vst [vmem:[#allocation105_spill] sm:$0xff] %v7543_v23  ;;  %3178 = vrot.lane.b32.xlu1 %v7543_v23, %s5707_s23  ;;  %v2773_v31 = vpop.permute.xlu0 %2772  ;;  %v2963_v13 = vpop.permute.xlu1 %2962 }
 0x30d   : > { %5390 = vpow2.f32 %v3088_v46  ;;  %v2850_v16 = vsub.f32 %v7030_v6, %v2773_v31  ;;  %v3041_v29 = vsub.f32 %v7019_v33, %v2963_v13 }
 0x30e   : > { %v7551_v63 = vpop.eup %5378  ;;  %5392 = vpow2.f32 %v2898_v7 }
 0x30f   : > { %9517 = vst [vmem:[#allocation106_spill] sm:$0xff] %v7551_v63  ;;  %v7553_v45 = vpop.eup %5380  ;;  %v2900_v25 = vmul.f32 1.442695, %v2850_v16  ;;  %v3090_v2 = vmul.f32 1.442695, %v3041_v29  ;;  %3180 = vrot.lane.b32.xlu0 %v7551_v63, %s5707_s23 }
 0x310   : > { %9518 = vst [vmem:[#allocation107_spill] sm:$0xff] %v7553_v45  ;;  %3338 = vrot.lane.b32.xlu1 %v7553_v45, %s5708_s26  ;;  %v2965_v23 = vpop.permute.xlu0 %2964  ;;  %v2775_v47 = vpop.permute.xlu1 %2774 }
 0x311   : > { %5394 = vpow2.f32 %v2900_v25  ;;  %v3042_v31 = vsub.f32 %v7030_v6, %v2965_v23  ;;  %v2851_v13 = vsub.f32 %v7041_v58, %v2775_v47 }
 0x312   : > { %v7561_v46 = vpop.eup %5382  ;;  %5396 = vpow2.f32 %v3090_v2 }
 0x313   : > { %9519 = vst [vmem:[#allocation108_spill] sm:$0xff] %v7561_v46  ;;  %v7563_v7 = vpop.eup %5384  ;;  %v3092_v16 = vmul.f32 1.442695, %v3042_v31  ;;  %v2902_v29 = vmul.f32 1.442695, %v2851_v13  ;;  %3340 = vrot.lane.b32.xlu0 %v7561_v46, %s5708_s26 }
 0x314   : > { %9520 = vst [vmem:[#allocation109_spill] sm:$0xff] %v7563_v7  ;;  %3182 = vrot.lane.b32.xlu1 %v7563_v7, %s5707_s23  ;;  %v2777_v63 = vpop.permute.xlu0 %2776  ;;  %v2967_v45 = vpop.permute.xlu1 %2966 }
 0x315   : > { %5398 = vpow2.f32 %v3092_v16  ;;  %v2852_v23 = vsub.f32 %v7052_v1, %v2777_v63  ;;  %v3043_v47 = vsub.f32 %v7041_v58, %v2967_v45 }
 0x316   : > { %v7571_v25 = vpop.eup %5386  ;;  %5400 = vpow2.f32 %v2902_v29 }
 0x317   : > { %9521 = vst [vmem:[#allocation110_spill] sm:$0xff] %v7571_v25  ;;  %v7573_v2 = vpop.eup %5388  ;;  %v2904_v31 = vmul.f32 1.442695, %v2852_v23  ;;  %v3094_v13 = vmul.f32 1.442695, %v3043_v47  ;;  %3184 = vrot.lane.b32.xlu0 %v7571_v25, %s5707_s23 }
 0x318   : > { %9522 = vst [vmem:[#allocation111_spill] sm:$0xff] %v7573_v2  ;;  %3342 = vrot.lane.b32.xlu1 %v7573_v2, %s5708_s26  ;;  %v2969_v7 = vpop.permute.xlu0 %2968  ;;  %v2779_v46 = vpop.permute.xlu1 %2778 }
 0x319   : > { %5402 = vpow2.f32 %v2904_v31  ;;  %v3044_v63 = vsub.f32 %v7052_v1, %v2969_v7  ;;  %v2853_v45 = vsub.f32 %v7063_v48, %v2779_v46 }
 0x31a   : > { %v7581_v16 = vpop.eup %5390  ;;  %5404 = vpow2.f32 %v3094_v13 }
 0x31b   : > { %9523 = vst [vmem:[#allocation112_spill] sm:$0xff] %v7581_v16  ;;  %v7583_v29 = vpop.eup %5392  ;;  %v3096_v23 = vmul.f32 1.442695, %v3044_v63  ;;  %v2906_v47 = vmul.f32 1.442695, %v2853_v45  ;;  %3344 = vrot.lane.b32.xlu0 %v7581_v16, %s5708_s26 }
 0x31c   : > { %9524 = vst [vmem:[#allocation113_spill] sm:$0xff] %v7583_v29  ;;  %3186 = vrot.lane.b32.xlu1 %v7583_v29, %s5707_s23  ;;  %v2781_v25 = vpop.permute.xlu0 %2780  ;;  %v2971_v2 = vpop.permute.xlu1 %2970 }
 0x31d   : > { %5406 = vpow2.f32 %v3096_v23  ;;  %v2854_v7 = vsub.f32 %v7074_v38, %v2781_v25  ;;  %v3045_v46 = vsub.f32 %v7063_v48, %v2971_v2 }
 0x31e   : > { %v7591_v31 = vpop.eup %5394  ;;  %5408 = vpow2.f32 %v2906_v47 }
 0x31f   : > { %9525 = vst [vmem:[#allocation114_spill] sm:$0xff] %v7591_v31  ;;  %v7593_v13 = vpop.eup %5396  ;;  %v2908_v63 = vmul.f32 1.442695, %v2854_v7  ;;  %v3098_v45 = vmul.f32 1.442695, %v3045_v46  ;;  %3188 = vrot.lane.b32.xlu0 %v7591_v31, %s5707_s23 }
 0x320   : > { %9526 = vst [vmem:[#allocation115_spill] sm:$0xff] %v7593_v13  ;;  %3346 = vrot.lane.b32.xlu1 %v7593_v13, %s5708_s26  ;;  %v2973_v29 = vpop.permute.xlu0 %2972  ;;  %v2783_v16 = vpop.permute.xlu1 %2782 }
 0x321   : > { %5410 = vpow2.f32 %v2908_v63  ;;  %v3046_v25 = vsub.f32 %v7074_v38, %v2973_v29  ;;  %v2855_v2 = vsub.f32 %v7085_v3, %v2783_v16 }
 0x322   : > { %v7601_v23 = vpop.eup %5398  ;;  %5412 = vpow2.f32 %v3098_v45 }
 0x323   : > { %9527 = vst [vmem:[#allocation116_spill] sm:$0xff] %v7601_v23  ;;  %v7603_v47 = vpop.eup %5400  ;;  %v3100_v7 = vmul.f32 1.442695, %v3046_v25  ;;  %v2910_v46 = vmul.f32 1.442695, %v2855_v2  ;;  %3348 = vrot.lane.b32.xlu0 %v7601_v23, %s5708_s26 }
 0x324   : > { %9528 = vst [vmem:[#allocation117_spill] sm:$0xff] %v7603_v47  ;;  %3190 = vrot.lane.b32.xlu1 %v7603_v47, %s5707_s23  ;;  %v2785_v31 = vpop.permute.xlu0 %2784  ;;  %v2975_v13 = vpop.permute.xlu1 %2974 }
 0x325   : > { %5414 = vpow2.f32 %v3100_v7  ;;  %v2856_v29 = vsub.f32 %v7096_v36, %v2785_v31  ;;  %v3047_v16 = vsub.f32 %v7085_v3, %v2975_v13 }
 0x326   : > { %v7611_v63 = vpop.eup %5402  ;;  %5416 = vpow2.f32 %v2910_v46 }
 0x327   : > { %9529 = vst [vmem:[#allocation118_spill] sm:$0xff] %v7611_v63  ;;  %v7613_v45 = vpop.eup %5404  ;;  %v2912_v25 = vmul.f32 1.442695, %v2856_v29  ;;  %v3102_v2 = vmul.f32 1.442695, %v3047_v16  ;;  %3192 = vrot.lane.b32.xlu0 %v7611_v63, %s5707_s23 }
 0x328   : > { %9530 = vst [vmem:[#allocation119_spill] sm:$0xff] %v7613_v45  ;;  %3350 = vrot.lane.b32.xlu1 %v7613_v45, %s5708_s26  ;;  %v2977_v47 = vpop.permute.xlu0 %2976  ;;  %v2787_v23 = vpop.permute.xlu1 %2786 }
 0x329   : > { %5418 = vpow2.f32 %v2912_v25  ;;  %v3048_v31 = vsub.f32 %v7096_v36, %v2977_v47  ;;  %v2857_v13 = vsub.f32 %v7107_v8, %v2787_v23 }
 0x32a   : > { %v7621_v7 = vpop.eup %5406  ;;  %5420 = vpow2.f32 %v3102_v2 }
 0x32b   : > { %9531 = vst [vmem:[#allocation120_spill] sm:$0xff] %v7621_v7  ;;  %v7623_v46 = vpop.eup %5408  ;;  %v3104_v29 = vmul.f32 1.442695, %v3048_v31  ;;  %v2914_v16 = vmul.f32 1.442695, %v2857_v13  ;;  %3352 = vrot.lane.b32.xlu0 %v7621_v7, %s5708_s26 }
 0x32c   : > { %9532 = vst [vmem:[#allocation121_spill] sm:$0xff] %v7623_v46  ;;  %3194 = vrot.lane.b32.xlu1 %v7623_v46, %s5707_s23  ;;  %v2789_v63 = vpop.permute.xlu0 %2788  ;;  %v2979_v45 = vpop.permute.xlu1 %2978  ;;  %v2608_v46 = vsub.f32 %v6834_v43, %v7164_v60 }
 0x32d   : > { %5422 = vpow2.f32 %v3104_v29  ;;  %v2858_v47 = vsub.f32 %v7118_v41, %v2789_v63  ;;  %v3049_v23 = vsub.f32 %v7107_v8, %v2979_v45 }
 0x32e   : > { %v7631_v25 = vpop.eup %5410  ;;  %5424 = vpow2.f32 %v2914_v16  ;;  %v2640_v60 = vmul.f32 1.442695, %v2608_v46 }
 0x32f   : > { %9533 = vst [vmem:[#allocation122_spill] sm:$0xff] %v7631_v25  ;;  %v7633_v2 = vpop.eup %5412  ;;  %v2916_v31 = vmul.f32 1.442695, %v2858_v47  ;;  %v3106_v13 = vmul.f32 1.442695, %v3049_v23  ;;  %3196 = vrot.lane.b32.xlu0 %v7631_v25, %s5707_s23 }
 0x330   : > { %9534 = vst [vmem:[#allocation123_spill] sm:$0xff] %v7633_v2  ;;  %3354 = vrot.lane.b32.xlu1 %v7633_v2, %s5708_s26  ;;  %v2981_v29 = vpop.permute.xlu0 %2980  ;;  %v2791_v63 = vpop.permute.xlu1 %2790 }
 0x331   : > { %5426 = vpow2.f32 %v2916_v31  ;;  %v3050_v45 = vsub.f32 %v7118_v41, %v2981_v29  ;;  %v2859_v16 = vsub.f32 %v7129_v11, %v2791_v63 }
 0x332   : > { %v7643_v7 = vpop.eup %5414  ;;  %5428 = vpow2.f32 %v3106_v13 }
 0x333   : > { %v7645_v47 = vpop.eup %5416  ;;  %v3108_v23 = vmul.f32 1.442695, %v3050_v45  ;;  %v2918_v25 = vmul.f32 1.442695, %v2859_v16  ;;  %3356 = vrot.lane.b32.xlu0 %v7643_v7, %s5708_s26  ;;  %v2609_v45 = vsub.f32 %v6843_v18, %v7172_v27 }
 0x334   : > { %9535 = vst [vmem:[#allocation124_spill] sm:$0xff] %v7645_v47  ;;  %3198 = vrot.lane.b32.xlu1 %v7645_v47, %s5707_s23  ;;  %v2793_v43 = vpop.permute.xlu0 %2792  ;;  %v2983_v31 = vpop.permute.xlu1 %2982 }
 0x335   : > { %5430 = vpow2.f32 %v3108_v23  ;;  %v2860_v29 = vsub.f32 %v7140_v12, %v2793_v43  ;;  %v3051_v63 = vsub.f32 %v7129_v11, %v2983_v31 }
 0x336   : > { %v7653_v2 = vpop.eup %5418  ;;  %5432 = vpow2.f32 %v2918_v25 }
 0x337   : > { %v7655_v13 = vpop.eup %5420  ;;  %v2920_v16 = vmul.f32 1.442695, %v2860_v29  ;;  %v3110_v46 = vmul.f32 1.442695, %v3051_v63  ;;  %3200 = vrot.lane.b32.xlu0 %v7653_v2, %s5707_s23  ;;  %5434 = vpow2.f32 %v2640_v60  ;;  %v2642_v29 = vmul.f32 1.442695, %v2609_v45 }
 0x338   : > { %3358 = vrot.lane.b32.xlu1 %v7655_v13, %s5708_s26  ;;  %v2985_v43 = vpop.permute.xlu0 %2984  ;;  %v2795_v23 = vpop.permute.xlu1 %2794 }
 0x339   : > { %5436 = vpow2.f32 %v2920_v16  ;;  %v3052_v31 = vsub.f32 %v7140_v12, %v2985_v43  ;;  %v2861_v25 = vsub.f32 %v7151_v28, %v2795_v23  ;;  %v2610_v16 = vsub.f32 %v6854_v56, %v7193_v55 }
 0x33a   : > { %v7665_v47 = vpop.eup %5422  ;;  %5438 = vpow2.f32 %v3110_v46 }
 0x33b   : > { %9536 = vst [vmem:[#allocation125_spill] sm:$0xff] %v7665_v47  ;;  %v7667_v27 = vpop.eup %5424  ;;  %v3112_v63 = vmul.f32 1.442695, %v3052_v31  ;;  %v2922_v18 = vmul.f32 1.442695, %v2861_v25  ;;  %3360 = vrot.lane.b32.xlu0 %v7665_v47, %s5708_s26 }
 0x33c   : > { %9537 = vst [vmem:[#allocation126_spill] sm:$0xff] %v7667_v27  ;;  %3202 = vrot.lane.b32.xlu1 %v7667_v27, %s5707_s23  ;;  %v2987_v60 = vpop.permute.xlu1 %2986  ;;  %v2644_v55 = vmul.f32 1.442695, %v2610_v16 }
 0x33d   : > { %5440 = vpow2.f32 %v3112_v63  ;;  %v3053_v43 = vsub.f32 %v7151_v28, %v2987_v60  ;;  %v2797_v23 = vpop.permute.xlu0 %2796 }
 0x33e   : > { %v7676_v46 = vpop.eup %5426  ;;  %5442 = vpow2.f32 %v2922_v18  ;;  %v2862_v45 = vsub.f32 %v7179_v5, %v2797_v23 }
 0x33f   : > { %9538 = vst [vmem:[#allocation127_spill] sm:$0xff] %v7676_v46  ;;  %v7679_v31 = vpop.eup %5428  ;;  %5444 = vpow2.f32 %v2642_v29  ;;  %v3114_v25 = vmul.f32 1.442695, %v3053_v43  ;;  %3204 = vrot.lane.b32.xlu0 %v7676_v46, %s5707_s23  ;;  %v2611_v43 = vsub.f32 %v6865_v59, %v7200_v15 }
 0x340   : > { %v2924_v27 = vmul.f32 1.442695, %v2862_v45  ;;  %3362 = vrot.lane.b32.xlu1 %v7679_v31, %s5708_s26 }
 0x341   : > { %5446 = vpow2.f32 %v3114_v25  ;;  %v2989_v63 = vpop.permute.xlu0 %2988  ;;  %v2799_v60 = vpop.permute.xlu1 %2798  ;;  %v2646_v15 = vmul.f32 1.442695, %v2611_v43 }
 0x342   : > { %v7685_v56 = vpop.eup %5430  ;;  %5448 = vpow2.f32 %v2924_v27  ;;  %v3054_v18 = vsub.f32 %v7179_v5, %v2989_v63  ;;  %v2863_v23 = vsub.f32 %v7186_v24, %v2799_v60 }
 0x343   : > { %9539 = vst [vmem:[#allocation128_spill] sm:$0xff] %v7685_v56  ;;  %v7689_v29 = vpop.eup %5432  ;;  %3364 = vrot.lane.b32.xlu0 %v7685_v56, %s5708_s26  ;;  %5450 = vpow2.f32 %v2644_v55  ;;  %v2612_v55 = vsub.f32 %v6876_v61, %v7207_v0  ;;  %v2613_v0 = vsub.f32 %v6887_v62, %v7214_v19 }
 0x344   : > { %9540 = vst [vmem:[#allocation129_spill] sm:$0xff] %v7689_v29  ;;  %v3116_v45 = vmul.f32 1.442695, %v3054_v18  ;;  %v2926_v16 = vmul.f32 1.442695, %v2863_v23  ;;  %3206 = vrot.lane.b32.xlu1 %v7689_v29, %s5707_s23  ;;  %v7697_v25 = vpop.eup %5434 }
 0x345   : > { %v3153_v27 = vpop.permute.xlu0 %3152  ;;  %v2991_v63 = vpop.permute.xlu1 %2990 }
 0x346   : > { %v7699_v47 = vpop.eup %5436  ;;  %5452 = vpow2.f32 %v3116_v45  ;;  %v3055_v60 = vsub.f32 %v7186_v24, %v2991_v63  ;;  %v3248_v18 = vadd.f32 %v7697_v25, %v3153_v27  ;;  %v2648_v27 = vmul.f32 1.442695, %v2612_v55 }
 0x347   : > { %v7702_v46 = vpop.eup %5438  ;;  %5454 = vpow2.f32 %v2926_v16  ;;  %3208 = vrot.lane.b32.xlu0 %v7699_v47, %s5707_s23 }
 0x348   : > { %v3118_v23 = vmul.f32 1.442695, %v3055_v60  ;;  %3366 = vrot.lane.b32.xlu1 %v7702_v46, %s5708_s26 }
 0x349   : > { %v3313_v59 = vpop.permute.xlu0 %3312  ;;  %v3155_v45 = vpop.permute.xlu1 %3154 }
 0x34a   : > { %v7711_v29 = vpop.eup %5440  ;;  %5456 = vpow2.f32 %v3118_v23  ;;  %v3408_v63 = vadd.f32 %v3313_v59, %v3248_v18 }
 0x34b   : > { %9541 = vst [vmem:[#allocation130_spill] sm:$0xff] %v7711_v29  ;;  %v7713_v43 = vpop.eup %5442  ;;  %5458 = vpow2.f32 %v2646_v15  ;;  %3368 = vrot.lane.b32.xlu0 %v7711_v29, %s5708_s26  ;;  %v2650_v15 = vmul.f32 1.442695, %v2613_v0 }
 0x34c   : > { %9542 = vst [vmem:[#allocation131_spill] sm:$0xff] %v7713_v43  ;;  %v5445_v16 = vpop.eup %5444  ;;  %5460 = vrcp.f32 %v3408_v63  ;;  %3210 = vrot.lane.b32.xlu1 %v7713_v43, %s5707_s23 }
 0x34d   : > { %v3249_v60 = vadd.f32 %v5445_v16, %v3155_v45  ;;  %v3315_v61 = vpop.permute.xlu1 %3314  ;;  %5462 = vpow2.f32 %v2648_v27  ;;  %v2614_v45 = vsub.f32 %v6898_v22, %v7221_v37  ;;  %v2615_v37 = vsub.f32 %v6909_v44, %v7228_v21 }
 0x34e   : > { %v7721_v56 = vpop.eup %5446 }
 0x34f   : > { %v7723_v59 = vpop.eup %5448  ;;  %v3409_v18 = vadd.f32 %v3315_v61, %v3249_v60  ;;  %v2652_v43 = vmul.f32 1.442695, %v2614_v45 }
 0x350   : > { %3370 = vrot.lane.b32.xlu1 %v7721_v56, %s5708_s26  ;;  %3212 = vrot.lane.b32.xlu0 %v7723_v59, %s5707_s23  ;;  %v7729_v55 = vpop.eup %5450 }
 0x351   : > { %v3157_v23 = vpop.permute.xlu0 %3156  ;;  %5464 = vrcp.f32 %v3409_v18 }
 0x352   : > { %v3250_v61 = vadd.f32 %v7729_v55, %v3157_v23  ;;  %5466 = vpow2.f32 %v2650_v15 }
 0x353   : > { %v7731_v63 = vpop.eup %5452 }
 0x354   : > { %9543 = vst [vmem:[#allocation132_spill] sm:$0xff] %v7731_v63  ;;  %v7733_v19 = vpop.eup %5454  ;;  %3372 = vrot.lane.b32.xlu0 %v7731_v63, %s5708_s26 }
 0x355   : > { %9544 = vst [vmem:[#allocation133_spill] sm:$0xff] %v7733_v19  ;;  %3214 = vrot.lane.b32.xlu1 %v7733_v19, %s5707_s23  ;;  %v3317_v27 = vpop.permute.xlu0 %3316 }
 0x356   : > { %v3410_v0 = vadd.f32 %v3317_v27, %v3250_v61  ;;  %v3159_v60 = vpop.permute.xlu1 %3158  ;;  %v2654_v27 = vmul.f32 1.442695, %v2615_v37 }
 0x357   : > { %v7742_v62 = vpop.eup %5456 }
 0x358   : > { %9545 = vst [vmem:[#allocation134_spill] sm:$0xff] %v7742_v62  ;;  %v5459_v18 = vpop.eup %5458  ;;  %5468 = vrcp.f32 %v3410_v0 }
 0x359   : > { %v5461_v29 = vpop.eup %5460  ;;  %v3251_v23 = vadd.f32 %v5459_v18, %v3159_v60  ;;  %3374 = vrot.lane.b32.xlu1 %v7742_v62, %s5708_s26  ;;  %v3161_v15 = vpop.permute.xlu0 %3160  ;;  %5470 = vpow2.f32 %v2652_v43  ;;  %v2616_v62 = vsub.f32 %v6920_v10, %v7235_v49 }
 0x35a   : > { %v3319_v63 = vpop.permute.xlu1 %3318  ;;  %4208 = vrot.lane.b32.xlu0 %v5461_v29, %s5710_s29  ;;  %v3472_v61 = vmul.f32 %v5461_v29, %v7697_v25  ;;  %v7751_v0 = vpop.eup %5462 }
 0x35b   : > { %v3411_v22 = vadd.f32 %v3319_v63, %v3251_v23  ;;  %v3252_v60 = vadd.f32 %v7751_v0, %v3161_v15  ;;  %v2656_v23 = vmul.f32 1.442695, %v2616_v62  ;;  %v2617_v15 = vsub.f32 %v6931_v52, %v7242_v54 }
 0x35d   : > { %5472 = vrcp.f32 %v3411_v22  ;;  %3728 = vrot.lane.b32.xlu1 %v5461_v29, %s5709_s27  ;;  %v3321_v45 = vpop.permute.xlu0 %3320 }
 0x35e   : > { %v3163_v21 = vpop.permute.xlu1 %3162  ;;  %3506 = vperm.xlu0 %5148, %v3472_v61   ;;  %v5465_v44 = vpop.eup %5464  ;;  %5474 = vpow2.f32 %v2654_v27  ;;  %v3412_v63 = vadd.f32 %v3321_v45, %v3252_v60  ;;  %v2658_v60 = vmul.f32 1.442695, %v2617_v15 }
 0x35f   : > { %v5467_v43 = vpop.eup %5466  ;;  %v3473_v37 = vmul.f32 %v5465_v44, %v5445_v16 }
 0x360   : > { %v3253_v29 = vadd.f32 %v5467_v43, %v3163_v21  ;;  %5476 = vrcp.f32 %v3412_v63  ;;  %v2618_v63 = vsub.f32 %v6942_v40, %v7249_v26 }
 0x361   : > { %4210 = vrot.lane.b32.xlu1 %v5465_v44, %s5710_s29  ;;  %v3165_v25 = vpop.permute.xlu0 %3164  ;;  %5478 = vpow2.f32 %v2656_v23 }
 0x362   : > { %v3323_v22 = vpop.permute.xlu1 %3322  ;;  %3730 = vrot.lane.b32.xlu0 %v5465_v44, %s5709_s27  ;;  %v2660_v52 = vmul.f32 1.442695, %v2618_v63 }
 0x363   : > { %v3413_v61 = vadd.f32 %v3323_v22, %v3253_v29 }
 0x365   : > { %v5469_v19 = vpop.eup %5468  ;;  %3511 = vperm.xlu1 %5149, %v3473_v37   ;;  %v3325_v49 = vpop.permute.xlu0 %3324  ;;  %5480 = vrcp.f32 %v3413_v61 }
 0x366   : > { %v3167_v27 = vpop.permute.xlu1 %3166  ;;  %4212 = vrot.lane.b32.xlu0 %v5469_v19, %s5710_s29  ;;  %v7761_v45 = vpop.eup %5470  ;;  %v3474_v54 = vmul.f32 %v5469_v19, %v7729_v55  ;;  %5482 = vpow2.f32 %v2658_v60 }
 0x367   : > { %v3254_v21 = vadd.f32 %v7761_v45, %v3165_v25  ;;  %v2619_v25 = vsub.f32 %v6953_v57, %v7256_v34 }
 0x369   : > { %3732 = vrot.lane.b32.xlu1 %v5469_v19, %s5709_s27  ;;  %v3169_v44 = vpop.permute.xlu0 %3168  ;;  %v3414_v22 = vadd.f32 %v3325_v49, %v3254_v21 }
 0x36a   : > { %v5473_v62 = vpop.eup %5472  ;;  %v3327_v16 = vpop.permute.xlu1 %3326 }
 0x36b   : > { %3734 = vrot.lane.b32.xlu0 %v5473_v62, %s5709_s27  ;;  %v3475_v37 = vmul.f32 %v5473_v62, %v5459_v18  ;;  %v5475_v23 = vpop.eup %5474  ;;  %5484 = vrcp.f32 %v3414_v22  ;;  %v2662_v18 = vmul.f32 1.442695, %v2619_v25 }
 0x36c   : > { %v3255_v61 = vadd.f32 %v5475_v23, %v3167_v27  ;;  %5486 = vpow2.f32 %v2660_v52 }
 0x36d   : > { %3516 = vperm.xlu1 %5149, %v3474_v54   ;;  %v3329_v29 = vpop.permute.xlu0 %3328  ;;  %v5477_v19 = vpop.eup %5476 }
 0x36e   : > { %v3171_v15 = vpop.permute.xlu1 %3170  ;;  %v3415_v10 = vadd.f32 %v3327_v16, %v3255_v61  ;;  %v7773_v49 = vpop.eup %5478  ;;  %v2620_v16 = vsub.f32 %v6964_v50, %v7263_v4 }
 0x36f   : > { %3521 = vperm.xlu0 %5148, %v3475_v37   ;;  %v3256_v34 = vadd.f32 %v7773_v49, %v3169_v44  ;;  %v2621_v44 = vsub.f32 %v6975_v42, %v7270_v32  ;;  %v9657_v42 = vld [vmem:[#allocation64_spill] sm:$0xff] }
 0x370   : > { %5488 = vrcp.f32 %v3415_v10  ;;  %v2664_v61 = vmul.f32 1.442695, %v2620_v16 }
 0x371   : > { %4214 = vrot.lane.b32.xlu1 %v5473_v62, %s5710_s29  ;;  %v3173_v55 = vpop.permute.xlu0 %3172  ;;  %v3476_v62 = vmul.f32 %v5477_v19, %v7751_v0  ;;  %5490 = vpow2.f32 %v2662_v18  ;;  %v3416_v52 = vadd.f32 %v3329_v29, %v3256_v34  ;;  %v2622_v34 = vsub.f32 %v6986_v30, %v7277_v9 }
 0x372   : > { %v3331_v26 = vpop.permute.xlu1 %3330  ;;  %v5481_v60 = vpop.eup %5480 }
 0x373   : > { %4216 = vrot.lane.b32.xlu0 %v5477_v19, %s5710_s29  ;;  %v3477_v63 = vmul.f32 %v5481_v60, %v5467_v43  ;;  %v5483_v10 = vpop.eup %5482  ;;  %5492 = vrcp.f32 %v3416_v52  ;;  %v2666_v43 = vmul.f32 1.442695, %v2621_v44  ;;  %v2668_v44 = vmul.f32 1.442695, %v2622_v34 }
 0x374   : > { %v3257_v37 = vadd.f32 %v5483_v10, %v3171_v15  ;;  %5494 = vpow2.f32 %v2664_v61 }
 0x375   : > { %3736 = vrot.lane.b32.xlu1 %v5477_v19, %s5709_s27  ;;  %v3333_v27 = vpop.permute.xlu0 %3332 }
 0x376   : > { %v3175_v21 = vpop.permute.xlu1 %3174  ;;  %v3417_v25 = vadd.f32 %v3331_v26, %v3257_v37 }
 0x377   : > { %3738 = vrot.lane.b32.xlu0 %v5481_v60, %s5709_s27 }
 0x378   : > { %v5485_v19 = vpop.eup %5484  ;;  %5496 = vrcp.f32 %v3417_v25 }
 0x379   : > { %3526 = vperm.xlu1 %5149, %v3476_v62   ;;  %v3177_v54 = vpop.permute.xlu0 %3176  ;;  %v7785_v29 = vpop.eup %5486  ;;  %5498 = vpow2.f32 %v2666_v43 }
 0x37a   : > { %v3335_v22 = vpop.permute.xlu1 %3334  ;;  %v3258_v26 = vadd.f32 %v7785_v29, %v3173_v55  ;;  %v2623_v55 = vsub.f32 %v6997_v53, %v7284_v20 }
 0x37b   : > { %3531 = vperm.xlu0 %5148, %v3477_v63  }
 0x37c   : > { %v3418_v62 = vadd.f32 %v3333_v27, %v3258_v26  ;;  %v2670_v27 = vmul.f32 1.442695, %v2623_v55  ;;  %v9546_v26 = vld [vmem:[#allocation67_spill] sm:$0xff] }
 0x37d   : > { %4218 = vrot.lane.b32.xlu1 %v5481_v60, %s5710_s29  ;;  %v3337_v0 = vpop.permute.xlu0 %3336  ;;  %v5489_v18 = vpop.eup %5488  ;;  %v3478_v60 = vmul.f32 %v5485_v19, %v7761_v45 }
 0x37e   : > { %v3179_v4 = vpop.permute.xlu1 %3178  ;;  %v3479_v52 = vmul.f32 %v5489_v18, %v5475_v23  ;;  %v5491_v63 = vpop.eup %5490  ;;  %5500 = vrcp.f32 %v3418_v62 }
 0x37f   : > { %4220 = vrot.lane.b32.xlu0 %v5485_v19, %s5710_s29  ;;  %v3259_v61 = vadd.f32 %v5491_v63, %v3175_v21  ;;  %5502 = vpow2.f32 %v2668_v44 }
 0x380   : > { %v5493_v9 = vpop.eup %5492 }
 0x381   : > { %3740 = vrot.lane.b32.xlu1 %v5485_v19, %s5709_s27  ;;  %v7788_v15 = vpop.permute.xlu0 %3180  ;;  %v3419_v25 = vadd.f32 %v3335_v22, %v3259_v61  ;;  %v7801_v23 = vpop.eup %5494 }
 0x382   : > { %v3339_v32 = vpop.permute.xlu1 %3338  ;;  %v3260_v22 = vadd.f32 %v7801_v23, %v3177_v54  ;;  %v9547_v54 = vld [vmem:[#allocation68_spill] sm:$0xff] }
 0x383   : > { %3742 = vrot.lane.b32.xlu0 %v5489_v18, %s5709_s27  ;;  %5504 = vrcp.f32 %v3419_v25  ;;  %v2625_v53 = vsub.f32 %v7019_v33, %v9547_v54 }
 0x384   : > { %5506 = vpow2.f32 %v2670_v27  ;;  %v3420_v34 = vadd.f32 %v3337_v0, %v3260_v22 }
 0x385   : > { %3536 = vperm.xlu1 %5149, %v3478_v60   ;;  %v3341_v16 = vpop.permute.xlu0 %3340  ;;  %v5497_v20 = vpop.eup %5496  ;;  %v2624_v60 = vsub.f32 %v7008_v14, %v9546_v26 }
 0x386   : > { %v3183_v37 = vpop.permute.xlu1 %3182  ;;  %v5499_v61 = vpop.eup %5498  ;;  %5508 = vrcp.f32 %v3420_v34 }
 0x387   : > { %3541 = vperm.xlu0 %5148, %v3479_v52   ;;  %v3481_v52 = vmul.f32 %v5497_v20, %v5483_v10  ;;  %v3261_v55 = vadd.f32 %v5499_v61, %v3179_v4  ;;  %v2672_v25 = vmul.f32 1.442695, %v2624_v60  ;;  %v2674_v4 = vmul.f32 1.442695, %v2625_v53  ;;  %v9548_v60 = vld [vmem:[#allocation69_spill] sm:$0xff] }
 0x388   : > { %v2626_v34 = vsub.f32 %v7030_v6, %v9548_v60 }
 0x389   : > { %4222 = vrot.lane.b32.xlu1 %v5489_v18, %s5710_s29  ;;  %v7798_v45 = vpop.permute.xlu0 %3184  ;;  %v3480_v18 = vmul.f32 %v5493_v9, %v7773_v49  ;;  %v3421_v49 = vadd.f32 %v3339_v32, %v3261_v55  ;;  %5510 = vpow2.f32 %v2672_v25 }
 0x38a   : > { %v3343_v19 = vpop.permute.xlu1 %3342  ;;  %v2676_v33 = vmul.f32 1.442695, %v2626_v34  ;;  %v9550_v34 = vld [vmem:[#allocation71_spill] sm:$0xff] }
 0x38b   : > { %4224 = vrot.lane.b32.xlu0 %v5493_v9, %s5710_s29  ;;  %v5501_v0 = vpop.eup %5500  ;;  %5512 = vrcp.f32 %v3421_v49 }
 0x38c   : > { %v7825_v10 = vpop.eup %5502  ;;  %v3482_v26 = vmul.f32 %v5501_v0, %v7785_v29  ;;  %5514 = vpow2.f32 %v2674_v4 }
 0x38d   : > { %3744 = vrot.lane.b32.xlu1 %v5493_v9, %s5709_s27  ;;  %v7804_v21 = vpop.permute.xlu0 %3344 }
 0x38e   : > { %v7806_v43 = vpop.permute.xlu1 %3186 }
 0x38f   : > { %3746 = vrot.lane.b32.xlu0 %v5497_v20, %s5709_s27 }
 0x391   : > { %3546 = vperm.xlu1 %5149, %v3480_v18   ;;  %v7813_v62 = vpop.permute.xlu0 %3188  ;;  %v5505_v18 = vpop.eup %5504 }
 0x392   : > { %v7815_v44 = vpop.permute.xlu1 %3346  ;;  %v3483_v55 = vmul.f32 %v5505_v18, %v5491_v63  ;;  %v5507_v25 = vpop.eup %5506 }
 0x393   : > { %3551 = vperm.xlu0 %5148, %v3481_v52   ;;  %v3263_v49 = vadd.f32 %v5507_v25, %v3183_v37 }
 0x395   : > { %4226 = vrot.lane.b32.xlu1 %v5497_v20, %s5710_s29  ;;  %v7820_v9 = vpop.permute.xlu0 %3348  ;;  %v3262_v20 = vadd.f32 %v7825_v10, %v7788_v15  ;;  %v9549_v15 = vld [vmem:[#allocation70_spill] sm:$0xff]  ;;  %v3423_v29 = vadd.f32 %v3343_v19, %v3263_v49 }
 0x396   : > { %v7822_v27 = vpop.permute.xlu1 %3190  ;;  %v2627_v14 = vsub.f32 %v7041_v58, %v9549_v15  ;;  %v9551_v58 = vld [vmem:[#allocation72_spill] sm:$0xff] }
 0x397   : > { %4228 = vrot.lane.b32.xlu0 %v5501_v0, %s5710_s29  ;;  %v3422_v53 = vadd.f32 %v3341_v16, %v3262_v20  ;;  %v5509_v16 = vpop.eup %5508 }
 0x398   : > { %v7850_v63 = vpop.eup %5510  ;;  %v2678_v37 = vmul.f32 1.442695, %v2627_v14  ;;  %v3484_v60 = vmul.f32 %v5509_v16, %v7801_v23  ;;  %v2629_v23 = vsub.f32 %v7063_v48, %v9551_v58  ;;  %v9553_v48 = vld [vmem:[#allocation74_spill] sm:$0xff] }
 0x399   : > { %3748 = vrot.lane.b32.xlu1 %v5501_v0, %s5709_s27  ;;  %v7828_v22 = vpop.permute.xlu0 %3192  ;;  %5516 = vrcp.f32 %v3422_v53 }
 0x39a   : > { %v7830_v32 = vpop.permute.xlu1 %3350  ;;  %5518 = vpow2.f32 %v2676_v33  ;;  %v2628_v33 = vsub.f32 %v7052_v1, %v9550_v34  ;;  %v2631_v1 = vsub.f32 %v7085_v3, %v9553_v48 }
 0x39b   : > { %3750 = vrot.lane.b32.xlu0 %v5505_v18, %s5709_s27  ;;  %5520 = vrcp.f32 %v3423_v29 }
 0x39c   : > { %5522 = vpow2.f32 %v2678_v37 }
 0x39d   : > { %3556 = vperm.xlu1 %5149, %v3482_v26   ;;  %v7838_v52 = vpop.permute.xlu0 %3352  ;;  %v5513_v26 = vpop.eup %5512 }
 0x39e   : > { %v7840_v54 = vpop.permute.xlu1 %3194  ;;  %v5515_v49 = vpop.eup %5514 }
 0x39f   : > { %3561 = vperm.xlu0 %5148, %v3483_v55   ;;  %v3485_v55 = vmul.f32 %v5513_v26, %v5499_v61  ;;  %v3265_v29 = vadd.f32 %v5515_v49, %v7806_v43  ;;  %v2682_v43 = vmul.f32 1.442695, %v2629_v23 }
 0x3a1   : > { %4230 = vrot.lane.b32.xlu1 %v5505_v18, %s5710_s29  ;;  %v7845_v0 = vpop.permute.xlu0 %3196  ;;  %v3264_v18 = vadd.f32 %v7850_v63, %v7798_v45  ;;  %v2680_v45 = vmul.f32 1.442695, %v2628_v33  ;;  %v9552_v33 = vld [vmem:[#allocation73_spill] sm:$0xff] }
 0x3a2   : > { %v7847_v4 = vpop.permute.xlu1 %3354 }
 0x3a3   : > { %4232 = vrot.lane.b32.xlu0 %v5509_v16, %s5710_s29  ;;  %v3424_v14 = vadd.f32 %v7804_v21, %v3264_v18 }
 0x3a5   : > { %3752 = vrot.lane.b32.xlu1 %v5509_v16, %s5709_s27  ;;  %v7853_v20 = vpop.permute.xlu0 %3356  ;;  %5524 = vrcp.f32 %v3424_v14  ;;  %v3425_v16 = vadd.f32 %v7815_v44, %v3265_v29  ;;  %v2630_v14 = vsub.f32 %v7074_v38, %v9552_v33  ;;  %v9554_v33 = vld [vmem:[#allocation75_spill] sm:$0xff] }
 0x3a6   : > { %v7855_v19 = vpop.permute.xlu1 %3198  ;;  %v5517_v37 = vpop.eup %5516  ;;  %5526 = vpow2.f32 %v2680_v45 }
 0x3a7   : > { %3754 = vrot.lane.b32.xlu0 %v5513_v26, %s5709_s27  ;;  %v7878_v61 = vpop.eup %5518  ;;  %5528 = vrcp.f32 %v3425_v16  ;;  %v3486_v34 = vmul.f32 %v5517_v37, %v7825_v10 }
 0x3a8   : > { %v5521_v58 = vpop.eup %5520  ;;  %v3266_v44 = vadd.f32 %v7878_v61, %v7813_v62  ;;  %5530 = vpow2.f32 %v2682_v43  ;;  %v2684_v62 = vmul.f32 1.442695, %v2630_v14  ;;  %v2632_v14 = vsub.f32 %v7096_v36, %v9554_v33  ;;  %v9556_v33 = vld [vmem:[#allocation77_spill] sm:$0xff] }
 0x3a9   : > { %3566 = vperm.xlu1 %5149, %v3484_v60   ;;  %v7864_v53 = vpop.permute.xlu0 %3200  ;;  %v3487_v29 = vmul.f32 %v5521_v58, %v5507_v25  ;;  %v5523_v45 = vpop.eup %5522 }
 0x3aa   : > { %v7866_v15 = vpop.permute.xlu1 %3358  ;;  %v3267_v16 = vadd.f32 %v5523_v45, %v7822_v27  ;;  %v2686_v27 = vmul.f32 1.442695, %v2631_v1 }
 0x3ab   : > { %3571 = vperm.xlu0 %5148, %v3485_v55   ;;  %v3426_v55 = vadd.f32 %v7820_v9, %v3266_v44 }
 0x3ac   : > { %v3427_v10 = vadd.f32 %v7830_v32, %v3267_v16 }
 0x3ad   : > { %4234 = vrot.lane.b32.xlu1 %v5513_v26, %s5710_s29  ;;  %v7873_v21 = vpop.permute.xlu0 %3360  ;;  %5532 = vrcp.f32 %v3426_v55 }
 0x3ae   : > { %v7875_v18 = vpop.permute.xlu1 %3202  ;;  %5534 = vpow2.f32 %v2684_v62  ;;  %v2688_v62 = vmul.f32 1.442695, %v2632_v14  ;;  %v2634_v14 = vsub.f32 %v7118_v41, %v9556_v33 }
 0x3af   : > { %4236 = vrot.lane.b32.xlu0 %v5517_v37, %s5710_s29  ;;  %5536 = vrcp.f32 %v3427_v10  ;;  %v9555_v10 = vld [vmem:[#allocation76_spill] sm:$0xff] }
 0x3b0   : > { %5538 = vpow2.f32 %v2686_v27  ;;  %v2633_v3 = vsub.f32 %v7107_v8, %v9555_v10  ;;  %v2635_v10 = vsub.f32 %v7129_v11, %v7368_v51 }
 0x3b1   : > { %3756 = vrot.lane.b32.xlu1 %v5517_v37, %s5709_s27  ;;  %v7885_v26 = vpop.permute.xlu0 %3204 }
 0x3b2   : > { %v7881_v60 = vpop.permute.xlu1 %3362  ;;  %v5525_v9 = vpop.eup %5524 }
 0x3b3   : > { %3758 = vrot.lane.b32.xlu0 %v5521_v58, %s5709_s27  ;;  %v7904_v25 = vpop.eup %5526 }
 0x3b4   : > { %v5529_v48 = vpop.eup %5528  ;;  %v3268_v32 = vadd.f32 %v7904_v25, %v7828_v22 }
 0x3b5   : > { %3576 = vperm.xlu1 %5149, %v3486_v34   ;;  %v7898_v37 = vpop.permute.xlu0 %3364  ;;  %v3489_v55 = vmul.f32 %v5529_v48, %v5515_v49 }
 0x3b6   : > { %v7892_v23 = vpop.permute.xlu1 %3206  ;;  %v3428_v1 = vadd.f32 %v7838_v52, %v3268_v32 }
 0x3b7   : > { %3581 = vperm.xlu0 %5148, %v3487_v29   ;;  %v5531_v29 = vpop.eup %5530 }
 0x3b8   : > { %v3269_v16 = vadd.f32 %v5531_v29, %v7840_v54  ;;  %5540 = vrcp.f32 %v3428_v1  ;;  %v2690_v54 = vmul.f32 1.442695, %v2633_v3 }
 0x3b9   : > { %4238 = vrot.lane.b32.xlu1 %v5521_v58, %s5710_s29  ;;  %v7911_v34 = vpop.permute.xlu0 %3208  ;;  %v3488_v58 = vmul.f32 %v5525_v9, %v7850_v63  ;;  %5542 = vpow2.f32 %v2688_v62  ;;  %v2692_v62 = vmul.f32 1.442695, %v2634_v14 }
 0x3ba   : > { %v7901_v43 = vpop.permute.xlu1 %3366  ;;  %v3429_v63 = vadd.f32 %v7847_v4, %v3269_v16  ;;  %v5533_v52 = vpop.eup %5532 }
 0x3bb   : > { %4240 = vrot.lane.b32.xlu0 %v5525_v9, %s5710_s29  ;;  %v7928_v49 = vpop.eup %5534 }
 0x3bc   : > { %5544 = vrcp.f32 %v3429_v63  ;;  %v5537_v27 = vpop.eup %5536  ;;  %v3270_v4 = vadd.f32 %v7928_v49, %v7845_v0 }
 0x3bd   : > { %3760 = vrot.lane.b32.xlu1 %v5525_v9, %s5709_s27  ;;  %v7924_v9 = vpop.permute.xlu0 %3368  ;;  %5546 = vpow2.f32 %v2690_v54  ;;  %v3491_v1 = vmul.f32 %v5537_v27, %v5523_v45 }
 0x3be   : > { %v7907_v44 = vpop.permute.xlu1 %3210  ;;  %v3430_v3 = vadd.f32 %v7853_v20, %v3270_v4  ;;  %v2636_v4 = vsub.f32 %v7140_v12, %v7376_v17 }
 0x3bf   : > { %3762 = vrot.lane.b32.xlu0 %v5529_v48, %s5709_s27 }
 0x3c0   : > { %5548 = vrcp.f32 %v3430_v3 }
 0x3c1   : > { %3586 = vperm.xlu1 %5149, %v3488_v58   ;;  %5550 = vpow2.f32 %v2692_v62  ;;  %v9557_v62 = vld [vmem:[#allocation78_spill] sm:$0xff] }
 0x3c2   : > { %v7919_v22 = vpop.permute.xlu1 %3370  ;;  %v7935_v58 = vpop.permute.xlu0 %3212 }
 0x3c3   : > { %3591 = vperm.xlu0 %5148, %v3489_v55   ;;  %v5539_v55 = vpop.eup %5538 }
 0x3c4   : > { %v3271_v16 = vadd.f32 %v5539_v55, %v7855_v19  ;;  %v2694_v19 = vmul.f32 1.442695, %v2635_v10 }
 0x3c5   : > { %4242 = vrot.lane.b32.xlu1 %v5529_v48, %s5710_s29  ;;  %v3490_v48 = vmul.f32 %v5533_v52, %v7878_v61  ;;  %v5541_v20 = vpop.eup %5540 }
 0x3c6   : > { %v3431_v61 = vadd.f32 %v7866_v15, %v3271_v16  ;;  %v7948_v63 = vpop.permute.xlu0 %3372  ;;  %v7952_v45 = vpop.eup %5542  ;;  %v2696_v16 = vmul.f32 1.442695, %v2636_v4 }
 0x3c7   : > { %4244 = vrot.lane.b32.xlu0 %v5533_v52, %s5710_s29  ;;  %v7931_v32 = vpop.permute.xlu1 %3214  ;;  %v3272_v15 = vadd.f32 %v7952_v45, %v7864_v53 }
 0x3c8   : > { %5552 = vrcp.f32 %v3431_v61 }
 0x3c9   : > { %3764 = vrot.lane.b32.xlu1 %v5533_v52, %s5709_s27  ;;  %v5545_v51 = vpop.eup %5544  ;;  %5554 = vpow2.f32 %v2694_v19 }
 0x3ca   : > { %v3493_v14 = vmul.f32 %v5545_v51, %v5531_v29  ;;  %v5547_v3 = vpop.eup %5546 }
 0x3cb   : > { %3766 = vrot.lane.b32.xlu0 %v5537_v27, %s5709_s27  ;;  %v7943_v0 = vpop.permute.xlu1 %3374 }
 0x3cc   : > { %v7954_v52 = vpop.permute.xlu0 %4208 }
 0x3cd   : > { %3596 = vperm.xlu1 %5149, %v3490_v48   ;;  %v3432_v48 = vadd.f32 %v7873_v21, %v3272_v15  ;;  %v5549_v10 = vpop.eup %5548 }
 0x3cf   : > { %3601 = vperm.xlu0 %5148, %v3491_v1   ;;  %v7957_v54 = vpop.permute.xlu1 %3728  ;;  %v3273_v1 = vadd.f32 %v5547_v3, %v7875_v18  ;;  %5556 = vrcp.f32 %v3432_v48  ;;  %v5551_v18 = vpop.eup %5550 }
 0x3d0   : > { %5558 = vpow2.f32 %v2696_v16 }
 0x3d1   : > { %4246 = vrot.lane.b32.xlu1 %v5537_v27, %s5710_s29  ;;  %v3492_v27 = vmul.f32 %v5541_v20, %v7904_v25  ;;  %v2637_v25 = vsub.f32 %v7151_v28, %v9557_v62  ;;  %v3433_v17 = vadd.f32 %v7881_v60, %v3273_v1  ;;  %v3274_v60 = vadd.f32 %v5551_v18, %v7885_v26  ;;  %v9558_v62 = vld [vmem:[#allocation79_spill] sm:$0xff] }
 0x3d3   : > { %4248 = vrot.lane.b32.xlu0 %v5541_v20, %s5710_s29  ;;  %v7969_v53 = vpop.permute.xlu1 %4210  ;;  %v2698_v61 = vmul.f32 1.442695, %v2637_v25  ;;  %5560 = vrcp.f32 %v3433_v17  ;;  %v2638_v25 = vsub.f32 %v7179_v5, %v9558_v62 }
 0x3d5   : > { %3768 = vrot.lane.b32.xlu1 %v5541_v20, %s5709_s27  ;;  %v5553_v19 = vpop.eup %5552  ;;  %5562 = vpow2.f32 %v2698_v61 }
 0x3d6   : > { %v3495_v48 = vmul.f32 %v5553_v19, %v5539_v55 }
 0x3d7   : > { %3770 = vrot.lane.b32.xlu0 %v5545_v51, %s5709_s27 }
 0x3d9   : > { %3606 = vperm.xlu1 %5149, %v3492_v27   ;;  %v7966_v33 = vpop.permute.xlu0 %3506  ;;  %v3434_v27 = vadd.f32 %v7898_v37, %v3274_v60 }
 0x3db   : > { %3611 = vperm.xlu0 %5148, %v3493_v14   ;;  %v5555_v14 = vpop.eup %5554  ;;  %5564 = vrcp.f32 %v3434_v27 }
 0x3dc   : > { %v3275_v1 = vadd.f32 %v5555_v14, %v7892_v23 }
 0x3dd   : > { %4250 = vrot.lane.b32.xlu1 %v5545_v51, %s5710_s29  ;;  %v7975_v21 = vpop.permute.xlu0 %3730  ;;  %v3494_v51 = vmul.f32 %v5549_v10, %v7928_v49  ;;  %v5557_v49 = vpop.eup %5556 }
 0x3de   : > { %v3435_v26 = vadd.f32 %v7901_v43, %v3275_v1  ;;  %v5559_v17 = vpop.eup %5558  ;;  %v9559_v1 = vld [vmem:[#allocation80_spill] sm:$0xff] }
 0x3df   : > { %4252 = vrot.lane.b32.xlu0 %v5549_v10, %s5710_s29  ;;  %v3276_v43 = vadd.f32 %v5559_v17, %v7911_v34 }
 0x3e0   : > { %v7978_v29 = vpop.permute.xlu1 %3511  ;;  %5566 = vrcp.f32 %v3435_v26  ;;  %v5561_v23 = vpop.eup %5560  ;;  %v2639_v26 = vsub.f32 %v7186_v24, %v9559_v1 }
 0x3e1   : > { %3772 = vrot.lane.b32.xlu1 %v5549_v10, %s5709_s27  ;;  %v7981_v20 = vpop.permute.xlu0 %4212  ;;  %v2700_v10 = vmul.f32 1.442695, %v2638_v25  ;;  %v3497_v27 = vmul.f32 %v5561_v23, %v5547_v3 }
 0x3e3   : > { %3774 = vrot.lane.b32.xlu0 %v5553_v19, %s5709_s27  ;;  %5568 = vpow2.f32 %v2700_v10 }
 0x3e4   : > { %v7986_v15 = vpop.permute.xlu1 %3732 }
 0x3e5   : > { %3616 = vperm.xlu1 %5149, %v3494_v51   ;;  %v7989_v4 = vpop.permute.xlu0 %3734  ;;  %v3436_v51 = vadd.f32 %v7924_v9, %v3276_v43 }
 0x3e7   : > { %3621 = vperm.xlu0 %5148, %v3495_v48   ;;  %v5563_v48 = vpop.eup %5562  ;;  %5570 = vrcp.f32 %v3436_v51 }
 0x3e8   : > { %v7992_v16 = vpop.permute.xlu1 %3516  ;;  %v3277_v25 = vadd.f32 %v5563_v48, %v7907_v44  ;;  %v5565_v9 = vpop.eup %5564 }
 0x3e9   : > { %4254 = vrot.lane.b32.xlu1 %v5553_v19, %s5710_s29  ;;  %v3496_v19 = vmul.f32 %v5557_v49, %v7952_v45 }
 0x3ea   : > { %v7998_v37 = vpop.permute.xlu0 %3521  ;;  %v3437_v45 = vadd.f32 %v7919_v22, %v3277_v25  ;;  %v3498_v22 = vmul.f32 %v5565_v9, %v5551_v18 }
 0x3eb   : > { %4256 = vrot.lane.b32.xlu0 %v5557_v49, %s5710_s29 }
 0x3ec   : > { %v8001_v55 = vpop.permute.xlu1 %4214  ;;  %5572 = vrcp.f32 %v3437_v45 }
 0x3ed   : > { %3776 = vrot.lane.b32.xlu1 %v5557_v49, %s5709_s27  ;;  %v2702_v49 = vmul.f32 1.442695, %v2639_v26  ;;  %v5567_v44 = vpop.eup %5566 }
 0x3ee   : > { %v8004_v61 = vpop.permute.xlu0 %4216 }
 0x3ef   : > { %3778 = vrot.lane.b32.xlu0 %v5561_v23, %s5709_s27  ;;  %5574 = vpow2.f32 %v2702_v49 }
 0x3f0   : > { %v8009_v60 = vpop.permute.xlu1 %3736 }
 0x3f1   : > { %3626 = vperm.xlu1 %5149, %v3496_v19  }
 0x3f2   : > { %v8014_v62 = vpop.permute.xlu0 %3738 }
 0x3f3   : > { %3631 = vperm.xlu0 %5148, %v3497_v27   ;;  %v5569_v27 = vpop.eup %5568 }
 0x3f4   : > { %v8017_v34 = vpop.permute.xlu1 %3526  ;;  %v3278_v1 = vadd.f32 %v5569_v27, %v7935_v58  ;;  %v5571_v25 = vpop.eup %5570 }
 0x3f5   : > { %4258 = vrot.lane.b32.xlu1 %v5561_v23, %s5710_s29  ;;  %v3499_v23 = vmul.f32 %v5567_v44, %v5555_v14  ;;  %v9233_v14 = vmov 66  }
 0x3f6   : > { %v8021_v3 = vpop.permute.xlu0 %3531  ;;  %v3438_v45 = vadd.f32 %v7948_v63, %v3278_v1  ;;  %v9560_v1 = vld [vmem:[#allocation82_spill] sm:$0xff] }
 0x3f7   : > { %4260 = vrot.lane.b32.xlu0 %v5565_v9, %s5710_s29  ;;  %v4304_v5 = vmul.f32 %v9560_v1, %v7954_v52  ;;  %v9564_v1 = vmov 66  }
 0x3f8   : > { %v8024_v10 = vpop.permute.xlu1 %4218  ;;  %5576 = vrcp.f32 %v3438_v45 }
 0x3f9   : > { %3780 = vrot.lane.b32.xlu1 %v5565_v9, %s5709_s27  ;;  %v5573_v9 = vpop.eup %5572 }
 0x3fa   : > { %v8027_v43 = vpop.permute.xlu0 %4220 }
 0x3fb   : > { %3782 = vrot.lane.b32.xlu0 %v5567_v44, %s5709_s27 }
 0x3fc   : > { %v8030_v19 = vpop.permute.xlu1 %3740 }
 0x3fd   : > { %3636 = vperm.xlu1 %5149, %v3498_v22   ;;  %v5575_v22 = vpop.eup %5574 }
 0x3fe   : > { %v8032_v51 = vpop.permute.xlu0 %3742  ;;  %v3279_v63 = vadd.f32 %v5575_v22, %v7931_v32  ;;  %v3501_v32 = vmul.f32 %v5573_v9, %v5563_v48  ;;  %v9563_v48 = vld [vmem:[#allocation83_spill] sm:$0xff] }
 0x3ff   : > { %3641 = vperm.xlu0 %5148, %v3499_v23  }
 0x400   : > { %v8035_v26 = vpop.permute.xlu1 %3536 }
 0x401   : > { %4262 = vrot.lane.b32.xlu1 %v5567_v44, %s5710_s29  ;;  %v3500_v44 = vmul.f32 %v5571_v25, %v5559_v17  ;;  %v9239_v17 = vmov 65  }
 0x402   : > { %v8039_v49 = vpop.permute.xlu0 %3541 }
 0x403   : > { %4264 = vrot.lane.b32.xlu0 %v5571_v25, %s5710_s29 }
 0x404   : > { %v8042_v18 = vpop.permute.xlu1 %4222  ;;  %5151 = vset.pattern.permute.xlu0 %v9233_v14  ;;  %v3439_v14 = vadd.f32 %v7943_v0, %v3279_v63 }
 0x405   : > { %3784 = vrot.lane.b32.xlu1 %v5571_v25, %s5709_s27  ;;  %v9561_v25 = vld [vmem:[#allocation81_spill] sm:$0xff]  ;;  %v5577_v63 = vpop.eup %5576 }
 0x406   : > { %v8046_v58 = vpop.permute.xlu0 %4224  ;;  %5578 = vrcp.f32 %v3439_v14  ;;  %v3824_v52 = vmul.f32 %v9561_v25, %v7957_v54  ;;  %v3825_v54 = vmul.f32 %v9563_v48, %v7975_v21  ;;  %v3502_v8 = vmul.f32 %v5577_v63, %v5569_v27 }
 0x407   : > { %3786 = vrot.lane.b32.xlu0 %v5573_v9, %s5709_s27  ;;  %v3826_v27 = vmul.f32 %v7433_v35, %v7986_v15  ;;  %v9570_v15 = vld [vmem:[#allocation91_spill] sm:$0xff] }
 0x408   : > { %v8050_v23 = vpop.permute.xlu1 %3744 }
 0x409   : > { %3646 = vperm.xlu1 %5149, %v3500_v44   ;;  %v9562_v44 = vmov 64  }
 0x40a   : > { %v8055_v24 = vpop.permute.xlu0 %3746 }
 0x40b   : > { %4338 = vperm.xlu0 %5151, %v4304_v5  }
 0x40c   : > { %v8057_v45 = vpop.permute.xlu1 %3546 }
 0x40d   : > { %4266 = vrot.lane.b32.xlu1 %v5573_v9, %s5710_s29 }
 0x40e   : > { %v8060_v28 = vpop.permute.xlu0 %3551  ;;  %5150 = vset.pattern.permute.xlu1 %v9239_v17 }
 0x40f   : > { %5152 = vset.pattern.permute.xlu0 %v9562_v44 }
 0x410   : > { %3651 = vperm.xlu0 %5152, %v3501_v32   ;;  %v8066_v0 = vpop.permute.xlu1 %4226  ;;  %v9565_v32 = vld [vmem:[#allocation84_spill] sm:$0xff] }
 0x411   : > { %3858 = vperm.xlu1 %5150, %v3824_v52   ;;  %v4305_v25 = vmul.f32 %v9565_v32, %v7969_v53  ;;  %v4307_v32 = vmul.f32 %v7453_v39, %v8001_v55  ;;  %v9569_v39 = vld [vmem:[#allocation85_spill] sm:$0xff] }
 0x412   : > { %v8068_v5 = vpop.permute.xlu0 %4228  ;;  %v4306_v55 = vmul.f32 %v9569_v39, %v7981_v20 }
 0x413   : > { %v5579_v12 = vpop.eup %5578 }
 0x414   : > { %4268 = vrot.lane.b32.xlu0 %v5577_v63, %s5710_s29  ;;  %v8071_v14 = vpop.permute.xlu1 %3748  ;;  %v3503_v53 = vmul.f32 %v5579_v12, %v5575_v22  ;;  %v9568_v22 = vld [vmem:[#allocation87_spill] sm:$0xff] }
 0x415   : > { %3788 = vrot.lane.b32.xlu1 %v5577_v63, %s5709_s27  ;;  %5153 = vset.pattern.permute.xlu0 %v9239_v17  ;;  %v3828_v63 = vmul.f32 %v9568_v22, %v8009_v60  ;;  %v9571_v60 = vld [vmem:[#allocation86_spill] sm:$0xff] }
 0x416   : > { %v8077_v9 = vpop.permute.xlu0 %3750  ;;  %5154 = vset.pattern.permute.xlu1 %v9564_v1 }
 0x418   : > { %3863 = vperm.xlu0 %5153, %v3825_v54   ;;  %v8082_v52 = vpop.permute.xlu1 %3556 }
 0x419   : > { %4343 = vperm.xlu1 %5154, %v4305_v25   ;;  %v9566_v25 = vmov 65  }
 0x41a   : > { %v8084_v11 = vpop.permute.xlu0 %3561 }
 0x41c   : > { %3790 = vrot.lane.b32.xlu0 %v5579_v12, %s5709_s27  ;;  %v8087_v17 = vpop.permute.xlu1 %4230 }
 0x41d   : > { %5155 = vset.pattern.permute.xlu1 %v9562_v44  ;;  %5158 = vset.pattern.permute.xlu0 %v9562_v44 }
 0x41e   : > { %v8091_v21 = vpop.permute.xlu0 %4232  ;;  %3656 = vperm.xlu1 %5155, %v3502_v8  }
 0x420   : > { %3661 = vperm.xlu0 %5158, %v3503_v53   ;;  %v8093_v48 = vpop.permute.xlu1 %3752 }
 0x422   : > { %v8095_v54 = vpop.permute.xlu0 %3754  ;;  %4270 = vrot.lane.b32.xlu1 %v5579_v12, %s5710_s29 }
 0x423   : > { %5156 = vset.pattern.permute.xlu1 %v9566_v25 }
 0x424   : > { %5160 = vset.pattern.permute.xlu0 %v9564_v1  ;;  %v8104_v44 = vpop.permute.xlu1 %3566 }
 0x425   : > { %4353 = vperm.xlu0 %5160, %v4307_v32   ;;  %v4309_v32 = vmul.f32 %v9570_v15, %v8024_v10  ;;  %v9574_v10 = vld [vmem:[#allocation88_spill] sm:$0xff] }
 0x426   : > { %v8106_v8 = vpop.permute.xlu0 %3571  ;;  %3868 = vperm.xlu1 %5156, %v3826_v27   ;;  %v3827_v27 = vmul.f32 %v9571_v60, %v7989_v4  ;;  %v4308_v15 = vmul.f32 %v9574_v10, %v8004_v61  ;;  %v9575_v60 = vld [vmem:[#allocation95_spill] sm:$0xff] }
 0x427   : > { %9567 = vst [vmem:[#allocation67_spill] sm:$0xff] %v8106_v8 }
 0x428   : > { %v8110_v12 = vpop.permute.xlu1 %4234 }
 0x429   : > { %5161 = vset.pattern.permute.xlu0 %v9566_v25 }
 0x42a   : > { %v8115_v53 = vpop.permute.xlu0 %4236  ;;  %5157 = vset.pattern.permute.xlu1 %v9564_v1  ;;  %3878 = vperm.xlu0 %5161, %v3828_v63   ;;  %v9572_v63 = vld [vmem:[#allocation90_spill] sm:$0xff] }
 0x42b   : > { %4348 = vperm.xlu1 %5157, %v4306_v55   ;;  %v3830_v39 = vmul.f32 %v9572_v63, %v8030_v19  ;;  %v9576_v19 = vld [vmem:[#allocation89_spill] sm:$0xff] }
 0x42c   : > { %v8118_v35 = vpop.permute.xlu1 %3756  ;;  %v3829_v63 = vmul.f32 %v9576_v19, %v8014_v62  ;;  %v9581_v19 = vld [vmem:[#allocation99_spill] sm:$0xff] }
 0x42e   : > { %v8124_v22 = vpop.permute.xlu0 %3758  ;;  %5164 = vset.pattern.permute.xlu0 %v9564_v1 }
 0x42f   : > { %5159 = vset.pattern.permute.xlu1 %v9566_v25  ;;  %4363 = vperm.xlu0 %5164, %v4309_v32  }
 0x430   : > { %3873 = vperm.xlu1 %5159, %v3827_v27   ;;  %v8128_v20 = vpop.permute.xlu1 %3576  ;;  %v4311_v27 = vmul.f32 %v9575_v60, %v8042_v18  ;;  %v9579_v18 = vld [vmem:[#allocation92_spill] sm:$0xff] }
 0x431   : > { %v4310_v60 = vmul.f32 %v9579_v18, %v8027_v43 }
 0x432   : > { %v8132_v55 = vpop.permute.xlu0 %3581 }
 0x433   : > { %9573 = vst [vmem:[#allocation68_spill] sm:$0xff] %v8132_v55  ;;  %5165 = vset.pattern.permute.xlu0 %v9566_v25  ;;  %v9651_v55 = vld [vmem:[#allocation60_spill] sm:$0xff] }
 0x434   : > { %5162 = vset.pattern.permute.xlu1 %v9564_v1  ;;  %3888 = vperm.xlu0 %5165, %v3830_v39   ;;  %v8138_v4 = vpop.permute.xlu1 %4238  ;;  %v9577_v39 = vld [vmem:[#allocation94_spill] sm:$0xff] }
 0x435   : > { %4358 = vperm.xlu1 %5162, %v4308_v15   ;;  %v3832_v10 = vmul.f32 %v9577_v39, %v8050_v23  ;;  %v9582_v23 = vld [vmem:[#allocation93_spill] sm:$0xff] }
 0x436   : > { %v8140_v32 = vpop.permute.xlu0 %4240  ;;  %v3831_v39 = vmul.f32 %v9582_v23, %v8032_v51  ;;  %v9587_v23 = vld [vmem:[#allocation103_spill] sm:$0xff] }
 0x438   : > { %5168 = vset.pattern.permute.xlu0 %v9564_v1  ;;  %v8147_v41 = vpop.permute.xlu1 %3760 }
 0x439   : > { %5163 = vset.pattern.permute.xlu1 %v9566_v25  ;;  %4373 = vperm.xlu0 %5168, %v4311_v27  }
 0x43a   : > { %v8150_v61 = vpop.permute.xlu0 %3762  ;;  %3883 = vperm.xlu1 %5163, %v3829_v63   ;;  %v4313_v63 = vmul.f32 %v9581_v19, %v8066_v0  ;;  %v9584_v0 = vld [vmem:[#allocation96_spill] sm:$0xff] }
 0x43b   : > { %v4312_v19 = vmul.f32 %v9584_v0, %v8046_v58 }
 0x43c   : > { %v8154_v15 = vpop.permute.xlu1 %3586 }
 0x43d   : > { %9578 = vst [vmem:[#allocation69_spill] sm:$0xff] %v8154_v15  ;;  %5169 = vset.pattern.permute.xlu0 %v9566_v25 }
 0x43e   : > { %v8159_v62 = vpop.permute.xlu0 %3591  ;;  %5166 = vset.pattern.permute.xlu1 %v9564_v1  ;;  %3898 = vperm.xlu0 %5169, %v3832_v10   ;;  %v9583_v10 = vld [vmem:[#allocation98_spill] sm:$0xff] }
 0x43f   : > { %9580 = vst [vmem:[#allocation70_spill] sm:$0xff] %v8159_v62  ;;  %4368 = vperm.xlu1 %5166, %v4310_v60   ;;  %v3834_v18 = vmul.f32 %v9583_v10, %v8071_v14  ;;  %v9588_v14 = vld [vmem:[#allocation97_spill] sm:$0xff] }
 0x440   : > { %v8162_v27 = vpop.permute.xlu1 %4242  ;;  %v3833_v10 = vmul.f32 %v9588_v14, %v8055_v24  ;;  %v9592_v14 = vld [vmem:[#allocation107_spill] sm:$0xff] }
 0x442   : > { %v8168_v36 = vpop.permute.xlu0 %4244  ;;  %5172 = vset.pattern.permute.xlu0 %v9564_v1 }
 0x443   : > { %5167 = vset.pattern.permute.xlu1 %v9566_v25  ;;  %4383 = vperm.xlu0 %5172, %v4313_v63  }
 0x444   : > { %3893 = vperm.xlu1 %5167, %v3831_v39   ;;  %v8172_v43 = vpop.permute.xlu1 %3764  ;;  %v4315_v39 = vmul.f32 %v9587_v23, %v8087_v17  ;;  %v9590_v17 = vld [vmem:[#allocation100_spill] sm:$0xff] }
 0x445   : > { %v4314_v23 = vmul.f32 %v9590_v17, %v8068_v5 }
 0x446   : > { %v8176_v60 = vpop.permute.xlu0 %3766 }
 0x447   : > { %5173 = vset.pattern.permute.xlu0 %v9566_v25 }
 0x448   : > { %5170 = vset.pattern.permute.xlu1 %v9564_v1  ;;  %3908 = vperm.xlu0 %5173, %v3834_v18   ;;  %v8182_v51 = vpop.permute.xlu1 %3596  ;;  %v9589_v18 = vld [vmem:[#allocation102_spill] sm:$0xff] }
 0x449   : > { %9585 = vst [vmem:[#allocation71_spill] sm:$0xff] %v8182_v51  ;;  %4378 = vperm.xlu1 %5170, %v4312_v19   ;;  %v3836_v0 = vmul.f32 %v9589_v18, %v8093_v48  ;;  %v9593_v48 = vld [vmem:[#allocation101_spill] sm:$0xff] }
 0x44a   : > { %v8184_v63 = vpop.permute.xlu0 %3601  ;;  %v3835_v18 = vmul.f32 %v9593_v48, %v8077_v9 }
 0x44b   : > { %9586 = vst [vmem:[#allocation72_spill] sm:$0xff] %v8184_v63 }
 0x44c   : > { %5176 = vset.pattern.permute.xlu0 %v9564_v1  ;;  %v8191_v38 = vpop.permute.xlu1 %4246 }
 0x44d   : > { %5171 = vset.pattern.permute.xlu1 %v9566_v25  ;;  %4393 = vperm.xlu0 %5176, %v4315_v39  }
 0x44e   : > { %v8194_v58 = vpop.permute.xlu0 %4248  ;;  %3903 = vperm.xlu1 %5171, %v3833_v10   ;;  %v4317_v10 = vmul.f32 %v9592_v14, %v8110_v12 }
 0x450   : > { %v8198_v19 = vpop.permute.xlu1 %3768 }
 0x451   : > { %5177 = vset.pattern.permute.xlu0 %v9566_v25 }
 0x452   : > { %v8203_v24 = vpop.permute.xlu0 %3770  ;;  %5174 = vset.pattern.permute.xlu1 %v9564_v1  ;;  %3918 = vperm.xlu0 %5177, %v3836_v0   ;;  %v9595_v0 = vld [vmem:[#allocation106_spill] sm:$0xff] }
 0x453   : > { %4388 = vperm.xlu1 %5174, %v4314_v23   ;;  %v3838_v17 = vmul.f32 %v9595_v0, %v8118_v35 }
 0x454   : > { %v8206_v39 = vpop.permute.xlu1 %3606 }
 0x455   : > { %9591 = vst [vmem:[#allocation73_spill] sm:$0xff] %v8206_v39  ;;  %v9596_v39 = vld [vmem:[#allocation104_spill] sm:$0xff] }
 0x456   : > { %v8212_v63 = vpop.permute.xlu0 %3611  ;;  %5180 = vset.pattern.permute.xlu0 %v9564_v1  ;;  %v4316_v12 = vmul.f32 %v9596_v39, %v8091_v21  ;;  %v9601_v39 = vld [vmem:[#allocation110_spill] sm:$0xff] }
 0x457   : > { %9594 = vst [vmem:[#allocation74_spill] sm:$0xff] %v8212_v63  ;;  %5175 = vset.pattern.permute.xlu1 %v9566_v25  ;;  %4403 = vperm.xlu0 %5180, %v4317_v10   ;;  %v9597_v10 = vld [vmem:[#allocation111_spill] sm:$0xff]  ;;  %v9602_v63 = vld [vmem:[#allocation108_spill] sm:$0xff] }
 0x458   : > { %3913 = vperm.xlu1 %5175, %v3835_v18   ;;  %v4251_v5 = vpop.permute.xlu1 %4250  ;;  %v4319_v48 = vmul.f32 %v9597_v10, %v8138_v4  ;;  %v9598_v18 = vld [vmem:[#allocation105_spill] sm:$0xff]  ;;  %v4318_v4 = vmul.f32 %v9602_v63, %v8115_v53  ;;  %v9606_v63 = vld [vmem:[#allocation114_spill] sm:$0xff] }
 0x459   : > { %v3837_v35 = vmul.f32 %v9598_v18, %v8095_v54 }
 0x45a   : > { %v8218_v23 = vpop.permute.xlu0 %4252 }
 0x45b   : > { %5181 = vset.pattern.permute.xlu0 %v9566_v25 }
 0x45c   : > { %5178 = vset.pattern.permute.xlu1 %v9564_v1  ;;  %3928 = vperm.xlu0 %5181, %v3838_v17   ;;  %v3773_v9 = vpop.permute.xlu1 %3772  ;;  %v3840_v17 = vmul.f32 %v9601_v39, %v8147_v41  ;;  %v3842_v39 = vmul.f32 %v9606_v63, %v8172_v43 }
 0x45d   : > { %4398 = vperm.xlu1 %5178, %v4316_v12  }
 0x45e   : > { %v8224_v14 = vpop.permute.xlu0 %3774 }
 0x460   : > { %5184 = vset.pattern.permute.xlu0 %v9564_v1  ;;  %v8231_v0 = vpop.permute.xlu1 %3616 }
 0x461   : > { %9599 = vst [vmem:[#allocation75_spill] sm:$0xff] %v8231_v0  ;;  %5179 = vset.pattern.permute.xlu1 %v9566_v25  ;;  %4413 = vperm.xlu0 %5184, %v4319_v48   ;;  %v9603_v48 = vld [vmem:[#allocation115_spill] sm:$0xff]  ;;  %v9647_v0 = vld [vmem:[#allocation56_spill] sm:$0xff] }
 0x462   : > { %v8234_v21 = vpop.permute.xlu0 %3621  ;;  %3923 = vperm.xlu1 %5179, %v3837_v35   ;;  %v4321_v18 = vmul.f32 %v9603_v48, %v8162_v27  ;;  %v9604_v35 = vld [vmem:[#allocation109_spill] sm:$0xff]  ;;  %v9608_v27 = vld [vmem:[#allocation112_spill] sm:$0xff] }
 0x463   : > { %9600 = vst [vmem:[#allocation76_spill] sm:$0xff] %v8234_v21  ;;  %v3839_v21 = vmul.f32 %v9604_v35, %v8124_v22  ;;  %v9610_v35 = vld [vmem:[#allocation113_spill] sm:$0xff] }
 0x464   : > { %v4255_v12 = vpop.permute.xlu1 %4254  ;;  %v3841_v43 = vmul.f32 %v9610_v35, %v8150_v61 }
 0x465   : > { %5185 = vset.pattern.permute.xlu0 %v9566_v25 }
 0x466   : > { %v8241_v54 = vpop.permute.xlu0 %4256  ;;  %5182 = vset.pattern.permute.xlu1 %v9564_v1  ;;  %3938 = vperm.xlu0 %5185, %v3840_v17  }
 0x467   : > { %4408 = vperm.xlu1 %5182, %v4318_v4   ;;  %v4320_v4 = vmul.f32 %v9608_v27, %v8140_v32 }
 0x468   : > { %v3777_v10 = vpop.permute.xlu1 %3776 }
 0x46a   : > { %v8248_v41 = vpop.permute.xlu0 %3778  ;;  %5188 = vset.pattern.permute.xlu0 %v9564_v1 }
 0x46b   : > { %5183 = vset.pattern.permute.xlu1 %v9566_v25  ;;  %4423 = vperm.xlu0 %5188, %v4321_v18  }
 0x46c   : > { %3933 = vperm.xlu1 %5183, %v3839_v21   ;;  %v8252_v53 = vpop.permute.xlu1 %3626  ;;  %v9609_v21 = vld [vmem:[#allocation119_spill] sm:$0xff] }
 0x46d   : > { %9605 = vst [vmem:[#allocation77_spill] sm:$0xff] %v8252_v53  ;;  %v4323_v18 = vmul.f32 %v9609_v21, %v8191_v38 }
 0x46e   : > { %v8256_v17 = vpop.permute.xlu0 %3631 }
 0x46f   : > { %9607 = vst [vmem:[#allocation78_spill] sm:$0xff] %v8256_v17  ;;  %5189 = vset.pattern.permute.xlu0 %v9566_v25  ;;  %v9613_v17 = vld [vmem:[#allocation116_spill] sm:$0xff] }
 0x470   : > { %5186 = vset.pattern.permute.xlu1 %v9564_v1  ;;  %3948 = vperm.xlu0 %5189, %v3842_v39   ;;  %v4259_v22 = vpop.permute.xlu1 %4258  ;;  %v9611_v39 = vld [vmem:[#allocation118_spill] sm:$0xff]  ;;  %v4322_v38 = vmul.f32 %v9613_v17, %v8168_v36 }
 0x471   : > { %4418 = vperm.xlu1 %5186, %v4320_v4   ;;  %v3844_v27 = vmul.f32 %v9611_v39, %v8198_v19  ;;  %v9617_v17 = vld [vmem:[#allocation122_spill] sm:$0xff] }
 0x472   : > { %v8262_v48 = vpop.permute.xlu0 %4260  ;;  %v3846_v39 = vmul.f32 %v9617_v17, %v3773_v9 }
 0x474   : > { %5192 = vset.pattern.permute.xlu0 %v9564_v1  ;;  %v3781_v63 = vpop.permute.xlu1 %3780 }
 0x475   : > { %5187 = vset.pattern.permute.xlu1 %v9566_v25  ;;  %4433 = vperm.xlu0 %5192, %v4323_v18   ;;  %v9615_v18 = vld [vmem:[#allocation123_spill] sm:$0xff] }
 0x476   : > { %v8270_v32 = vpop.permute.xlu0 %3782  ;;  %3943 = vperm.xlu1 %5187, %v3841_v43   ;;  %v4325_v35 = vmul.f32 %v9615_v18, %v4251_v5  ;;  %v9616_v43 = vld [vmem:[#allocation117_spill] sm:$0xff] }
 0x477   : > { %v3843_v53 = vmul.f32 %v9616_v43, %v8176_v60  ;;  %v9620_v18 = vld [vmem:[#allocation121_spill] sm:$0xff]  ;;  %v3848_v43 = vmul.f32 %v7653_v2, %v3777_v10 }
 0x478   : > { %v8274_v4 = vpop.permute.xlu1 %3636  ;;  %v3845_v9 = vmul.f32 %v9620_v18, %v8203_v24 }
 0x479   : > { %9612 = vst [vmem:[#allocation79_spill] sm:$0xff] %v8274_v4  ;;  %5193 = vset.pattern.permute.xlu0 %v9566_v25 }
 0x47a   : > { %v8279_v61 = vpop.permute.xlu0 %3641  ;;  %5190 = vset.pattern.permute.xlu1 %v9564_v1  ;;  %3958 = vperm.xlu0 %5193, %v3844_v27   ;;  %v9618_v27 = vld [vmem:[#allocation120_spill] sm:$0xff] }
 0x47b   : > { %9614 = vst [vmem:[#allocation80_spill] sm:$0xff] %v8279_v61  ;;  %4428 = vperm.xlu1 %5190, %v4322_v38   ;;  %v4324_v38 = vmul.f32 %v9618_v27, %v8194_v58  ;;  %v9622_v27 = vld [vmem:[#allocation124_spill] sm:$0xff] }
 0x47c   : > { %v4263_v21 = vpop.permute.xlu1 %4262 }
 0x47e   : > { %v8285_v19 = vpop.permute.xlu0 %4264  ;;  %5196 = vset.pattern.permute.xlu0 %v9564_v1 }
 0x47f   : > { %5191 = vset.pattern.permute.xlu1 %v9566_v25  ;;  %4443 = vperm.xlu0 %5196, %v4325_v35  }
 0x480   : > { %3953 = vperm.xlu1 %5191, %v3843_v53   ;;  %v3785_v36 = vpop.permute.xlu1 %3784  ;;  %v4327_v53 = vmul.f32 %v7655_v13, %v4255_v12  ;;  %v4329_v12 = vmul.f32 %v7679_v31, %v4259_v22 }
 0x482   : > { %v8290_v61 = vpop.permute.xlu0 %3786 }
 0x483   : > { %5197 = vset.pattern.permute.xlu0 %v9566_v25 }
 0x484   : > { %5194 = vset.pattern.permute.xlu1 %v9564_v1  ;;  %3968 = vperm.xlu0 %5197, %v3846_v39   ;;  %v8296_v60 = vpop.permute.xlu1 %3646  ;;  %v4326_v39 = vmul.f32 %v7643_v7, %v8218_v23  ;;  %v9623_v23 = vld [vmem:[#allocation127_spill] sm:$0xff] }
 0x485   : > { %9619 = vst [vmem:[#allocation82_spill] sm:$0xff] %v8296_v60  ;;  %4438 = vperm.xlu1 %5194, %v4324_v38   ;;  %v3847_v38 = vmul.f32 %v9622_v27, %v8224_v14  ;;  %v3850_v10 = vmul.f32 %v9623_v23, %v3781_v63  ;;  %v4331_v14 = vmul.f32 %v7702_v46, %v4263_v21  ;;  %v9628_v46 = vld [vmem:[#allocation128_spill] sm:$0xff] }
 0x486   : > { %v8298_v5 = vpop.permute.xlu0 %4338  ;;  %v3852_v63 = vmul.f32 %v7699_v47, %v3785_v36  ;;  %v4330_v21 = vmul.f32 %v9628_v46, %v8262_v48  ;;  %v5580_v23 = vld [vmem:[%s5812_s19 + $0x18] sm:$0xff]  ;;  %v9629_v47 = vld [vmem:[#allocation129_spill] sm:$0xff] }
 0x487   : > { %v3851_v36 = vmul.f32 %v9629_v47, %v8270_v32  ;;  %v9632_v32 = vld [vmem:[#allocation130_spill] sm:$0xff] }
 0x488   : > { %5200 = vset.pattern.permute.xlu0 %v9564_v1  ;;  %v4267_v35 = vpop.permute.xlu1 %4266  ;;  %v4332_v46 = vmul.f32 %v9632_v32, %v8285_v19 }
 0x489   : > { %5195 = vset.pattern.permute.xlu1 %v9566_v25  ;;  %4453 = vperm.xlu0 %5200, %v4327_v53   ;;  %v9624_v53 = vld [vmem:[#allocation125_spill] sm:$0xff]  ;;  %v4333_v27 = vmul.f32 %v7721_v56, %v4267_v35 }
 0x48a   : > { %3963 = vperm.xlu1 %5195, %v3845_v9   ;;  %v4328_v18 = vmul.f32 %v9624_v53, %v8241_v54  ;;  %v5581_v53 = vld [vmem:[%s5812_s19 + $0x20] sm:$0xff] }
 0x48b   : > { %v8305_v58 = vpop.permute.xlu0 %3651 }
 0x48c   : > { %9621 = vst [vmem:[#allocation81_spill] sm:$0xff] %v8305_v58  ;;  %v8308_v17 = vpop.permute.xlu1 %3858  ;;  %v9639_v58 = vld [vmem:[#allocation37_spill] sm:$0xff] }
 0x48d   : > { %5201 = vset.pattern.permute.xlu0 %v9566_v25 }
 0x48e   : > { %5198 = vset.pattern.permute.xlu1 %v9564_v1  ;;  %3978 = vperm.xlu0 %5201, %v3848_v43   ;;  %v9627_v43 = vld [vmem:[#allocation126_spill] sm:$0xff] }
 0x48f   : > { %v8314_v13 = vpop.permute.xlu0 %4268  ;;  %4448 = vperm.xlu1 %5198, %v4326_v39   ;;  %v3849_v39 = vmul.f32 %v9627_v43, %v8248_v41  ;;  %v9631_v43 = vld [vmem:[#allocation12_spill] sm:$0xff] }
 0x490   : > { %v3789_v24 = vpop.permute.xlu1 %3788 }
 0x491   : > { %v3854_v56 = vmul.f32 %v7723_v59, %v3789_v24 }
 0x492   : > { %5204 = vset.pattern.permute.xlu0 %v9564_v1 }
 0x493   : > { %v8320_v2 = vpop.permute.xlu0 %3863  ;;  %5199 = vset.pattern.permute.xlu1 %v9566_v25  ;;  %4463 = vperm.xlu0 %5204, %v4329_v12  }
 0x494   : > { %3973 = vperm.xlu1 %5199, %v3847_v38   ;;  %v8323_v7 = vpop.permute.xlu1 %4343 }
 0x497   : > { %v3791_v9 = vpop.permute.xlu0 %3790  ;;  %5205 = vset.pattern.permute.xlu0 %v9566_v25 }
 0x498   : > { %5202 = vset.pattern.permute.xlu1 %v9564_v1  ;;  %3988 = vperm.xlu0 %5205, %v3850_v10   ;;  %v4609_v10 = vrot.slane %v5580_v23, 1  ;;  %v9633_v23 = vld [vmem:[#allocation28_spill] sm:$0xff] }
 0x499   : > { %4458 = vperm.xlu1 %5202, %v4328_v18   ;;  %v8330_v31 = vpop.permute.xlu1 %3656  ;;  %v4610_v18 = vrot.slane %v5581_v53, 1  ;;  %v8373_v53 = vadd.f32 %v9631_v43, %v9633_v23 }
 0x49a   : > { %9625 = vst [vmem:[#allocation83_spill] sm:$0xff] %v8330_v31 }
 0x49b   : > { %v8333_v22 = vpop.permute.xlu0 %3661  ;;  %v9246_v19 = vmax.f32 %v8373_v53, 0.0 }
 0x49c   : > { %9626 = vst [vmem:[#allocation84_spill] sm:$0xff] %v8333_v22  ;;  %5208 = vset.pattern.permute.xlu0 %v9564_v1 }
 0x49d   : > { %5203 = vset.pattern.permute.xlu1 %v9566_v25  ;;  %4473 = vperm.xlu0 %5208, %v4331_v14   ;;  %v8339_v54 = vpop.permute.xlu1 %4270  ;;  %v9630_v14 = vld [vmem:[#allocation10_spill] sm:$0xff] }
 0x49e   : > { %3983 = vperm.xlu1 %5203, %v3849_v39   ;;  %v8359_v39 = vadd.f32 %v9631_v43, %v9630_v14 }
 0x4a0   : > { %v8342_v12 = vpop.permute.xlu0 %4353 }
 0x4a1   : > { %5209 = vset.pattern.permute.xlu0 %v9566_v25  ;;  %v3869_v41 = vpop.permute.xlu1 %3868 }
 0x4a2   : > { %5206 = vset.pattern.permute.xlu1 %v9564_v1  ;;  %3998 = vperm.xlu0 %5209, %v3852_v63   ;;  %v8365_v63 = vsel %vm1617_vm2, %v4609_v10, %v4610_v18  ;;  %v9634_v10 = vld [vmem:[#allocation39_spill] sm:$0xff] }
 0x4a3   : > { %4468 = vperm.xlu1 %5206, %v4330_v21   ;;  %v8382_v47 = vadd.f32 %v9631_v43, %v9634_v10  ;;  %v9637_v10 = vld [vmem:[#allocation43_spill] sm:$0xff] }
 0x4a5   : > { %v3879_v38 = vpop.permute.xlu0 %3878  ;;  %v9247_v23 = vmax.f32 %v8382_v47, 0.0 }
 0x4a6   : > { %5212 = vset.pattern.permute.xlu0 %v9564_v1  ;;  %v8354_v48 = vpop.permute.xlu1 %4348 }
 0x4a7   : > { %5207 = vset.pattern.permute.xlu1 %v9566_v25  ;;  %4483 = vperm.xlu0 %5212, %v4333_v27   ;;  %v9245_v27 = vmax.f32 %v8359_v39, 0.0 }
 0x4a8   : > { %3993 = vperm.xlu1 %5207, %v3851_v36   ;;  %v9635_v36 = vld [vmem:[#allocation131_spill] sm:$0xff] }
 0x4a9   : > { %v4016_v59 = vmul.f32 %v8308_v17, %v9245_v27  ;;  %v3853_v14 = vmul.f32 %v9635_v36, %v8290_v61  ;;  %v9636_v17 = vld [vmem:[#allocation9_spill] sm:$0xff]  ;;  %v8400_v61 = vadd.f32 %v9631_v43, %v9637_v10 }
 0x4aa   : > { %v8362_v35 = vpop.permute.xlu0 %4363 }
 0x4ab   : > { %5213 = vset.pattern.permute.xlu0 %v9566_v25  ;;  %v3874_v21 = vpop.permute.xlu1 %3873  ;;  %v9248_v10 = vmax.f32 %v8400_v61, 0.0 }
 0x4ac   : > { %5210 = vset.pattern.permute.xlu1 %v9564_v1  ;;  %4008 = vperm.xlu0 %5213, %v3854_v56   ;;  %v8393_v56 = vadd.f32 %v9631_v43, %v9636_v17 }
 0x4ad   : > { %4478 = vperm.xlu1 %5210, %v4332_v46   ;;  %v4018_v46 = vmul.f32 %v3869_v41, %v9246_v19  ;;  %v8410_v41 = vadd.f32 %v9631_v43, %v9639_v58 }
 0x4ae   : > { %v9250_v22 = vmax.f32 %v8393_v56, 0.0 }
 0x4af   : > { %v3889_v24 = vpop.permute.xlu0 %3888  ;;  %v9249_v19 = vmax.f32 %v8410_v41, 0.0 }
 0x4b0   : > { %4080 = vrot.lane.b32.xlu0 %v4016_v59, %s5706_s28  ;;  %v8387_v32 = vpop.permute.xlu1 %4358  ;;  %v9638_v59 = vld [vmem:[#allocation133_spill] sm:$0xff] }
 0x4b1   : > { %5211 = vset.pattern.permute.xlu1 %v9566_v25  ;;  %5215 = vset.pattern.permute.xlu0 %v9564_v1  ;;  %v3855_v36 = vmul.f32 %v9638_v59, %v3791_v9  ;;  %v5582_v25 = vld [vmem:[%s5812_s19 + $0x28] sm:$0x3]  ;;  %v9640_v9 = vld [vmem:[#allocation47_spill] sm:$0xff] }
 0x4b2   : > { %4003 = vperm.xlu1 %5211, %v3853_v14   ;;  %v4612_v31 = vrot.slane %v5582_v25, 1  ;;  %v4020_v14 = vmul.f32 %v3879_v38, %v9247_v23  ;;  %v8417_v59 = vadd.f32 %v9631_v43, %v9640_v9  ;;  %v9641_v38 = vld [vmem:[#allocation41_spill] sm:$0xff]  ;;  %v4022_v9 = vmul.f32 %v3889_v24, %v9248_v10  ;;  %v9643_v24 = vld [vmem:[#allocation51_spill] sm:$0xff] }
 0x4b4   : > { %v8403_v27 = vpop.permute.xlu0 %4373  ;;  %4084 = vrot.lane.b32.xlu0 %v4018_v46, %s5706_s28  ;;  %v4017_v46 = vmul.f32 %v8320_v2, %v9250_v22  ;;  %v8424_v58 = vsel %vm1617_vm2, %v4610_v18, %v4612_v31  ;;  %v9251_v2 = vmax.f32 %v8417_v59, 0.0  ;;  %v4019_v31 = vmul.f32 %v3874_v21, %v9249_v19  ;;  %v9644_v22 = vld [vmem:[#allocation49_spill] sm:$0xff] }
 0x4b5   : > { %v3884_v17 = vpop.permute.xlu1 %3883 }
 0x4b6   : > { %4013 = vperm.xlu1 %5211, %v3855_v36   ;;  %v8429_v36 = vadd.f32 %v9631_v43, %v9641_v38 }
 0x4b8   : > { %4088 = vrot.lane.b32.xlu0 %v4020_v14, %s5706_s28  ;;  %v9252_v18 = vmax.f32 %v8429_v36, 0.0  ;;  %v9642_v14 = vld [vmem:[#allocation45_spill] sm:$0xff] }
 0x4b9   : > { %v3899_v25 = vpop.permute.xlu0 %3898  ;;  %v8444_v38 = vadd.f32 %v9631_v43, %v9642_v14 }
 0x4ba   : > { %4082 = vrot.lane.b32.xlu1 %v4017_v46, %s5706_s28  ;;  %v8434_v23 = vpop.permute.xlu1 %4368  ;;  %v8448_v46 = vadd.f32 %v9631_v43, %v9643_v24 }
 0x4bb   : > { %5214 = vset.pattern.permute.xlu1 %v9564_v1  ;;  %v4024_v1 = vmul.f32 %v3899_v25, %v9251_v2  ;;  %v9253_v14 = vmax.f32 %v8444_v38, 0.0  ;;  %v8463_v25 = vadd.f32 %v9631_v43, %v9644_v22 }
 0x4bc   : > { %4092 = vrot.lane.b32.xlu0 %v4022_v9, %s5706_s28  ;;  %v4021_v9 = vmul.f32 %v3884_v17, %v9252_v18  ;;  %v9254_v19 = vmax.f32 %v8448_v46, 0.0 }
 0x4be   : > { %v8452_v10 = vpop.permute.xlu0 %4383  ;;  %4086 = vrot.lane.b32.xlu1 %v4019_v31, %s5706_s28 }
 0x4bf   : > { %v3894_v21 = vpop.permute.xlu1 %3893 }
 0x4c0   : > { %4096 = vrot.lane.b32.xlu0 %v4024_v1, %s5706_s28  ;;  %v4023_v31 = vmul.f32 %v3894_v21, %v9253_v14  ;;  %v9255_v1 = vmax.f32 %v8463_v25, 0.0 }
 0x4c2   : > { %4090 = vrot.lane.b32.xlu1 %v4021_v9, %s5706_s28  ;;  %v9645_v9 = vld [vmem:[#allocation53_spill] sm:$0xff] }
 0x4c3   : > { %v3909_v24 = vpop.permute.xlu0 %3908  ;;  %v8476_v18 = vadd.f32 %v9631_v43, %v9645_v9 }
 0x4c4   : > { %v4026_v2 = vmul.f32 %v3909_v24, %v9254_v19  ;;  %v8469_v17 = vpop.permute.xlu1 %4378 }
 0x4c5   : > { %v9256_v24 = vmax.f32 %v8476_v18, 0.0 }
 0x4c6   : > { %4100 = vrot.lane.b32.xlu0 %v4026_v2, %s5706_s28  ;;  %4094 = vrot.lane.b32.xlu1 %v4023_v31, %s5706_s28  ;;  %v9646_v2 = vld [vmem:[#allocation52_spill] sm:$0xff] }
 0x4c7   : > { %v8486_v31 = vadd.f32 %v9631_v43, %v9646_v2 }
 0x4c8   : > { %v8478_v22 = vpop.permute.xlu0 %4393 }
 0x4c9   : > { %v3904_v60 = vpop.permute.xlu1 %3903  ;;  %v9258_v4 = vmax.f32 %v8486_v31, 0.0 }
 0x4ca   : > { %v4025_v21 = vmul.f32 %v3904_v60, %v9255_v1  ;;  %v8496_v60 = vadd.f32 %v9631_v43, %v9647_v0 }
 0x4cc   : > { %4098 = vrot.lane.b32.xlu1 %v4025_v21, %s5706_s28  ;;  %v9259_v62 = vmax.f32 %v8496_v60, 0.0 }
 0x4cd   : > { %v3919_v14 = vpop.permute.xlu0 %3918 }
 0x4ce   : > { %v4028_v19 = vmul.f32 %v3919_v14, %v9256_v24  ;;  %v8490_v9 = vpop.permute.xlu1 %4388  ;;  %v9649_v24 = vld [vmem:[#allocation54_spill] sm:$0xff] }
 0x4d0   : > { %4104 = vrot.lane.b32.xlu0 %v4028_v19, %s5706_s28  ;;  %v8506_v19 = vadd.f32 %v9631_v43, %v9649_v24 }
 0x4d2   : > { %v8498_v1 = vpop.permute.xlu0 %4403  ;;  %9650 = vst [vmem:[#allocation85_spill] sm:$0xff] %v8506_v19  ;;  %v9261_v51 = vmax.f32 %v8506_v19, 0.0 }
 0x4d3   : > { %9648 = vst [vmem:[#allocation87_spill] sm:$0xff] %v8498_v1  ;;  %v3914_v21 = vpop.permute.xlu1 %3913 }
 0x4d4   : > { %v4027_v2 = vmul.f32 %v3914_v21, %v9258_v4  ;;  %v8516_v21 = vadd.f32 %v9631_v43, %v9651_v55 }
 0x4d6   : > { %4102 = vrot.lane.b32.xlu1 %v4027_v2, %s5706_s28  ;;  %9652 = vst [vmem:[#allocation91_spill] sm:$0xff] %v8516_v21  ;;  %v9262_v15 = vmax.f32 %v8516_v21, 0.0 }
 0x4d7   : > { %v3929_v14 = vpop.permute.xlu0 %3928 }
 0x4d8   : > { %v4030_v6 = vmul.f32 %v3929_v14, %v9259_v62  ;;  %v8510_v0 = vpop.permute.xlu1 %4398  ;;  %v9654_v62 = vld [vmem:[#allocation58_spill] sm:$0xff] }
 0x4da   : > { %4108 = vrot.lane.b32.xlu0 %v4030_v6, %s5706_s28  ;;  %v8526_v6 = vadd.f32 %v9631_v43, %v9654_v62 }
 0x4dc   : > { %v8518_v4 = vpop.permute.xlu0 %4413  ;;  %9655 = vst [vmem:[#allocation90_spill] sm:$0xff] %v8526_v6 }
 0x4dd   : > { %9653 = vst [vmem:[#allocation86_spill] sm:$0xff] %v8518_v4  ;;  %v3924_v2 = vpop.permute.xlu1 %3923  ;;  %v9265_v4 = vmax.f32 %v8526_v6, 0.0  ;;  %v9663_v6 = vld [vmem:[#allocation16_spill] sm:$0xff] }
 0x4de   : > { %v4029_v24 = vmul.f32 %v3924_v2, %v9261_v51  ;;  %v8536_v2 = vadd.f32 %v9631_v43, %v9657_v42 }
 0x4e0   : > { %4106 = vrot.lane.b32.xlu1 %v4029_v24, %s5706_s28  ;;  %9658 = vst [vmem:[#allocation95_spill] sm:$0xff] %v8536_v2  ;;  %v9267_v8 = vmax.f32 %v8536_v2, 0.0 }
 0x4e1   : > { %v3939_v14 = vpop.permute.xlu0 %3938 }
 0x4e2   : > { %v4032_v1 = vmul.f32 %v3939_v14, %v9262_v15  ;;  %v8530_v55 = vpop.permute.xlu1 %4408  ;;  %v9660_v15 = vld [vmem:[#allocation62_spill] sm:$0xff] }
 0x4e3   : > { %9656 = vst [vmem:[#allocation88_spill] sm:$0xff] %v8530_v55  ;;  %v9700_v55 = vld [vmem:[#allocation34_spill] sm:$0xff] }
 0x4e4   : > { %4112 = vrot.lane.b32.xlu0 %v4032_v1, %s5706_s28  ;;  %v8546_v1 = vadd.f32 %v9631_v43, %v9660_v15 }
 0x4e6   : > { %v8538_v51 = vpop.permute.xlu0 %4423  ;;  %9661 = vst [vmem:[#allocation94_spill] sm:$0xff] %v8546_v1 }
 0x4e7   : > { %9659 = vst [vmem:[#allocation89_spill] sm:$0xff] %v8538_v51  ;;  %v3934_v24 = vpop.permute.xlu1 %3933  ;;  %v9270_v51 = vmax.f32 %v8546_v1, 0.0  ;;  %v9669_v1 = vld [vmem:[#allocation7_spill] sm:$0xff] }
 0x4e8   : > { %v4031_v62 = vmul.f32 %v3934_v24, %v9265_v4  ;;  %v8556_v24 = vadd.f32 %v9631_v43, %v9663_v6 }
 0x4ea   : > { %4110 = vrot.lane.b32.xlu1 %v4031_v62, %s5706_s28  ;;  %9664 = vst [vmem:[#allocation99_spill] sm:$0xff] %v8556_v24  ;;  %v9271_v19 = vmax.f32 %v8556_v24, 0.0 }
 0x4eb   : > { %v3949_v14 = vpop.permute.xlu0 %3948 }
 0x4ec   : > { %v4034_v21 = vmul.f32 %v3949_v14, %v9267_v8  ;;  %v8550_v42 = vpop.permute.xlu1 %4418  ;;  %v9666_v8 = vld [vmem:[#allocation66_spill] sm:$0xff] }
 0x4ed   : > { %9662 = vst [vmem:[#allocation92_spill] sm:$0xff] %v8550_v42 }
 0x4ee   : > { %4116 = vrot.lane.b32.xlu0 %v4034_v21, %s5706_s28  ;;  %v8566_v21 = vadd.f32 %v9631_v43, %v9666_v8 }
 0x4f0   : > { %v8558_v4 = vpop.permute.xlu0 %4433  ;;  %9667 = vst [vmem:[#allocation98_spill] sm:$0xff] %v8566_v21 }
 0x4f1   : > { %9665 = vst [vmem:[#allocation93_spill] sm:$0xff] %v8558_v4  ;;  %v3944_v62 = vpop.permute.xlu1 %3943  ;;  %v9274_v4 = vmax.f32 %v8566_v21, 0.0  ;;  %v9675_v21 = vld [vmem:[#allocation11_spill] sm:$0xff] }
 0x4f2   : > { %v4033_v15 = vmul.f32 %v3944_v62, %v9270_v51  ;;  %v8576_v62 = vadd.f32 %v9631_v43, %v9669_v1 }
 0x4f4   : > { %4114 = vrot.lane.b32.xlu1 %v4033_v15, %s5706_s28  ;;  %9670 = vst [vmem:[#allocation103_spill] sm:$0xff] %v8576_v62  ;;  %v9275_v42 = vmax.f32 %v8576_v62, 0.0 }
 0x4f5   : > { %v3959_v14 = vpop.permute.xlu0 %3958 }
 0x4f6   : > { %v4036_v2 = vmul.f32 %v3959_v14, %v9271_v19  ;;  %v8570_v6 = vpop.permute.xlu1 %4428  ;;  %v9672_v19 = vld [vmem:[#allocation27_spill] sm:$0xff] }
 0x4f7   : > { %9668 = vst [vmem:[#allocation96_spill] sm:$0xff] %v8570_v6 }
 0x4f8   : > { %4120 = vrot.lane.b32.xlu0 %v4036_v2, %s5706_s28  ;;  %v8586_v2 = vadd.f32 %v9631_v43, %v9672_v19 }
 0x4fa   : > { %v8578_v51 = vpop.permute.xlu0 %4443  ;;  %9673 = vst [vmem:[#allocation102_spill] sm:$0xff] %v8586_v2 }
 0x4fb   : > { %9671 = vst [vmem:[#allocation97_spill] sm:$0xff] %v8578_v51  ;;  %v3954_v15 = vpop.permute.xlu1 %3953  ;;  %v9278_v51 = vmax.f32 %v8586_v2, 0.0  ;;  %v9681_v2 = vld [vmem:[#allocation21_spill] sm:$0xff] }
 0x4fc   : > { %v4035_v8 = vmul.f32 %v3954_v15, %v9274_v4  ;;  %v8596_v15 = vadd.f32 %v9631_v43, %v9675_v21 }
 0x4fe   : > { %4118 = vrot.lane.b32.xlu1 %v4035_v8, %s5706_s28  ;;  %9676 = vst [vmem:[#allocation107_spill] sm:$0xff] %v8596_v15  ;;  %v9279_v6 = vmax.f32 %v8596_v15, 0.0 }
 0x4ff   : > { %v3969_v14 = vpop.permute.xlu0 %3968 }
 0x500   : > { %v4038_v24 = vmul.f32 %v3969_v14, %v9275_v42  ;;  %v8590_v1 = vpop.permute.xlu1 %4438  ;;  %v9678_v42 = vld [vmem:[#allocation5_spill] sm:$0xff] }
 0x501   : > { %9674 = vst [vmem:[#allocation100_spill] sm:$0xff] %v8590_v1 }
 0x502   : > { %4124 = vrot.lane.b32.xlu0 %v4038_v24, %s5706_s28  ;;  %v8606_v24 = vadd.f32 %v9631_v43, %v9678_v42 }
 0x504   : > { %v8598_v4 = vpop.permute.xlu0 %4453  ;;  %9679 = vst [vmem:[#allocation106_spill] sm:$0xff] %v8606_v24 }
 0x505   : > { %9677 = vst [vmem:[#allocation101_spill] sm:$0xff] %v8598_v4  ;;  %v3964_v8 = vpop.permute.xlu1 %3963  ;;  %v9282_v4 = vmax.f32 %v8606_v24, 0.0  ;;  %v9687_v24 = vld [vmem:[#allocation25_spill] sm:$0xff] }
 0x506   : > { %v4037_v19 = vmul.f32 %v3964_v8, %v9278_v51  ;;  %v8616_v8 = vadd.f32 %v9631_v43, %v9681_v2 }
 0x508   : > { %4122 = vrot.lane.b32.xlu1 %v4037_v19, %s5706_s28  ;;  %9682 = vst [vmem:[#allocation111_spill] sm:$0xff] %v8616_v8  ;;  %v9283_v1 = vmax.f32 %v8616_v8, 0.0 }
 0x509   : > { %v3979_v14 = vpop.permute.xlu0 %3978 }
 0x50a   : > { %v4040_v62 = vmul.f32 %v3979_v14, %v9279_v6  ;;  %v8610_v21 = vpop.permute.xlu1 %4448  ;;  %v9684_v6 = vld [vmem:[#allocation18_spill] sm:$0xff] }
 0x50b   : > { %9680 = vst [vmem:[#allocation104_spill] sm:$0xff] %v8610_v21 }
 0x50c   : > { %4128 = vrot.lane.b32.xlu0 %v4040_v62, %s5706_s28  ;;  %v8626_v62 = vadd.f32 %v9631_v43, %v9684_v6 }
 0x50e   : > { %v8618_v51 = vpop.permute.xlu0 %4463  ;;  %9685 = vst [vmem:[#allocation110_spill] sm:$0xff] %v8626_v62 }
 0x50f   : > { %9683 = vst [vmem:[#allocation105_spill] sm:$0xff] %v8618_v51  ;;  %v3974_v19 = vpop.permute.xlu1 %3973  ;;  %v9285_v51 = vmax.f32 %v8626_v62, 0.0 }
 0x510   : > { %v4039_v42 = vmul.f32 %v3974_v19, %v9282_v4  ;;  %v8636_v19 = vadd.f32 %v9631_v43, %v9687_v24 }
 0x512   : > { %4126 = vrot.lane.b32.xlu1 %v4039_v42, %s5706_s28  ;;  %9688 = vst [vmem:[#allocation115_spill] sm:$0xff] %v8636_v19  ;;  %v9288_v21 = vmax.f32 %v8636_v19, 0.0 }
 0x513   : > { %v3989_v14 = vpop.permute.xlu0 %3988 }
 0x514   : > { %v4042_v15 = vmul.f32 %v3989_v14, %v9283_v1  ;;  %v8630_v2 = vpop.permute.xlu1 %4458  ;;  %v9690_v1 = vld [vmem:[#allocation24_spill] sm:$0xff] }
 0x515   : > { %9686 = vst [vmem:[#allocation108_spill] sm:$0xff] %v8630_v2 }
 0x516   : > { %4132 = vrot.lane.b32.xlu0 %v4042_v15, %s5706_s28  ;;  %v8646_v15 = vadd.f32 %v9631_v43, %v9690_v1 }
 0x518   : > { %v8638_v4 = vpop.permute.xlu0 %4473  ;;  %9691 = vst [vmem:[#allocation114_spill] sm:$0xff] %v8646_v15 }
 0x519   : > { %9689 = vst [vmem:[#allocation109_spill] sm:$0xff] %v8638_v4  ;;  %v3984_v42 = vpop.permute.xlu1 %3983  ;;  %v9289_v4 = vmax.f32 %v8646_v15, 0.0  ;;  %v9699_v15 = vld [vmem:[#allocation35_spill] sm:$0xff] }
 0x51a   : > { %v4041_v6 = vmul.f32 %v3984_v42, %v9285_v51  ;;  %v9693_v42 = vld [vmem:[#allocation32_spill] sm:$0xff] }
 0x51b   : > { %v8656_v51 = vadd.f32 %v9631_v43, %v9693_v42 }
 0x51c   : > { %4130 = vrot.lane.b32.xlu1 %v4041_v6, %s5706_s28 }
 0x51d   : > { %v3999_v14 = vpop.permute.xlu0 %3998  ;;  %9694 = vst [vmem:[#allocation119_spill] sm:$0xff] %v8656_v51  ;;  %v9291_v19 = vmax.f32 %v8656_v51, 0.0 }
 0x51e   : > { %v4044_v24 = vmul.f32 %v3999_v14, %v9288_v21  ;;  %v8650_v8 = vpop.permute.xlu1 %4468  ;;  %v9696_v14 = vld [vmem:[#allocation8_spill] sm:$0xff] }
 0x51f   : > { %9692 = vst [vmem:[#allocation112_spill] sm:$0xff] %v8650_v8  ;;  %v2288_v8 = vmax.f32 %v9699_v15, 0.0 }
 0x520   : > { %4136 = vrot.lane.b32.xlu0 %v4044_v24, %s5706_s28  ;;  %v8666_v24 = vadd.f32 %v9631_v43, %v9696_v14 }
 0x521   : > { %v4496_v2 = vmul.f32 %v8298_v5, %v2288_v8  ;;  %v9703_v5 = vmax.f32 %v8373_v53, 0.0 }
 0x522   : > { %v8658_v6 = vpop.permute.xlu0 %4483 }
 0x523   : > { %9695 = vst [vmem:[#allocation113_spill] sm:$0xff] %v8658_v6  ;;  %v3994_v62 = vpop.permute.xlu1 %3993 }
 0x524   : > { %v4043_v1 = vmul.f32 %v3994_v62, %v9289_v4  ;;  %v9698_v62 = vmax.f32 %v8359_v39, 0.0 }
 0x526   : > { %4134 = vrot.lane.b32.xlu1 %v4043_v1, %s5706_s28  ;;  %v3664_v4 = vmul.f32 %v7966_v33, %v9698_v62  ;;  %v5583_v62 = vld [vmem:[%s5812_s19 + $0x30] sm:$0xff] }
 0x527   : > { %v4009_v21 = vpop.permute.xlu0 %4008  ;;  %v4614_v15 = vrot.slane %v5583_v62, 1 }
 0x528   : > { %v4046_v42 = vmul.f32 %v4009_v21, %v9291_v19  ;;  %v8670_v6 = vpop.permute.xlu1 %4478  ;;  %v8682_v21 = vadd.f32 %v9631_v43, %v9700_v55  ;;  %v9702_v19 = vld [vmem:[#allocation134_spill] sm:$0xff]  ;;  %v3666_v43 = vmul.f32 %v7992_v16, %v9703_v5  ;;  %v9704_v55 = vld [vmem:[#allocation36_spill] sm:$0xff] }
 0x529   : > { %9697 = vst [vmem:[#allocation118_spill] sm:$0xff] %v8670_v6  ;;  %v4335_v51 = vmul.f32 %v9702_v19, %v8339_v54  ;;  %v2290_v8 = vmax.f32 %v9704_v55, 0.0  ;;  %v9705_v54 = vmax.f32 %v8666_v24, 0.0 }
 0x52a   : > { %4140 = vrot.lane.b32.xlu0 %v4046_v42, %s5706_s28  ;;  %9701 = vst [vmem:[#allocation116_spill] sm:$0xff] %v8682_v21  ;;  %v8690_v42 = vld [vmem:[%s5812_s19 + $0x38] sm:$0xff] }
 0x52b   : > { %v4081_v14 = vpop.permute.xlu0 %4080  ;;  %v4498_v62 = vmul.f32 %v8354_v48, %v2290_v8  ;;  %v9706_v16 = vrot.slane %v8690_v42, 1  ;;  %v9707_v48 = vmax.f32 %v8382_v47, 0.0  ;;  %v5587_v8 = vld [vmem:[%s5812_s19 + $0x40] sm:$0x3] }
 0x52c   : > { %v4176_v39 = vadd.f32 %v4081_v14, %v3664_v4  ;;  %v9294_v14 = vmax.f32 %v8682_v21, 0.0  ;;  %v5589_v47 = vld [vmem:[%s5812_s19 + $0x60] sm:$0xff]  ;;  %v8741_v21 = vld [vmem:[%s5812_s19 + $0x68] sm:$0xff] }
 0x52d   : > { %v4004_v33 = vpop.permute.xlu1 %4003  ;;  %v4616_v53 = vsel %vm1617_vm2, %v4614_v15, %v9706_v16  ;;  %v3668_v55 = vmul.f32 %v8017_v34, %v9707_v48  ;;  %v9709_v34 = vld [vmem:[#allocation14_spill] sm:$0xff]  ;;  %v9710_v16 = vld [vmem:[#allocation44_spill] sm:$0xff] }
 0x52e   : > { %v4528_v6 = vadd.f32 %v4496_v2, %v4176_v39  ;;  %v4045_v19 = vmul.f32 %v4004_v33, %v9705_v54  ;;  %4493 = vperm.xlu0 %5215, %v4335_v51   ;;  %v5585_v39 = vld [vmem:[%s5812_s19 + $0x48] sm:$0xff]  ;;  %v8708_v51 = vld [vmem:[%s5812_s19 + $0x50] sm:$0xff]  ;;  %v4617_v54 = vrot.slane %v5587_v8, 1  ;;  %v9712_v8 = vmax.f32 %v8400_v61, 0.0 }
 0x52f   : > { %v4085_v4 = vpop.permute.xlu0 %4084  ;;  %v4619_v33 = vrot.slane %v5585_v39, 1  ;;  %v4620_v5 = vrot.slane %v8708_v51, 1  ;;  %v2294_v39 = vmax.f32 %v9710_v16, 0.0 }
 0x530   : > { %v4721_v1 = vadd.f32 %v8365_v63, %v4528_v6  ;;  %v4178_v30 = vadd.f32 %v4085_v4, %v3666_v43  ;;  %4138 = vrot.lane.b32.xlu1 %v4045_v19, %s5706_s28  ;;  %v9708_v63 = vld [vmem:[#allocation40_spill] sm:$0xff]  ;;  %v8723_v19 = vld [vmem:[%s5812_s19 + $0x70] sm:$0x3]  ;;  %v2289_v4 = vmax.f32 %v9709_v34, 0.0 }
 0x531   : > { %v4014_v2 = vpop.permute.xlu1 %4013  ;;  %v2292_v6 = vmax.f32 %v9708_v63, 0.0  ;;  %v4621_v34 = vsel %vm1617_vm2, %v4619_v33, %v4620_v5 }
 0x532   : > { %4753 = vst.msk [vmem:[%s8715_s5] sm:$0xff] %vm326_vm1, %v4721_v1  ;;  %v4530_v43 = vadd.f32 %v4498_v62, %v4178_v30  ;;  %v4047_v15 = vmul.f32 %v4014_v2, %v9294_v14  ;;  %v9711_v1 = vmax.f32 %v8393_v56, 0.0  ;;  %v3670_v14 = vmul.f32 %v8035_v26, %v9712_v8 }
 0x533   : > { %v4089_v48 = vpop.permute.xlu0 %4088  ;;  %v4500_v62 = vmul.f32 %v8387_v32, %v2292_v6  ;;  %v4624_v56 = vrot.slane %v5589_v47, 1  ;;  %v9713_v32 = vld [vmem:[#allocation132_spill] sm:$0xff]  ;;  %v9715_v47 = vld [vmem:[#allocation38_spill] sm:$0xff] }
 0x534   : > { %v3665_v30 = vmul.f32 %v7978_v29, %v9711_v1  ;;  %v4723_v2 = vadd.f32 %v4616_v53, %v4530_v43  ;;  %v4180_v63 = vadd.f32 %v4089_v48, %v3668_v55  ;;  %4142 = vrot.lane.b32.xlu1 %v4047_v15, %s5706_s28  ;;  %v4625_v29 = vrot.slane %v8741_v21, 1  ;;  %v5591_v6 = vld [vmem:[%s5812_s19 + $0x58] sm:$0x3]  ;;  %s5057_s28 = sshll.u32 %s5696_s15, 12  ;;  %s5628_s15 = scalar_lea.vmem %s9045_s6, 4096 }
 0x535   : > { %v4083_v16 = vpop.permute.xlu1 %4082  ;;  %v4334_v53 = vmul.f32 %v9713_v32, %v8314_v13  ;;  %v4497_v55 = vmul.f32 %v8323_v7, %v2289_v4  ;;  %v4622_v33 = vrot.slane %v5591_v6, 1  ;;  %v9714_v43 = vmax.f32 %v8410_v41, 0.0  ;;  %v9716_v1 = vld [vmem:[#allocation48_spill] sm:$0xff]  ;;  %v8764_v6 = vld [vmem:[%s5812_s19 + $0x80] sm:$0xff]  ;;  %p5629_p12 = scmp.ne.s32.totalorder %s9045_s6, %s5628_s15  ;;  %p5636_p2 = scmp.lt.s32.totalorder %s5634_s18, %s5628_s15 }
 0x536   : > { %4755 = vst.msk [vmem:[%s8715_s5 + $0x10] sm:$0xff] %vm326_vm1, %v4723_v2  ;;  %v4532_v61 = vadd.f32 %v4500_v62, %v4180_v63  ;;  %v4177_v26 = vadd.f32 %v4083_v16, %v3665_v30  ;;  %v2291_v48 = vmax.f32 %v9715_v47, 0.0  ;;  %v2296_v8 = vmax.f32 %v9716_v1, 0.0  ;;  %v5592_v16 = vld [vmem:[%s5812_s19 + $0x78] sm:$0xff]  ;;  %v5594_v1 = vld [vmem:[%s5812_s19 + $0x90] sm:$0xff] }
 0x537   : > { %v3667_v15 = vmul.f32 %v7998_v37, %v9714_v43  ;;  %v4093_v13 = vpop.permute.xlu0 %4092  ;;  %v4502_v7 = vmul.f32 %v8434_v23, %v2294_v39  ;;  %v9717_v30 = vmax.f32 %v8417_v59, 0.0  ;;  %v4626_v37 = vsel %vm1617_vm2, %v4624_v56, %v4625_v29  ;;  %p5630_p13 = pnand %p5629_p12, %p5777_p4  ;;  %p5637_p3 = por %p5636_p2, %p5635_p1 }
 0x538   : > { %v4725_v4 = vadd.f32 %v4621_v34, %v4532_v61  ;;  %v4529_v2 = vadd.f32 %v4497_v55, %v4177_v26  ;;  %v4182_v62 = vadd.f32 %v4093_v13, %v3670_v14  ;;  %4488 = vperm.xlu1 %5214, %v4334_v53   ;;  %v4629_v32 = vrot.slane %v5592_v16, 1  ;;  %v9719_v53 = vld [vmem:[#allocation42_spill] sm:$0xff]  ;;  %v8790_v13 = vld [vmem:[%s5812_s19 + $0x98] sm:$0xff] }
 0x539   : > { %v3672_v63 = vmul.f32 %v8057_v45, %v9717_v30  ;;  %v4087_v41 = vpop.permute.xlu1 %4086  ;;  %v4630_v23 = vrot.slane %v8764_v6, 1  ;;  %v4499_v39 = vmul.f32 %v8342_v12, %v2291_v48  ;;  %v9718_v34 = vmax.f32 %v8429_v36, 0.0  ;;  %v5600_v6 = vld [vmem:[%s5812_s19 + $0xc0] sm:$0xff]  ;;  %p5631_p0 = pneg %p5630_p13 }
 0x53a   : > { %4757 = vst.msk [vmem:[%s8715_s5 + $0x20] sm:$0xff] %vm326_vm1, %v4725_v4  ;;  %v4722_v59 = vadd.f32 %v8424_v58, %v4529_v2  ;;  %v4534_v45 = vadd.f32 %v4502_v7, %v4182_v62  ;;  %v4179_v14 = vadd.f32 %v4087_v41, %v3667_v15  ;;  %v2293_v55 = vmax.f32 %v9719_v53, 0.0  ;;  %v9723_v62 = vld [vmem:[#allocation46_spill] sm:$0xff] }
 0x53b   : > { %v3669_v56 = vmul.f32 %v8021_v3, %v9718_v34  ;;  %v2298_v61 = vmax.f32 %v6942_v40, 0.0  ;;  %v9720_v26 = vrot.slane %v8690_v42, 1  ;;  %v4097_v43 = vpop.permute.xlu0 %4096  ;;  %v4504_v58 = vmul.f32 %v8469_v17, %v2296_v8  ;;  %v5598_v34 = vld [vmem:[%s5812_s19 + $0x88] sm:$0x3]  ;;  %p5638_p5 = pnand %p5637_p3, %p5631_p0 }
 0x53c   : > { %4754 = vst.msk [vmem:[%s8715_s5 + $0x8] sm:$0xff] %vm326_vm1, %v4722_v59  ;;  %v4727_v15 = vadd.f32 %v4626_v37, %v4534_v45  ;;  %v4531_v47 = vadd.f32 %v4499_v39, %v4179_v14  ;;  %v4184_v36 = vadd.f32 %v4097_v43, %v3672_v63  ;;  %v9721_v48 = vmax.f32 %v8448_v46, 0.0  ;;  %v5596_v59 = vld [vmem:[%s5812_s19 + $0xa8] sm:$0xff] }
 0x53d   : > { %v4618_v12 = vsel %vm1617_vm2, %v9720_v26, %v4617_v54  ;;  %v4631_v40 = vsel %vm1617_vm2, %v4629_v32, %v4630_v23  ;;  %v4091_v42 = vpop.permute.xlu1 %4090  ;;  %v4634_v54 = vrot.slane %v5594_v1, 1  ;;  %v4635_v17 = vrot.slane %v8790_v13, 1  ;;  %v9732_v13 = vld [vmem:[#allocation85_spill] sm:$0xff] }
 0x53e   : > { %v3674_v3 = vmul.f32 %v8082_v52, %v9721_v48  ;;  %v4501_v8 = vmul.f32 %v8362_v35, %v2293_v55  ;;  %4759 = vst.msk [vmem:[%s8715_s5 + $0x30] sm:$0xff] %vm326_vm1, %v4727_v15  ;;  %v4724_v7 = vadd.f32 %v4618_v12, %v4531_v47  ;;  %v4536_v46 = vadd.f32 %v4504_v58, %v4184_v36  ;;  %v5599_v48 = vld [vmem:[%s5812_s19 + $0xa0] sm:$0x3] }
 0x53f   : > { %v4181_v52 = vadd.f32 %v4091_v42, %v3669_v56  ;;  %v9722_v4 = vmax.f32 %v8444_v38, 0.0  ;;  %v2295_v30 = vmax.f32 %v9723_v62, 0.0  ;;  %v2300_v63 = vmax.f32 %v6964_v50, 0.0  ;;  %v4101_v37 = vpop.permute.xlu0 %4100  ;;  %v9730_v62 = vld [vmem:[#allocation57_spill] sm:$0xff] }
 0x540   : > { %v4623_v35 = vsel %vm1617_vm2, %v4620_v5, %v4622_v33  ;;  %v4506_v41 = vmul.f32 %v8490_v9, %v2298_v61  ;;  %4756 = vst.msk [vmem:[%s8715_s5 + $0x18] sm:$0xff] %vm326_vm1, %v4724_v7  ;;  %v4729_v16 = vadd.f32 %v4631_v40, %v4536_v46  ;;  %v4186_v32 = vadd.f32 %v4101_v37, %v3674_v3  ;;  %v8815_v33 = vld [vmem:[%s5812_s19 + $0xb0] sm:$0xff]  ;;  %v9726_v61 = vld [vmem:[#allocation50_spill] sm:$0xff]  ;;  %v9731_v37 = vld [vmem:[#allocation88_spill] sm:$0xff] }
 0x541   : > { %v3671_v2 = vmul.f32 %v8039_v49, %v9722_v4  ;;  %v4533_v38 = vadd.f32 %v4501_v8, %v4181_v52  ;;  %v9724_v49 = vmax.f32 %v8476_v18, 0.0  ;;  %v4636_v50 = vsel %vm1617_vm2, %v4634_v54, %v4635_v17  ;;  %v4095_v51 = vpop.permute.xlu1 %4094 }
 0x542   : > { %v4639_v5 = vrot.slane %v5596_v59, 1  ;;  %v4640_v9 = vrot.slane %v8815_v33, 1  ;;  %v4503_v45 = vmul.f32 %v8403_v27, %v2295_v30  ;;  %4761 = vst.msk [vmem:[%s8715_s5 + $0x40] sm:$0xff] %vm326_vm1, %v4729_v16  ;;  %v4538_v18 = vadd.f32 %v4506_v41, %v4186_v32  ;;  %v5602_v32 = vld [vmem:[%s5812_s19 + $0xb8] sm:$0x3] }
 0x543   : > { %v3676_v39 = vmul.f32 %v8104_v44, %v9724_v49  ;;  %v4726_v14 = vadd.f32 %v4623_v35, %v4533_v38  ;;  %v4183_v44 = vadd.f32 %v4095_v51, %v3671_v2  ;;  %v4632_v56 = vrot.slane %v5598_v34, 1  ;;  %v4105_v43 = vpop.permute.xlu0 %4104  ;;  %v9735_v51 = vld [vmem:[#allocation55_spill] sm:$0xff] }
 0x544   : > { %v9725_v53 = vmax.f32 %v8463_v25, 0.0  ;;  %v2297_v26 = vmax.f32 %v9726_v61, 0.0  ;;  %v9727_v12 = vrot.slane %v8723_v19, 1  ;;  %v4508_v58 = vmul.f32 %v8510_v0, %v2300_v63 }
 0x545   : > { %4758 = vst.msk [vmem:[%s8715_s5 + $0x28] sm:$0xff] %vm326_vm1, %v4726_v14  ;;  %v4731_v15 = vadd.f32 %v4636_v50, %v4538_v18  ;;  %v4535_v47 = vadd.f32 %v4503_v45, %v4183_v44  ;;  %v4188_v25 = vadd.f32 %v4105_v43, %v3676_v39  ;;  %v4099_v36 = vpop.permute.xlu1 %4098  ;;  %v4637_v3 = vrot.slane %v5599_v48, 1  ;;  %v9734_v39 = vld [vmem:[#allocation67_spill] sm:$0xff]  ;;  %v9742_v48 = vld [vmem:[#allocation90_spill] sm:$0xff] }
 0x546   : > { %v3673_v55 = vmul.f32 %v8060_v28, %v9725_v53  ;;  %v4628_v27 = vsel %vm1617_vm2, %v4625_v29, %v9727_v12  ;;  %v4641_v28 = vsel %vm1617_vm2, %v4639_v5, %v4640_v9  ;;  %v4505_v19 = vmul.f32 %v8452_v10, %v2297_v26  ;;  %v9736_v14 = vld [vmem:[#allocation87_spill] sm:$0xff] }
 0x547   : > { %4763 = vst.msk [vmem:[%s8715_s5 + $0x50] sm:$0xff] %vm326_vm1, %v4731_v15  ;;  %v4728_v21 = vadd.f32 %v4628_v27, %v4535_v47  ;;  %v4540_v29 = vadd.f32 %v4508_v58, %v4188_v25  ;;  %v2299_v40 = vmax.f32 %v6953_v57, 0.0  ;;  %v4633_v42 = vsel %vm1617_vm2, %v4630_v23, %v4632_v56  ;;  %v5601_v23 = vld [vmem:[%s5812_s19 + $0xc8] sm:$0xff]  ;;  %v5603_v56 = vld [vmem:[%s5812_s19 + $0xd8] sm:$0xff]  ;;  %v9737_v26 = vld [vmem:[#allocation91_spill] sm:$0xff] }
 0x548   : > { %v4185_v0 = vadd.f32 %v4099_v36, %v3673_v55  ;;  %v9728_v1 = vmax.f32 %v8486_v31, 0.0  ;;  %v4644_v4 = vrot.slane %v5600_v6, 1  ;;  %v4645_v31 = vrot.slane %v5601_v23, 1  ;;  %v5604_v55 = vld [vmem:[%s5812_s19 + $0xe0] sm:$0xff]  ;;  %v5606_v6 = vld [vmem:[%s5812_s19 + $0xf0] sm:$0xff]  ;;  %v5607_v23 = vld [vmem:[%s5812_s19 + $0xf8] sm:$0xff] }
 0x549   : > { %4760 = vst.msk [vmem:[%s8715_s5 + $0x38] sm:$0xff] %vm326_vm1, %v4728_v21  ;;  %v4733_v10 = vadd.f32 %v4641_v28, %v4540_v29  ;;  %v4507_v7 = vmul.f32 %v8478_v22, %v2299_v40  ;;  %v4103_v46 = vpop.permute.xlu1 %4102  ;;  %v2302_v30 = vmax.f32 %v9730_v62, 0.0  ;;  %v4638_v22 = vsel %vm1617_vm2, %v4635_v17, %v4637_v3  ;;  %v9739_v27 = vld [vmem:[#allocation69_spill] sm:$0xff]  ;;  %v9741_v28 = vld [vmem:[#allocation92_spill] sm:$0xff]  ;;  %v5605_v29 = vld [vmem:[%s5812_s19 + $0xd0] sm:$0x3] }
 0x54a   : > { %v3675_v54 = vmul.f32 %v8084_v11, %v9728_v1  ;;  %v4537_v8 = vadd.f32 %v4505_v19, %v4185_v0  ;;  %v9729_v11 = vmax.f32 %v8496_v60, 0.0  ;;  %v4646_v60 = vsel %vm1617_vm2, %v4644_v4, %v4645_v31  ;;  %v9740_v58 = vld [vmem:[#allocation61_spill] sm:$0xff]  ;;  %v9744_v40 = vld [vmem:[#allocation68_spill] sm:$0xff]  ;;  %v9745_v1 = vld [vmem:[#allocation59_spill] sm:$0xff] }
 0x54b   : > { %4765 = vst.msk [vmem:[%s8715_s5 + $0x60] sm:$0xff] %vm326_vm1, %v4733_v10  ;;  %v4510_v41 = vmul.f32 %v9731_v37, %v2302_v30  ;;  %v4642_v49 = vrot.slane %v5602_v32, 1  ;;  %v9733_v17 = vmax.f32 %v9732_v13, 0.0  ;;  %v2301_v59 = vmax.f32 %v9735_v51, 0.0  ;;  %v9749_v30 = vld [vmem:[#allocation71_spill] sm:$0xff] }
 0x54c   : > { %v4730_v52 = vadd.f32 %v4633_v42, %v4537_v8  ;;  %v4187_v57 = vadd.f32 %v4103_v46, %v3675_v54  ;;  %v3678_v2 = vmul.f32 %v8128_v20, %v9729_v11  ;;  %v4109_v35 = vpop.permute.xlu0 %4108  ;;  %v4649_v53 = vrot.slane %v5603_v56, 1 }
 0x54d   : > { %v3677_v50 = vmul.f32 %v9734_v39, %v9733_v17  ;;  %v4509_v18 = vmul.f32 %v9736_v14, %v2301_v59  ;;  %v4643_v34 = vsel %vm1617_vm2, %v4640_v9, %v4642_v49  ;;  %v4650_v61 = vrot.slane %v5604_v55, 1  ;;  %v5608_v49 = vld [vmem:[%s5812_s19 + $0xe8] sm:$0x3]  ;;  %v9755_v59 = vld [vmem:[#allocation63_spill] sm:$0xff] }
 0x54e   : > { %4762 = vst.msk [vmem:[%s8715_s5 + $0x48] sm:$0xff] %vm326_vm1, %v4730_v52  ;;  %v4539_v63 = vadd.f32 %v4507_v7, %v4187_v57  ;;  %v4190_v16 = vadd.f32 %v4109_v35, %v3678_v2  ;;  %v9738_v12 = vmax.f32 %v9737_v26, 0.0  ;;  %v2304_v15 = vmax.f32 %v9740_v58, 0.0  ;;  %v9746_v7 = vld [vmem:[#allocation86_spill] sm:$0xff]  ;;  %v9747_v2 = vld [vmem:[#allocation95_spill] sm:$0xff]  ;;  %v9759_v58 = vld [vmem:[#allocation73_spill] sm:$0xff] }
 0x54f   : > { %v4651_v9 = vsel %vm1617_vm2, %v4649_v53, %v4650_v61  ;;  %v4647_v0 = vrot.slane %v5605_v29, 1  ;;  %v9743_v3 = vmax.f32 %v9742_v48, 0.0  ;;  %v2303_v54 = vmax.f32 %v9745_v1, 0.0  ;;  %v9752_v17 = vld [vmem:[#allocation94_spill] sm:$0xff]  ;;  %v5610_v26 = vld [vmem:[%s5812_s19 + $0x110] sm:$0xff] }
 0x550   : > { %v4732_v38 = vadd.f32 %v4638_v22, %v4539_v63  ;;  %v4542_v20 = vadd.f32 %v4510_v41, %v4190_v16  ;;  %v3680_v43 = vmul.f32 %v9739_v27, %v9738_v12  ;;  %v4512_v36 = vmul.f32 %v9741_v28, %v2304_v15  ;;  %v9750_v63 = vld [vmem:[#allocation65_spill] sm:$0xff]  ;;  %v9751_v16 = vld [vmem:[#allocation96_spill] sm:$0xff]  ;;  %v5609_v53 = vld [vmem:[%s5812_s19 + $0x108] sm:$0xff] }
 0x551   : > { %v3679_v42 = vmul.f32 %v9744_v40, %v9743_v3  ;;  %v4511_v46 = vmul.f32 %v9746_v7, %v2303_v54  ;;  %v4648_v57 = vsel %vm1617_vm2, %v4645_v31, %v4647_v0  ;;  %v4654_v4 = vrot.slane %v5606_v6, 1  ;;  %v9757_v27 = vld [vmem:[#allocation99_spill] sm:$0xff]  ;;  %v5611_v0 = vld [vmem:[%s5812_s19 + $0x100] sm:$0x3]  ;;  %v9762_v3 = vld [vmem:[#allocation98_spill] sm:$0xff] }
 0x552   : > { %4764 = vst.msk [vmem:[%s8715_s5 + $0x58] sm:$0xff] %vm326_vm1, %v4732_v38  ;;  %v4735_v5 = vadd.f32 %v4646_v60, %v4542_v20  ;;  %v4107_v45 = vpop.permute.xlu1 %4106  ;;  %v4655_v11 = vrot.slane %v5607_v23, 1  ;;  %v9748_v62 = vmax.f32 %v9747_v2, 0.0  ;;  %v2306_v35 = vmax.f32 %v9750_v63, 0.0  ;;  %v9765_v54 = vld [vmem:[#allocation15_spill] sm:$0xff]  ;;  %v5613_v2 = vld [vmem:[%s5812_s19 + $0x128] sm:$0xff] }
 0x553   : > { %v4189_v44 = vadd.f32 %v4107_v45, %v3677_v50  ;;  %v4652_v13 = vrot.slane %v5608_v49, 1  ;;  %v9753_v39 = vmax.f32 %v9752_v17, 0.0  ;;  %v9754_v50 = vld [vmem:[#allocation70_spill] sm:$0xff]  ;;  %v4659_v55 = vrot.slane %v5609_v53, 1  ;;  %v9769_v63 = vld [vmem:[#allocation75_spill] sm:$0xff] }
 0x554   : > { %4767 = vst.msk [vmem:[%s8715_s5 + $0x70] sm:$0xff] %vm326_vm1, %v4735_v5  ;;  %v3682_v22 = vmul.f32 %v9749_v30, %v9748_v62  ;;  %v4514_v38 = vmul.f32 %v9751_v16, %v2306_v35  ;;  %v4656_v31 = vsel %vm1617_vm2, %v4654_v4, %v4655_v11  ;;  %v2305_v5 = vmax.f32 %v9755_v59, 0.0  ;;  %v5612_v4 = vld [vmem:[%s5812_s19 + $0x120] sm:$0xff]  ;;  %v9767_v30 = vld [vmem:[#allocation103_spill] sm:$0xff] }
 0x555   : > { %v4541_v47 = vadd.f32 %v4509_v18, %v4189_v44  ;;  %v3681_v51 = vmul.f32 %v9754_v50, %v9753_v39  ;;  %v9756_v18 = vld [vmem:[#allocation89_spill] sm:$0xff]  ;;  %v4653_v56 = vsel %vm1617_vm2, %v4650_v61, %v4652_v13  ;;  %v4660_v12 = vrot.slane %v5610_v26, 1  ;;  %v5614_v13 = vld [vmem:[%s5812_s19 + $0x118] sm:$0x3]  ;;  %v9772_v39 = vld [vmem:[#allocation102_spill] sm:$0xff] }
 0x556   : > { %v4113_v25 = vpop.permute.xlu0 %4112  ;;  %v4513_v44 = vmul.f32 %v9756_v18, %v2305_v5  ;;  %v4657_v48 = vrot.slane %v5611_v0, 1  ;;  %v9763_v40 = vmax.f32 %v9762_v3, 0.0  ;;  %v4664_v23 = vrot.slane %v5612_v4, 1  ;;  %v9775_v5 = vld [vmem:[#allocation6_spill] sm:$0xff] }
 0x557   : > { %v4734_v33 = vadd.f32 %v4643_v34, %v4541_v47  ;;  %v4192_v19 = vadd.f32 %v4113_v25, %v3680_v43  ;;  %v9758_v43 = vmax.f32 %v9757_v27, 0.0  ;;  %v9760_v47 = vld [vmem:[#allocation17_spill] sm:$0xff]  ;;  %v4661_v61 = vsel %vm1617_vm2, %v4659_v55, %v4660_v12  ;;  %v5615_v55 = vld [vmem:[%s5812_s19 + $0x138] sm:$0xff] }
 0x558   : > { %v2308_v25 = vmax.f32 %v9760_v47, 0.0  ;;  %v4658_v6 = vsel %vm1617_vm2, %v4655_v11, %v4657_v48  ;;  %v4665_v62 = vrot.slane %v5613_v2, 1  ;;  %v4662_v17 = vrot.slane %v5614_v13, 1  ;;  %v5616_v27 = vld [vmem:[%s5812_s19 + $0x140] sm:$0xff]  ;;  %v5617_v48 = vld [vmem:[%s5812_s19 + $0x130] sm:$0x3] }
 0x559   : > { %4766 = vst.msk [vmem:[%s8715_s5 + $0x68] sm:$0xff] %vm326_vm1, %v4734_v33  ;;  %v4544_v21 = vadd.f32 %v4512_v36, %v4192_v19  ;;  %v3684_v15 = vmul.f32 %v9759_v58, %v9758_v43  ;;  %v9761_v33 = vld [vmem:[#allocation100_spill] sm:$0xff]  ;;  %v9773_v50 = vmax.f32 %v9772_v39, 0.0  ;;  %v4669_v26 = vrot.slane %v5615_v55, 1  ;;  %v9777_v58 = vld [vmem:[#allocation107_spill] sm:$0xff]  ;;  %v9779_v47 = vld [vmem:[#allocation77_spill] sm:$0xff] }
 0x55a   : > { %v4516_v19 = vmul.f32 %v9761_v33, %v2308_v25  ;;  %v4666_v11 = vsel %vm1617_vm2, %v4664_v23, %v4665_v62  ;;  %v4663_v53 = vsel %vm1617_vm2, %v4660_v12, %v4662_v17  ;;  %v4670_v43 = vrot.slane %v5616_v27, 1  ;;  %v5618_v23 = vld [vmem:[%s5812_s19 + $0x150] sm:$0xff]  ;;  %v5620_v17 = vld [vmem:[%s5812_s19 + $0x148] sm:$0x3] }
 0x55b   : > { %v4737_v10 = vadd.f32 %v4651_v9, %v4544_v21  ;;  %v4667_v3 = vrot.slane %v5617_v48, 1  ;;  %v4674_v2 = vrot.slane %v5618_v23, 1  ;;  %v4672_v39 = vrot.slane %v5620_v17, 1 }
 0x55c   : > { %v4111_v8 = vpop.permute.xlu1 %4110  ;;  %v4671_v12 = vsel %vm1617_vm2, %v4669_v26, %v4670_v43  ;;  %v5621_v26 = vld [vmem:[%s5812_s19 + $0x168] sm:$0xff] }
 0x55d   : > { %4769 = vst.msk [vmem:[%s8715_s5 + $0x80] sm:$0xff] %vm326_vm1, %v4737_v10  ;;  %v4191_v52 = vadd.f32 %v4111_v8, %v3679_v42  ;;  %v9764_v42 = vld [vmem:[#allocation72_spill] sm:$0xff]  ;;  %v2307_v10 = vmax.f32 %v9765_v54, 0.0  ;;  %v4668_v4 = vsel %vm1617_vm2, %v4665_v62, %v4667_v3  ;;  %v4673_v55 = vsel %vm1617_vm2, %v4670_v43, %v4672_v39  ;;  %v5623_v3 = vld [vmem:[%s5812_s19 + $0x160] sm:$0x3] }
 0x55e   : > { %v3683_v1 = vmul.f32 %v9764_v42, %v9763_v40  ;;  %v9782_v40 = vld [vmem:[#allocation106_spill] sm:$0xff]  ;;  %v4679_v27 = vrot.slane %v5621_v26, 1 }
 0x55f   : > { %v4543_v37 = vadd.f32 %v4511_v46, %v4191_v52  ;;  %v9766_v46 = vld [vmem:[#allocation93_spill] sm:$0xff]  ;;  %v9783_v42 = vmax.f32 %v9782_v40, 0.0  ;;  %v4677_v40 = vrot.slane %v5623_v3, 1 }
 0x560   : > { %v4117_v41 = vpop.permute.xlu0 %4116  ;;  %v4515_v52 = vmul.f32 %v9766_v46, %v2307_v10  ;;  %v9785_v10 = vld [vmem:[#allocation19_spill] sm:$0xff] }
 0x561   : > { %v4736_v60 = vadd.f32 %v4648_v57, %v4543_v37  ;;  %v4194_v20 = vadd.f32 %v4117_v41, %v3682_v22  ;;  %v9768_v22 = vmax.f32 %v9767_v30, 0.0  ;;  %v9770_v37 = vld [vmem:[#allocation20_spill] sm:$0xff] }
 0x562   : > { %v2310_v41 = vmax.f32 %v9770_v37, 0.0  ;;  %v5619_v30 = vld [vmem:[%s5812_s19 + $0x158] sm:$0xff]  ;;  %v9789_v37 = vld [vmem:[#allocation79_spill] sm:$0xff] }
 0x563   : > { %4768 = vst.msk [vmem:[%s8715_s5 + $0x78] sm:$0xff] %vm326_vm1, %v4736_v60  ;;  %v4546_v32 = vadd.f32 %v4514_v38, %v4194_v20  ;;  %v3686_v35 = vmul.f32 %v9769_v63, %v9768_v22  ;;  %v9771_v60 = vld [vmem:[#allocation104_spill] sm:$0xff]  ;;  %v4675_v22 = vrot.slane %v5619_v30, 1  ;;  %v9787_v63 = vld [vmem:[#allocation111_spill] sm:$0xff] }
 0x564   : > { %v4518_v20 = vmul.f32 %v9771_v60, %v2310_v41 }
 0x565   : > { %v4739_v45 = vadd.f32 %v4656_v31, %v4546_v32  ;;  %v4676_v62 = vsel %vm1617_vm2, %v4674_v2, %v4675_v22  ;;  %v4678_v23 = vsel %vm1617_vm2, %v4675_v22, %v4677_v40 }
 0x566   : > { %v4115_v14 = vpop.permute.xlu1 %4114 }
 0x567   : > { %4771 = vst.msk [vmem:[%s8715_s5 + $0x90] sm:$0xff] %vm326_vm1, %v4739_v45  ;;  %v4193_v34 = vadd.f32 %v4115_v14, %v3681_v51  ;;  %v9774_v51 = vld [vmem:[#allocation74_spill] sm:$0xff]  ;;  %v2309_v45 = vmax.f32 %v9775_v5, 0.0 }
 0x568   : > { %v3685_v59 = vmul.f32 %v9774_v51, %v9773_v50  ;;  %v9792_v50 = vld [vmem:[#allocation110_spill] sm:$0xff] }
 0x569   : > { %v4545_v28 = vadd.f32 %v4513_v44, %v4193_v34  ;;  %v9776_v44 = vld [vmem:[#allocation97_spill] sm:$0xff]  ;;  %v9793_v51 = vmax.f32 %v9792_v50, 0.0 }
 0x56a   : > { %v4121_v36 = vpop.permute.xlu0 %4120  ;;  %v4517_v34 = vmul.f32 %v9776_v44, %v2309_v45  ;;  %v9795_v45 = vld [vmem:[#allocation23_spill] sm:$0xff] }
 0x56b   : > { %v4738_v9 = vadd.f32 %v4653_v56, %v4545_v28  ;;  %v4196_v21 = vadd.f32 %v4121_v36, %v3684_v15  ;;  %v9778_v15 = vmax.f32 %v9777_v58, 0.0  ;;  %v9780_v28 = vld [vmem:[#allocation22_spill] sm:$0xff]  ;;  %v5622_v58 = vld [vmem:[%s5812_s19 + $0x170] sm:$0xff] }
 0x56c   : > { %v2312_v36 = vmax.f32 %v9780_v28, 0.0  ;;  %v9799_v28 = vld [vmem:[#allocation82_spill] sm:$0xff] }
 0x56d   : > { %4770 = vst.msk [vmem:[%s8715_s5 + $0x88] sm:$0xff] %vm326_vm1, %v4738_v9  ;;  %v4548_v29 = vadd.f32 %v4516_v19, %v4196_v21  ;;  %v3688_v25 = vmul.f32 %v9779_v47, %v9778_v15  ;;  %v9781_v9 = vld [vmem:[#allocation108_spill] sm:$0xff]  ;;  %v4680_v15 = vrot.slane %v5622_v58, 1  ;;  %v9797_v47 = vld [vmem:[#allocation115_spill] sm:$0xff]  ;;  %v5627_v58 = vld [vmem:[%s5812_s19 + $0x180] sm:$0xff] }
 0x56e   : > { %v4520_v21 = vmul.f32 %v9781_v9, %v2312_v36 }
 0x56f   : > { %v4741_v8 = vadd.f32 %v4661_v61, %v4548_v29  ;;  %v4681_v43 = vsel %vm1617_vm2, %v4679_v27, %v4680_v15 }
 0x570   : > { %v4119_v7 = vpop.permute.xlu1 %4118 }
 0x571   : > { %4773 = vst.msk [vmem:[%s8715_s5 + $0xa0] sm:$0xff] %vm326_vm1, %v4741_v8  ;;  %v4195_v57 = vadd.f32 %v4119_v7, %v3683_v1  ;;  %v9784_v1 = vld [vmem:[#allocation76_spill] sm:$0xff]  ;;  %v2311_v8 = vmax.f32 %v9785_v10, 0.0 }
 0x572   : > { %v3687_v54 = vmul.f32 %v9784_v1, %v9783_v42  ;;  %v9802_v42 = vld [vmem:[#allocation114_spill] sm:$0xff] }
 0x573   : > { %v4547_v16 = vadd.f32 %v4515_v52, %v4195_v57  ;;  %v9786_v52 = vld [vmem:[#allocation101_spill] sm:$0xff]  ;;  %v9803_v1 = vmax.f32 %v9802_v42, 0.0 }
 0x574   : > { %v4125_v38 = vpop.permute.xlu0 %4124  ;;  %v4519_v57 = vmul.f32 %v9786_v52, %v2311_v8  ;;  %v9805_v8 = vld [vmem:[#allocation30_spill] sm:$0xff] }
 0x575   : > { %v4740_v31 = vadd.f32 %v4658_v6, %v4547_v16  ;;  %v4198_v32 = vadd.f32 %v4125_v38, %v3686_v35  ;;  %v9788_v35 = vmax.f32 %v9787_v63, 0.0  ;;  %v9790_v16 = vld [vmem:[#allocation26_spill] sm:$0xff]  ;;  %v5624_v63 = vld [vmem:[%s5812_s19 + $0x178] sm:$0x3] }
 0x576   : > { %v2314_v38 = vmax.f32 %v9790_v16, 0.0 }
 0x577   : > { %4772 = vst.msk [vmem:[%s8715_s5 + $0x98] sm:$0xff] %vm326_vm1, %v4740_v31  ;;  %v4550_v49 = vadd.f32 %v4518_v20, %v4198_v32  ;;  %v3690_v41 = vmul.f32 %v9789_v37, %v9788_v35  ;;  %v9791_v31 = vld [vmem:[#allocation112_spill] sm:$0xff]  ;;  %v4682_v35 = vrot.slane %v5624_v63, 1  ;;  %v9807_v37 = vmax.f32 %v8666_v24, 0.0  ;;  %v5626_v24 = vld [vmem:[%s5812_s19 + $0x188] sm:$0xff] }
 0x578   : > { %v4522_v32 = vmul.f32 %v9791_v31, %v2314_v38  ;;  %v9809_v38 = vld [vmem:[#allocation13_spill] sm:$0xff] }
 0x579   : > { %v4743_v14 = vadd.f32 %v4666_v11, %v4550_v49  ;;  %v9810_v31 = vld [vmem:[#allocation113_spill] sm:$0xff]  ;;  %v4683_v22 = vsel %vm1617_vm2, %v4680_v15, %v4682_v35  ;;  %v4684_v15 = vrot.slane %v5627_v58, 1 }
 0x57a   : > { %v4123_v18 = vpop.permute.xlu1 %4122 }
 0x57b   : > { %4775 = vst.msk [vmem:[%s8715_s5 + $0xb0] sm:$0xff] %vm326_vm1, %v4743_v14  ;;  %v4197_v56 = vadd.f32 %v4123_v18, %v3685_v59  ;;  %v9794_v59 = vld [vmem:[#allocation78_spill] sm:$0xff]  ;;  %v2313_v14 = vmax.f32 %v9795_v45, 0.0  ;;  %v9813_v45 = vld [vmem:[#allocation84_spill] sm:$0xff] }
 0x57c   : > { %v3689_v5 = vmul.f32 %v9794_v59, %v9793_v51  ;;  %v4685_v51 = vrot.slane %v5626_v24, 1  ;;  %v9811_v59 = vld [vmem:[#allocation116_spill] sm:$0xff] }
 0x57d   : > { %v4549_v33 = vadd.f32 %v4517_v34, %v4197_v56  ;;  %v9796_v34 = vld [vmem:[#allocation105_spill] sm:$0xff] }
 0x57e   : > { %v4129_v19 = vpop.permute.xlu0 %4128  ;;  %v4521_v56 = vmul.f32 %v9796_v34, %v2313_v14 }
 0x57f   : > { %v4742_v61 = vadd.f32 %v4663_v53, %v4549_v33  ;;  %v4200_v29 = vadd.f32 %v4129_v19, %v3688_v25  ;;  %v9798_v25 = vmax.f32 %v9797_v47, 0.0  ;;  %v9800_v33 = vld [vmem:[#allocation29_spill] sm:$0xff]  ;;  %v9815_v47 = vld [vmem:[#allocation119_spill] sm:$0xff] }
 0x580   : > { %v2316_v19 = vmax.f32 %v9800_v33, 0.0  ;;  %v9818_v33 = vld [vmem:[#allocation31_spill] sm:$0xff] }
 0x581   : > { %4774 = vst.msk [vmem:[%s8715_s5 + $0xa8] sm:$0xff] %vm326_vm1, %v4742_v61  ;;  %v4552_v0 = vadd.f32 %v4520_v21, %v4200_v29  ;;  %v3692_v36 = vmul.f32 %v9799_v28, %v9798_v25  ;;  %v9801_v61 = vld [vmem:[#allocation118_spill] sm:$0xff]  ;;  %v9816_v25 = vmax.f32 %v9815_v47, 0.0  ;;  %v9817_v28 = vld [vmem:[#allocation83_spill] sm:$0xff] }
 0x582   : > { %v4524_v29 = vmul.f32 %v9801_v61, %v2316_v19  ;;  %v2318_v19 = vmax.f32 %v9818_v33, 0.0 }
 0x583   : > { %v4745_v7 = vadd.f32 %v4671_v12, %v4552_v0 }
 0x584   : > { %v4127_v46 = vpop.permute.xlu1 %4126 }
 0x585   : > { %4777 = vst.msk [vmem:[%s8715_s5 + $0xc0] sm:$0xff] %vm326_vm1, %v4745_v7  ;;  %v4199_v6 = vadd.f32 %v4127_v46, %v3687_v54  ;;  %v9804_v54 = vld [vmem:[#allocation80_spill] sm:$0xff]  ;;  %v2315_v7 = vmax.f32 %v9805_v8, 0.0 }
 0x586   : > { %v3691_v10 = vmul.f32 %v9804_v54, %v9803_v1 }
 0x587   : > { %v4551_v60 = vadd.f32 %v4519_v57, %v4199_v6  ;;  %v9806_v57 = vld [vmem:[#allocation109_spill] sm:$0xff] }
 0x588   : > { %v4133_v20 = vpop.permute.xlu0 %4132  ;;  %v4523_v6 = vmul.f32 %v9806_v57, %v2315_v7 }
 0x589   : > { %v4744_v11 = vadd.f32 %v4668_v4, %v4551_v60  ;;  %v4202_v49 = vadd.f32 %v4133_v20, %v3690_v41  ;;  %v9808_v41 = vld [vmem:[#allocation81_spill] sm:$0xff]  ;;  %v2317_v60 = vmax.f32 %v9809_v38, 0.0 }
 0x58a   : > { %v3693_v16 = vmul.f32 %v9808_v41, %v9807_v37 }
 0x58b   : > { %4776 = vst.msk [vmem:[%s8715_s5 + $0xb8] sm:$0xff] %vm326_vm1, %v4744_v11  ;;  %v4554_v13 = vadd.f32 %v4522_v32, %v4202_v49  ;;  %v4525_v32 = vmul.f32 %v9810_v31, %v2317_v60 }
 0x58d   : > { %v4747_v18 = vadd.f32 %v4676_v62, %v4554_v13  ;;  %v5625_v13 = vld [vmem:[%s5812_s19 + $0x190] sm:$0x3]  ;;  %s9043_s19 = scalar_lea.hbm %s9099_s3, %s5057_s28 }
 0x58e   : > { %v4131_v44 = vpop.permute.xlu1 %4130  ;;  %v4687_v17 = vrot.slane %v5625_v13, 1 }
 0x58f   : > { %4779 = vst.msk [vmem:[%s8715_s5 + $0xd0] sm:$0xff] %vm326_vm1, %v4747_v18  ;;  %v4201_v53 = vadd.f32 %v4131_v44, %v3689_v5  ;;  %v9812_v5 = vmax.f32 %v9811_v59, 0.0  ;;  %v9814_v18 = vld [vmem:[#allocation33_spill] sm:$0xff] }
 0x590   : > { %v2319_v44 = vmax.f32 %v9814_v18, 0.0 }
 0x591   : > { %v4553_v9 = vadd.f32 %v4521_v56, %v4201_v53  ;;  %v3695_v14 = vmul.f32 %v9813_v45, %v9812_v5 }
 0x592   : > { %v4137_v21 = vpop.permute.xlu0 %4136 }
 0x593   : > { %v4746_v12 = vadd.f32 %v4673_v55, %v4553_v9  ;;  %v4204_v0 = vadd.f32 %v4137_v21, %v3692_v36  ;;  %v4688_v55 = vsel %vm1617_vm2, %v4685_v51, %v4687_v17  ;;  %v3694_v36 = vmul.f32 %v9817_v28, %v9816_v25 }
 0x595   : > { %4778 = vst.msk [vmem:[%s8715_s5 + $0xc8] sm:$0xff] %vm326_vm1, %v4746_v12  ;;  %v4556_v48 = vadd.f32 %v4524_v29, %v4204_v0  ;;  %v4686_v29 = vsel %vm1617_vm2, %v4684_v15, %v4685_v51 }
 0x597   : > { %v4749_v46 = vadd.f32 %v4681_v43, %v4556_v48 }
 0x598   : > { %v4135_v52 = vpop.permute.xlu1 %4134 }
 0x599   : > { %4781 = vst.msk [vmem:[%s8715_s5 + $0xe0] sm:$0xff] %vm326_vm1, %v4749_v46  ;;  %v4203_v4 = vadd.f32 %v4135_v52, %v3691_v10 }
 0x59b   : > { %v4555_v2 = vadd.f32 %v4523_v6, %v4203_v4 }
 0x59c   : > { %v4141_v49 = vpop.permute.xlu0 %4140 }
 0x59d   : > { %v4748_v30 = vadd.f32 %v4678_v23, %v4555_v2  ;;  %v4206_v21 = vadd.f32 %v4141_v49, %v3694_v36 }
 0x59f   : > { %4780 = vst.msk [vmem:[%s8715_s5 + $0xd8] sm:$0xff] %vm326_vm1, %v4748_v30 }
 0x5a2   : > { %v4139_v20 = vpop.permute.xlu1 %4138 }
 0x5a3   : > { %v4205_v11 = vadd.f32 %v4139_v20, %v3693_v16 }
 0x5a5   : > { %v4557_v62 = vadd.f32 %v4525_v32, %v4205_v11 }
 0x5a6   : > { %v4143_v50 = vpop.permute.xlu1 %4142 }
 0x5a7   : > { %v4750_v39 = vadd.f32 %v4683_v22, %v4557_v62  ;;  %v4207_v56 = vadd.f32 %v4143_v50, %v3695_v14 }
 0x5a9   : > { %4782 = vst.msk [vmem:[%s8715_s5 + $0xe8] sm:$0xff] %vm326_vm1, %v4750_v39  ;;  %v4494_v34 = vpop.permute.xlu0 %4493 }
 0x5aa   : > { %v4527_v53 = vmul.f32 %v4494_v34, %v2319_v44 }
 0x5ac   : > { %v4559_v26 = vadd.f32 %v4527_v53, %v4207_v56 }
 0x5ae   : > { %v4752_v27 = vadd.f32 %v4688_v55, %v4559_v26 }
 0x5b0   : > { %4784 = vst.msk [vmem:[%s8715_s5 + $0xf8] sm:$0xff] %vm326_vm1, %v4752_v27 }
 0x5b3   : > { %v4489_v9 = vpop.permute.xlu1 %4488 }
 0x5b4   : > { %v4526_v61 = vmul.f32 %v4489_v9, %v2318_v19 }
 0x5b6   : > { %v4558_v12 = vadd.f32 %v4526_v61, %v4206_v21 }
 0x5b8   : > { %v4751_v0 = vadd.f32 %v4686_v29, %v4558_v12 }
 0x5ba   : > { %4783 = vst.msk [vmem:[%s8715_s5 + $0xf0] sm:$0xff] %vm326_vm1, %v4751_v0 }
 0x5bb   : > { %5641 = shalt.err (!%p5638_p5)
}
 0x5bc   : > { %s5642_s21 = scalar_lea.hbm %s9043_s19, 4096  ;;  %s5646_s27 = scalar_lea.hbm %s9099_s3, 8192 }
 0x5bd   : > { %p5643_p6 = scmp.ne.s32.totalorder %s9043_s19, %s5642_s21  ;;  %p5647_p10 = scmp.lt.s32.totalorder %s9043_s19, %s9099_s3 }
 0x5be   : > { %p5648_p11 = scmp.lt.s32.totalorder %s5646_s27, %s5642_s21 }
 0x5bf   : > { %p5644_p7 = pnand %p5643_p6, %p5777_p4 }
 0x5c0   : > { %p5649_p12 = por %p5648_p11, %p5647_p10 }
 0x5c1   : > { %p5645_p9 = pneg %p5644_p7 }
 0x5c3   : > { %p5650_p13 = pnand %p5649_p12, %p5645_p9 }
 0x5c5   : > { %5653 = shalt.err (!%p5650_p13)
}
 0x5c6   : > { %s5715_s4 = smov 128   ;;  %s5716_s5 = smov 8  }
 0x5c7   : > { %5083 = dma.vmem_to_hbm [thread:$0]  (%p5777_p4), %s9045_s6, 4096, %s9043_s19, %s9051_s9, %s5715_s4, %s5715_s4, %s5716_s5  }
 0x5c8 PF: > { %p5089_p0 = scmp.ge.s32.totalorder %s5704_s17, 2  ;;  %s4817_s28 = sand.u32 1, %s5684_s12  }
 0x5c9   : > { %s4818_s7 = scalar_lea.sflag [#allocation3], %s4817_s28 }
 0x5ca   : > { %p5086_p1 = pnand %p5089_p0, %p5784_p8 }
 0x5cc   : > { %p5087_p2 = pneg %p5086_p1 }
 0x5ce   : > { %5679 = dma.done.wait (%p5087_p2), %s4818_s7, 4096  }
 0x5cf   : > { %5681 = vsyncadd (%p5087_p2), %s4818_s7, 4294963200  ;;  %s16_s17 = sadd.s32 1, %s5704_s17   ;;  %s9819_s12 = smov %s5688_s13 }
 0x5d0   : > { %p13_p3 = scmp.ge.s32.totalorder %s16_s17, 4   ;;  %s9820_s13 = smov %s5692_s14 }
 0x5d1   : > { %s9821_s14 = smov %s5790_s25  ;;  %s9822_s15 = smov %s5700_s16 }
 0x5d2   : > { %s9823_s16 = smov %s9825_s20  ;;  %15 = sbr.rel (!%p13_p3) target bundleno = 4 (0x4), region = 70 }
 0x5d7   :  { %4823 = vsyncpa [#allocation3], 1 }
 0x5d8   :  { %4825 = vsyncpa [#allocation3 + $0x1], 1 }

</bundles_post_ra>
